<compile_context>
chip_gen: v7x
topology: tpu7x:2x2x1
jax: 0.10.0
libtpu: 0.0.40
codegen_flags: <defaults>
</compile_context>

<pallas_src>
import functools
import math

import jax
import jax.numpy as jnp
from jax import lax
from jax.experimental import pallas as pl
from jax.experimental.pallas import tpu as pltpu

# ----------------------------- configuration --------------------------------
B = 2               # batch
C_IN = 3            # image channels
IMG = 16            # image height/width
PATCH = 8           # patch size
GRID_HW = IMG // PATCH
N_PATCH = GRID_HW * GRID_HW       # 4
T = N_PATCH + 1                   # real tokens incl. class token = 5
TP = 8                            # token axis padded to one sublane tile
D = 32              # hidden dim (stands in for 1024)
H = 4               # attention heads
DH = D // H         # 8
D_MLP = 64          # MLP hidden dim
L = 2               # transformer layers
NUM_CLASSES = 18
NC_PAD = 128        # lane-dense classifier output width (sliced back to 18)
EPS = 1e-6          # LayerNorm eps used by pytorch_pretrained_vit
CPP = C_IN * PATCH * PATCH        # 192
_SQRT2 = math.sqrt(2.0)
_SCALE = 1.0 / math.sqrt(DH)


# ------------------------------- kernel helpers ------------------------------
def _layernorm(x, w, b):
    mu = jnp.mean(x, axis=-1, keepdims=True)
    var = jnp.mean(jnp.square(x - mu), axis=-1, keepdims=True)
    return (x - mu) * lax.rsqrt(var + EPS) * w + b


def _split_heads(x):
    # [B*TP, D] -> [B*H, TP, DH] (heads onto the batch axis)
    return x.reshape(B, TP, H, DH).transpose(0, 2, 1, 3).reshape(B * H, TP, DH)


def _merge_heads(x):
    # [B*H, TP, DH] -> [B*TP, D]
    return x.reshape(B, H, TP, DH).transpose(0, 2, 1, 3).reshape(B * TP, D)


# --------------------------------- kernel ------------------------------------
def vit_kernel(xp_ref, pe_w_ref, pe_b_ref, cls_tok_ref, pos_ref, kbias_ref,
               ln1_w_ref, ln1_b_ref,
               q_w_ref, q_b_ref, k_w_ref, k_b_ref, v_w_ref, v_b_ref,
               proj_w_ref, proj_b_ref,
               ln2_w_ref, ln2_b_ref,
               fc1_w_ref, fc1_b_ref,
               fc2_w_ref, fc2_b_ref,
               norm_w_ref, norm_b_ref,
               cls_w_ref, cls_b_ref,
               feat_ref, score_ref):
    # ---- patch embedding + [cls] + positional embedding ----
    emb = (jnp.dot(xp_ref[...], pe_w_ref[...],
                   preferred_element_type=jnp.float32)
           + pe_b_ref[...]).reshape(B, N_PATCH, D)
    cls = jnp.broadcast_to(cls_tok_ref[...].reshape(1, 1, D), (B, 1, D))
    pad = jnp.zeros((B, TP - T, D), jnp.float32)
    x = (jnp.concatenate([cls, emb, pad], axis=1) + pos_ref[...])
    x = x.reshape(B * TP, D)                       # batch folded into M rows

    key_bias = kbias_ref[...].reshape(1, 1, TP)    # 0 for real keys, -1e30 pad

    # ---- transformer layers (weights fully VMEM-resident, unrolled loop) ----
    def layer_body(l, x):
        # multi-head self-attention (pre-norm)
        xn = _layernorm(x, ln1_w_ref[l], ln1_b_ref[l])          # [B*TP, D]
        q = (jnp.dot(xn, q_w_ref[l], preferred_element_type=jnp.float32)
             + q_b_ref[l]) * _SCALE                # fold 1/sqrt(DH) into q once
        k = jnp.dot(xn, k_w_ref[l], preferred_element_type=jnp.float32) + k_b_ref[l]
        v = jnp.dot(xn, v_w_ref[l], preferred_element_type=jnp.float32) + v_b_ref[l]

        qh = _split_heads(q)                       # [B*H, TP, DH]
        kh = _split_heads(k)
        vh = _split_heads(v)

        scores = jnp.einsum('bqd,bkd->bqk', qh, kh,
                            preferred_element_type=jnp.float32) + key_bias
        m = jnp.max(scores, axis=-1, keepdims=True)
        e = jnp.exp(scores - m)
        s = jnp.sum(e, axis=-1, keepdims=True)
        p = e / s                                   # exact softmax denominator
        ctx = _merge_heads(jnp.einsum('bqk,bkd->bqd', p, vh,
                                      preferred_element_type=jnp.float32))

        attn = (jnp.dot(ctx, proj_w_ref[l], preferred_element_type=jnp.float32)
                + proj_b_ref[l])
        x = x + attn

        # position-wise feed-forward (pre-norm, exact erf GELU)
        yn = _layernorm(x, ln2_w_ref[l], ln2_b_ref[l])
        h1 = (jnp.dot(yn, fc1_w_ref[l], preferred_element_type=jnp.float32)
              + fc1_b_ref[l])
        h1 = 0.5 * h1 * (1.0 + lax.erf(h1 / _SQRT2))
        h2 = (jnp.dot(h1, fc2_w_ref[l], preferred_element_type=jnp.float32)
              + fc2_b_ref[l])
        return x + h2

    x = lax.fori_loop(0, L, layer_body, x, unroll=True)

    # ---- final LayerNorm -> class token -> classifier (lane-dense 128) ----
    cls_out = x.reshape(B, TP, D)[:, 0, :]                      # [B, D]
    feat = _layernorm(cls_out, norm_w_ref[...], norm_b_ref[...])
    feat_ref[...] = feat                                        # ViT.fc is Identity
    score_ref[...] = (jnp.dot(feat, cls_w_ref[...],
                              preferred_element_type=jnp.float32)
                      + cls_b_ref[...])


# ------------------------------ wrapper ---------------------------------------
def vision_transformer_forward(x, params, triplet=True):
    """x: NCHW [B, C_IN, IMG, IMG] -> (feat [B, D], score [B, NUM_CLASSES])."""
    # patchify (layout glue only): NCHW -> [B*N, C*P*P], row-major (gh, gw)
    xp = x.reshape(B, C_IN, GRID_HW, PATCH, GRID_HW, PATCH)
    xp = xp.transpose(0, 2, 4, 1, 3, 5).reshape(B * N_PATCH, CPP)
    pos = jnp.pad(params['pos_emb'], ((0, 0), (0, TP - T), (0, 0)))  # pad T->TP
    # additive key-padding bias, computed once (constant-folded under jit)
    kbias = jnp.where(jnp.arange(TP) < T, 0.0, -1e30).astype(jnp.float32)
    kbias = kbias.reshape(1, TP)
    # lane-dense classifier: pad 18 -> 128 output lanes, slice back after
    cls_w_pad = jnp.pad(params['cls_w'], ((0, 0), (0, NC_PAD - NUM_CLASSES)))
    cls_b_pad = jnp.pad(params['cls_b'], ((0, 0), (0, NC_PAD - NUM_CLASSES)))

    vmem_spec = functools.partial(pl.BlockSpec,
                                  memory_space=pltpu.MemorySpace.VMEM)
    n_inputs = 26

    feat, score_pad = pl.pallas_call(
        vit_kernel,
        out_shape=(jax.ShapeDtypeStruct((B, D), jnp.float32),
                   jax.ShapeDtypeStruct((B, NC_PAD), jnp.float32)),
        in_specs=[vmem_spec() for _ in range(n_inputs)],
        out_specs=(vmem_spec(), vmem_spec()),
    )(xp, params['pe_w'], params['pe_b'], params['cls_token'], pos, kbias,
      params['ln1_w'], params['ln1_b'],
      params['q_w'], params['q_b'], params['k_w'], params['k_b'],
      params['v_w'], params['v_b'],
      params['proj_w'], params['proj_b'],
      params['ln2_w'], params['ln2_b'],
      params['fc1_w'], params['fc1_b'],
      params['fc2_w'], params['fc2_b'],
      params['norm_w'], params['norm_b'],
      cls_w_pad, cls_b_pad)

    score = score_pad[:, :NUM_CLASSES]
    if triplet:
        return feat, score
    return score


# ------------------------- deterministic parameters ---------------------------
def init_params(key):
    ks = jax.random.split(key, 10)

    def nrm(k, shape, std):
        return (std * jax.random.normal(k, shape)).astype(jnp.float32)

    # TODO(synk): pretrained ImageNet ViT weights are not loadable here; backbone
    # params are synthetic deterministic initializations of the same structure.
    return {
        # patch embedding (Conv2d k=stride=PATCH folded into a matmul)
        'pe_w': nrm(ks[0], (CPP, D), 0.02),
        'pe_b': jnp.zeros((1, D), jnp.float32),
        'cls_token': nrm(ks[1], (1, D), 0.02),
        'pos_emb': nrm(ks[2], (1, T, D), 0.02),
        # per-layer (stacked over L) transformer weights; QKV stored split
        'ln1_w': jnp.ones((L, 1, D), jnp.float32),
        'ln1_b': jnp.zeros((L, 1, D), jnp.float32),
        'q_w': nrm(ks[3], (L, D, D), 0.02),
        'q_b': jnp.zeros((L, 1, D), jnp.float32),
        'k_w': nrm(ks[4], (L, D, D), 0.02),
        'k_b': jnp.zeros((L, 1, D), jnp.float32),
        'v_w': nrm(ks[5], (L, D, D), 0.02),
        'v_b': jnp.zeros((L, 1, D), jnp.float32),
        'proj_w': nrm(ks[6], (L, D, D), 0.02),
        'proj_b': jnp.zeros((L, 1, D), jnp.float32),
        'ln2_w': jnp.ones((L, 1, D), jnp.float32),
        'ln2_b': jnp.zeros((L, 1, D), jnp.float32),
        'fc1_w': nrm(ks[7], (L, D, D_MLP), 0.02),
        'fc1_b': jnp.zeros((L, 1, D_MLP), jnp.float32),
        'fc2_w': nrm(ks[8], (L, D_MLP, D), 0.02),
        'fc2_b': jnp.zeros((L, 1, D), jnp.float32),
        # final norm of the ViT backbone
        'norm_w': jnp.ones((1, D), jnp.float32),
        'norm_b': jnp.zeros((1, D), jnp.float32),
        # classifier head: weights_init_classifier -> Normal(std=0.001), bias 0
        'cls_w': nrm(ks[9], (D, NUM_CLASSES), 0.001),
        'cls_b': jnp.zeros((1, NUM_CLASSES), jnp.float32),
    }


# --------------------------------- main ---------------------------------------
if __name__ == "__main__":
    key = jax.random.PRNGKey(0)
    kx, kp = jax.random.split(key)
    x = jax.random.normal(kx, (B, C_IN, IMG, IMG), dtype=jnp.float32)
    params = init_params(kp)

    fwd = jax.jit(functools.partial(vision_transformer_forward, triplet=True))
    feat, score = fwd(x, params)
    jax.block_until_ready((feat, score))

    assert feat.shape == (B, D), feat.shape
    assert score.shape == (B, NUM_CLASSES), score.shape
    assert feat.dtype == jnp.float32 and score.dtype == jnp.float32
    assert bool(jnp.all(jnp.isfinite(feat))) and bool(jnp.all(jnp.isfinite(score)))
    print("KERNEL_OK")
</pallas_src>

<mosaic_0001>
module attributes {stable_mosaic.version = 11 : i64} {
  func.func @vit_kernel(%arg0: memref<8x192xf32, #tpu.memory_space<vmem>>, %arg1: memref<192x32xf32, #tpu.memory_space<vmem>>, %arg2: memref<1x32xf32, #tpu.memory_space<vmem>>, %arg3: memref<1x32xf32, #tpu.memory_space<vmem>>, %arg4: memref<1x8x32xf32, #tpu.memory_space<vmem>>, %arg5: memref<1x8xf32, #tpu.memory_space<vmem>>, %arg6: memref<2x1x32xf32, #tpu.memory_space<vmem>>, %arg7: memref<2x1x32xf32, #tpu.memory_space<vmem>>, %arg8: memref<2x32x32xf32, #tpu.memory_space<vmem>>, %arg9: memref<2x1x32xf32, #tpu.memory_space<vmem>>, %arg10: memref<2x32x32xf32, #tpu.memory_space<vmem>>, %arg11: memref<2x1x32xf32, #tpu.memory_space<vmem>>, %arg12: memref<2x32x32xf32, #tpu.memory_space<vmem>>, %arg13: memref<2x1x32xf32, #tpu.memory_space<vmem>>, %arg14: memref<2x32x32xf32, #tpu.memory_space<vmem>>, %arg15: memref<2x1x32xf32, #tpu.memory_space<vmem>>, %arg16: memref<2x1x32xf32, #tpu.memory_space<vmem>>, %arg17: memref<2x1x32xf32, #tpu.memory_space<vmem>>, %arg18: memref<2x32x64xf32, #tpu.memory_space<vmem>>, %arg19: memref<2x1x64xf32, #tpu.memory_space<vmem>>, %arg20: memref<2x64x32xf32, #tpu.memory_space<vmem>>, %arg21: memref<2x1x32xf32, #tpu.memory_space<vmem>>, %arg22: memref<1x32xf32, #tpu.memory_space<vmem>>, %arg23: memref<1x32xf32, #tpu.memory_space<vmem>>, %arg24: memref<32x128xf32, #tpu.memory_space<vmem>>, %arg25: memref<1x128xf32, #tpu.memory_space<vmem>>, %arg26: memref<2x32xf32, #tpu.memory_space<vmem>>, %arg27: memref<2x128xf32, #tpu.memory_space<vmem>>) attributes {dimension_semantics = [], scalar_prefetch = 0 : i64, scratch_operands = 0 : i64, tpu.core_type = #tpu.core_type<tc>} {
    %c0 = arith.constant 0 : index
    %c0_0 = arith.constant 0 : index
    %0 = vector.load %arg0[%c0, %c0_0] : memref<8x192xf32, #tpu.memory_space<vmem>>, vector<8x192xf32>
    %c0_1 = arith.constant 0 : index
    %c0_2 = arith.constant 0 : index
    %1 = vector.load %arg1[%c0_1, %c0_2] : memref<192x32xf32, #tpu.memory_space<vmem>>, vector<192x32xf32>
    %cst = arith.constant dense<0.000000e+00> : vector<8x32xf32>
    %2 = tpu.matmul %0, %1, %cst {dimension_numbers = #tpu.dot_dimension_numbers<[1], [0], [0], [1], [0, 0, 1, 1], [], []>} : vector<8x192xf32>, vector<192x32xf32>, vector<8x32xf32> -> vector<8x32xf32>
    %c0_3 = arith.constant 0 : index
    %c0_4 = arith.constant 0 : index
    %3 = vector.load %arg2[%c0_3, %c0_4] : memref<1x32xf32, #tpu.memory_space<vmem>>, vector<1x32xf32>
    %4 = vector.broadcast %3 : vector<1x32xf32> to vector<8x32xf32>
    %5 = arith.addf %2, %4 : vector<8x32xf32>
    %6 = vector.shape_cast %5 : vector<8x32xf32> to vector<2x4x32xf32>
    %c0_5 = arith.constant 0 : index
    %c0_6 = arith.constant 0 : index
    %7 = vector.load %arg3[%c0_5, %c0_6] : memref<1x32xf32, #tpu.memory_space<vmem>>, vector<1x32xf32>
    %8 = vector.shape_cast %7 : vector<1x32xf32> to vector<1x1x32xf32>
    %9 = vector.shape_cast %8 : vector<1x1x32xf32> to vector<1x1x32xf32>
    %10 = vector.broadcast %9 : vector<1x1x32xf32> to vector<2x1x32xf32>
    %cst_7 = arith.constant 0.000000e+00 : f32
    %11 = vector.broadcast %cst_7 : f32 to vector<2x3x32xf32>
    %12 = tpu.concatenate %10, %6, %11 in 1 : vector<2x1x32xf32>, vector<2x4x32xf32>, vector<2x3x32xf32> -> vector<2x8x32xf32>
    %c0_8 = arith.constant 0 : index
    %c0_9 = arith.constant 0 : index
    %c0_10 = arith.constant 0 : index
    %13 = vector.load %arg4[%c0_8, %c0_9, %c0_10] : memref<1x8x32xf32, #tpu.memory_space<vmem>>, vector<1x8x32xf32>
    %14 = vector.broadcast %13 : vector<1x8x32xf32> to vector<2x8x32xf32>
    %15 = arith.addf %12, %14 : vector<2x8x32xf32>
    %16 = vector.shape_cast %15 : vector<2x8x32xf32> to vector<16x32xf32>
    %c0_11 = arith.constant 0 : index
    %c0_12 = arith.constant 0 : index
    %17 = vector.load %arg5[%c0_11, %c0_12] : memref<1x8xf32, #tpu.memory_space<vmem>>, vector<1x8xf32>
    %18 = vector.shape_cast %17 : vector<1x8xf32> to vector<1x1x8xf32>
    %c0_i32 = arith.constant 0 : i32
    %19 = arith.index_cast %c0_i32 : i32 to index
    %c0_13 = arith.constant 0 : index
    %c0_14 = arith.constant 0 : index
    %20 = vector.load %arg6[%19, %c0_13, %c0_14] : memref<2x1x32xf32, #tpu.memory_space<vmem>>, vector<1x1x32xf32>
    %21 = vector.shape_cast %20 : vector<1x1x32xf32> to vector<1x32xf32>
    %22 = arith.index_cast %c0_i32 : i32 to index
    %c0_15 = arith.constant 0 : index
    %c0_16 = arith.constant 0 : index
    %23 = vector.load %arg7[%22, %c0_15, %c0_16] : memref<2x1x32xf32, #tpu.memory_space<vmem>>, vector<1x1x32xf32>
    %24 = vector.shape_cast %23 : vector<1x1x32xf32> to vector<1x32xf32>
    %cst_17 = arith.constant dense<0.000000e+00> : vector<16xf32>
    %25 = vector.multi_reduction <add>, %16, %cst_17 [1] : vector<16x32xf32> to vector<16xf32>
    %26 = vector.shape_cast %25 : vector<16xf32> to vector<16x1xf32>
    %cst_18 = arith.constant 3.200000e+01 : f32
    %27 = vector.broadcast %cst_18 : f32 to vector<16x1xf32>
    %28 = arith.divf %26, %27 : vector<16x1xf32>
    %29 = vector.broadcast %28 : vector<16x1xf32> to vector<16x32xf32>
    %30 = arith.subf %16, %29 : vector<16x32xf32>
    %31 = arith.mulf %30, %30 : vector<16x32xf32>
    %cst_19 = arith.constant dense<0.000000e+00> : vector<16xf32>
    %32 = vector.multi_reduction <add>, %31, %cst_19 [1] : vector<16x32xf32> to vector<16xf32>
    %33 = vector.shape_cast %32 : vector<16xf32> to vector<16x1xf32>
    %cst_20 = arith.constant 3.200000e+01 : f32
    %34 = vector.broadcast %cst_20 : f32 to vector<16x1xf32>
    %35 = arith.divf %33, %34 : vector<16x1xf32>
    %36 = vector.broadcast %28 : vector<16x1xf32> to vector<16x32xf32>
    %37 = arith.subf %16, %36 : vector<16x32xf32>
    %cst_21 = arith.constant 9.99999997E-7 : f32
    %38 = vector.broadcast %cst_21 : f32 to vector<16x1xf32>
    %39 = arith.addf %35, %38 : vector<16x1xf32>
    %40 = math.rsqrt %39 : vector<16x1xf32>
    %41 = vector.broadcast %40 : vector<16x1xf32> to vector<16x32xf32>
    %42 = arith.mulf %37, %41 : vector<16x32xf32>
    %43 = vector.broadcast %21 : vector<1x32xf32> to vector<16x32xf32>
    %44 = arith.mulf %42, %43 : vector<16x32xf32>
    %45 = vector.broadcast %24 : vector<1x32xf32> to vector<16x32xf32>
    %46 = arith.addf %44, %45 : vector<16x32xf32>
    %47 = arith.index_cast %c0_i32 : i32 to index
    %c0_22 = arith.constant 0 : index
    %c0_23 = arith.constant 0 : index
    %48 = vector.load %arg8[%47, %c0_22, %c0_23] : memref<2x32x32xf32, #tpu.memory_space<vmem>>, vector<1x32x32xf32>
    %49 = vector.shape_cast %48 : vector<1x32x32xf32> to vector<32x32xf32>
    %cst_24 = arith.constant dense<0.000000e+00> : vector<16x32xf32>
    %50 = tpu.matmul %46, %49, %cst_24 {dimension_numbers = #tpu.dot_dimension_numbers<[1], [0], [0], [1], [0, 0, 1, 1], [], []>} : vector<16x32xf32>, vector<32x32xf32>, vector<16x32xf32> -> vector<16x32xf32>
    %51 = arith.index_cast %c0_i32 : i32 to index
    %c0_25 = arith.constant 0 : index
    %c0_26 = arith.constant 0 : index
    %52 = vector.load %arg9[%51, %c0_25, %c0_26] : memref<2x1x32xf32, #tpu.memory_space<vmem>>, vector<1x1x32xf32>
    %53 = vector.shape_cast %52 : vector<1x1x32xf32> to vector<1x32xf32>
    %54 = vector.broadcast %53 : vector<1x32xf32> to vector<16x32xf32>
    %55 = arith.addf %50, %54 : vector<16x32xf32>
    %cst_27 = arith.constant 0.353553385 : f32
    %56 = vector.broadcast %cst_27 : f32 to vector<16x32xf32>
    %57 = arith.mulf %55, %56 : vector<16x32xf32>
    %58 = arith.index_cast %c0_i32 : i32 to index
    %c0_28 = arith.constant 0 : index
    %c0_29 = arith.constant 0 : index
    %59 = vector.load %arg10[%58, %c0_28, %c0_29] : memref<2x32x32xf32, #tpu.memory_space<vmem>>, vector<1x32x32xf32>
    %60 = vector.shape_cast %59 : vector<1x32x32xf32> to vector<32x32xf32>
    %cst_30 = arith.constant dense<0.000000e+00> : vector<16x32xf32>
    %61 = tpu.matmul %46, %60, %cst_30 {dimension_numbers = #tpu.dot_dimension_numbers<[1], [0], [0], [1], [0, 0, 1, 1], [], []>} : vector<16x32xf32>, vector<32x32xf32>, vector<16x32xf32> -> vector<16x32xf32>
    %62 = arith.index_cast %c0_i32 : i32 to index
    %c0_31 = arith.constant 0 : index
    %c0_32 = arith.constant 0 : index
    %63 = vector.load %arg11[%62, %c0_31, %c0_32] : memref<2x1x32xf32, #tpu.memory_space<vmem>>, vector<1x1x32xf32>
    %64 = vector.shape_cast %63 : vector<1x1x32xf32> to vector<1x32xf32>
    %65 = vector.broadcast %64 : vector<1x32xf32> to vector<16x32xf32>
    %66 = arith.addf %61, %65 : vector<16x32xf32>
    %67 = arith.index_cast %c0_i32 : i32 to index
    %c0_33 = arith.constant 0 : index
    %c0_34 = arith.constant 0 : index
    %68 = vector.load %arg12[%67, %c0_33, %c0_34] : memref<2x32x32xf32, #tpu.memory_space<vmem>>, vector<1x32x32xf32>
    %69 = vector.shape_cast %68 : vector<1x32x32xf32> to vector<32x32xf32>
    %cst_35 = arith.constant dense<0.000000e+00> : vector<16x32xf32>
    %70 = tpu.matmul %46, %69, %cst_35 {dimension_numbers = #tpu.dot_dimension_numbers<[1], [0], [0], [1], [0, 0, 1, 1], [], []>} : vector<16x32xf32>, vector<32x32xf32>, vector<16x32xf32> -> vector<16x32xf32>
    %71 = arith.index_cast %c0_i32 : i32 to index
    %c0_36 = arith.constant 0 : index
    %c0_37 = arith.constant 0 : index
    %72 = vector.load %arg13[%71, %c0_36, %c0_37] : memref<2x1x32xf32, #tpu.memory_space<vmem>>, vector<1x1x32xf32>
    %73 = vector.shape_cast %72 : vector<1x1x32xf32> to vector<1x32xf32>
    %74 = vector.broadcast %73 : vector<1x32xf32> to vector<16x32xf32>
    %75 = arith.addf %70, %74 : vector<16x32xf32>
    %76 = vector.shape_cast %57 : vector<16x32xf32> to vector<2x8x4x8xf32>
    %77 = tpu.transpose %76, [0, 2, 1, 3] : vector<2x8x4x8xf32> -> vector<2x4x8x8xf32>
    %78 = vector.shape_cast %77 : vector<2x4x8x8xf32> to vector<8x8x8xf32>
    %79 = vector.shape_cast %66 : vector<16x32xf32> to vector<2x8x4x8xf32>
    %80 = tpu.transpose %79, [0, 2, 1, 3] : vector<2x8x4x8xf32> -> vector<2x4x8x8xf32>
    %81 = vector.shape_cast %80 : vector<2x4x8x8xf32> to vector<8x8x8xf32>
    %82 = vector.shape_cast %75 : vector<16x32xf32> to vector<2x8x4x8xf32>
    %83 = tpu.transpose %82, [0, 2, 1, 3] : vector<2x8x4x8xf32> -> vector<2x4x8x8xf32>
    %84 = vector.shape_cast %83 : vector<2x4x8x8xf32> to vector<8x8x8xf32>
    "tpu.trace_start"() <{level = 10 : i32, message = "bqd,bkd->bqk"}> : () -> ()
    %cst_38 = arith.constant dense<0.000000e+00> : vector<8x8x8xf32>
    %85 = tpu.matmul %78, %81, %cst_38 {dimension_numbers = #tpu.dot_dimension_numbers<[2], [2], [1], [1], [0, 0, 0, 1, 1, 1], [0], [0]>} : vector<8x8x8xf32>, vector<8x8x8xf32>, vector<8x8x8xf32> -> vector<8x8x8xf32>
    "tpu.trace_stop"() : () -> ()
    %86 = vector.broadcast %18 : vector<1x1x8xf32> to vector<8x8x8xf32>
    %87 = arith.addf %85, %86 : vector<8x8x8xf32>
    %cst_39 = arith.constant dense<0xFF800000> : vector<8x8xf32>
    %88 = vector.multi_reduction <maximumf>, %87, %cst_39 [2] : vector<8x8x8xf32> to vector<8x8xf32>
    %89 = vector.shape_cast %88 : vector<8x8xf32> to vector<8x8x1xf32>
    %90 = vector.broadcast %89 : vector<8x8x1xf32> to vector<8x8x8xf32>
    %91 = arith.subf %87, %90 : vector<8x8x8xf32>
    %92 = math.exp %91 : vector<8x8x8xf32>
    %cst_40 = arith.constant dense<0.000000e+00> : vector<8x8xf32>
    %93 = vector.multi_reduction <add>, %92, %cst_40 [2] : vector<8x8x8xf32> to vector<8x8xf32>
    %94 = vector.shape_cast %93 : vector<8x8xf32> to vector<8x8x1xf32>
    %95 = vector.broadcast %94 : vector<8x8x1xf32> to vector<8x8x8xf32>
    %96 = arith.divf %92, %95 : vector<8x8x8xf32>
    "tpu.trace_start"() <{level = 10 : i32, message = "bqk,bkd->bqd"}> : () -> ()
    %cst_41 = arith.constant dense<0.000000e+00> : vector<8x8x8xf32>
    %97 = tpu.matmul %96, %84, %cst_41 {dimension_numbers = #tpu.dot_dimension_numbers<[2], [1], [1], [2], [0, 0, 0, 1, 1, 2], [0], [0]>} : vector<8x8x8xf32>, vector<8x8x8xf32>, vector<8x8x8xf32> -> vector<8x8x8xf32>
    "tpu.trace_stop"() : () -> ()
    %98 = vector.shape_cast %97 : vector<8x8x8xf32> to vector<2x4x8x8xf32>
    %99 = tpu.transpose %98, [0, 2, 1, 3] : vector<2x4x8x8xf32> -> vector<2x8x4x8xf32>
    %100 = vector.shape_cast %99 : vector<2x8x4x8xf32> to vector<16x32xf32>
    %101 = arith.index_cast %c0_i32 : i32 to index
    %c0_42 = arith.constant 0 : index
    %c0_43 = arith.constant 0 : index
    %102 = vector.load %arg14[%101, %c0_42, %c0_43] : memref<2x32x32xf32, #tpu.memory_space<vmem>>, vector<1x32x32xf32>
    %103 = vector.shape_cast %102 : vector<1x32x32xf32> to vector<32x32xf32>
    %cst_44 = arith.constant dense<0.000000e+00> : vector<16x32xf32>
    %104 = tpu.matmul %100, %103, %cst_44 {dimension_numbers = #tpu.dot_dimension_numbers<[1], [0], [0], [1], [0, 0, 1, 1], [], []>} : vector<16x32xf32>, vector<32x32xf32>, vector<16x32xf32> -> vector<16x32xf32>
    %105 = arith.index_cast %c0_i32 : i32 to index
    %c0_45 = arith.constant 0 : index
    %c0_46 = arith.constant 0 : index
    %106 = vector.load %arg15[%105, %c0_45, %c0_46] : memref<2x1x32xf32, #tpu.memory_space<vmem>>, vector<1x1x32xf32>
    %107 = vector.shape_cast %106 : vector<1x1x32xf32> to vector<1x32xf32>
    %108 = vector.broadcast %107 : vector<1x32xf32> to vector<16x32xf32>
    %109 = arith.addf %104, %108 : vector<16x32xf32>
    %110 = arith.addf %16, %109 : vector<16x32xf32>
    %111 = arith.index_cast %c0_i32 : i32 to index
    %c0_47 = arith.constant 0 : index
    %c0_48 = arith.constant 0 : index
    %112 = vector.load %arg16[%111, %c0_47, %c0_48] : memref<2x1x32xf32, #tpu.memory_space<vmem>>, vector<1x1x32xf32>
    %113 = vector.shape_cast %112 : vector<1x1x32xf32> to vector<1x32xf32>
    %114 = arith.index_cast %c0_i32 : i32 to index
    %c0_49 = arith.constant 0 : index
    %c0_50 = arith.constant 0 : index
    %115 = vector.load %arg17[%114, %c0_49, %c0_50] : memref<2x1x32xf32, #tpu.memory_space<vmem>>, vector<1x1x32xf32>
    %116 = vector.shape_cast %115 : vector<1x1x32xf32> to vector<1x32xf32>
    %cst_51 = arith.constant dense<0.000000e+00> : vector<16xf32>
    %117 = vector.multi_reduction <add>, %110, %cst_51 [1] : vector<16x32xf32> to vector<16xf32>
    %118 = vector.shape_cast %117 : vector<16xf32> to vector<16x1xf32>
    %cst_52 = arith.constant 3.200000e+01 : f32
    %119 = vector.broadcast %cst_52 : f32 to vector<16x1xf32>
    %120 = arith.divf %118, %119 : vector<16x1xf32>
    %121 = vector.broadcast %120 : vector<16x1xf32> to vector<16x32xf32>
    %122 = arith.subf %110, %121 : vector<16x32xf32>
    %123 = arith.mulf %122, %122 : vector<16x32xf32>
    %cst_53 = arith.constant dense<0.000000e+00> : vector<16xf32>
    %124 = vector.multi_reduction <add>, %123, %cst_53 [1] : vector<16x32xf32> to vector<16xf32>
    %125 = vector.shape_cast %124 : vector<16xf32> to vector<16x1xf32>
    %cst_54 = arith.constant 3.200000e+01 : f32
    %126 = vector.broadcast %cst_54 : f32 to vector<16x1xf32>
    %127 = arith.divf %125, %126 : vector<16x1xf32>
    %128 = vector.broadcast %120 : vector<16x1xf32> to vector<16x32xf32>
    %129 = arith.subf %110, %128 : vector<16x32xf32>
    %cst_55 = arith.constant 9.99999997E-7 : f32
    %130 = vector.broadcast %cst_55 : f32 to vector<16x1xf32>
    %131 = arith.addf %127, %130 : vector<16x1xf32>
    %132 = math.rsqrt %131 : vector<16x1xf32>
    %133 = vector.broadcast %132 : vector<16x1xf32> to vector<16x32xf32>
    %134 = arith.mulf %129, %133 : vector<16x32xf32>
    %135 = vector.broadcast %113 : vector<1x32xf32> to vector<16x32xf32>
    %136 = arith.mulf %134, %135 : vector<16x32xf32>
    %137 = vector.broadcast %116 : vector<1x32xf32> to vector<16x32xf32>
    %138 = arith.addf %136, %137 : vector<16x32xf32>
    %139 = arith.index_cast %c0_i32 : i32 to index
    %c0_56 = arith.constant 0 : index
    %c0_57 = arith.constant 0 : index
    %140 = vector.load %arg18[%139, %c0_56, %c0_57] : memref<2x32x64xf32, #tpu.memory_space<vmem>>, vector<1x32x64xf32>
    %141 = vector.shape_cast %140 : vector<1x32x64xf32> to vector<32x64xf32>
    %cst_58 = arith.constant dense<0.000000e+00> : vector<16x64xf32>
    %142 = tpu.matmul %138, %141, %cst_58 {dimension_numbers = #tpu.dot_dimension_numbers<[1], [0], [0], [1], [0, 0, 1, 1], [], []>} : vector<16x32xf32>, vector<32x64xf32>, vector<16x64xf32> -> vector<16x64xf32>
    %143 = arith.index_cast %c0_i32 : i32 to index
    %c0_59 = arith.constant 0 : index
    %c0_60 = arith.constant 0 : index
    %144 = vector.load %arg19[%143, %c0_59, %c0_60] : memref<2x1x64xf32, #tpu.memory_space<vmem>>, vector<1x1x64xf32>
    %145 = vector.shape_cast %144 : vector<1x1x64xf32> to vector<1x64xf32>
    %146 = vector.broadcast %145 : vector<1x64xf32> to vector<16x64xf32>
    %147 = arith.addf %142, %146 : vector<16x64xf32>
    %cst_61 = arith.constant 5.000000e-01 : f32
    %148 = vector.broadcast %cst_61 : f32 to vector<16x64xf32>
    %149 = arith.mulf %148, %147 : vector<16x64xf32>
    %cst_62 = arith.constant 1.41421354 : f32
    %150 = vector.broadcast %cst_62 : f32 to vector<16x64xf32>
    %151 = arith.divf %147, %150 : vector<16x64xf32>
    %152 = math.erf %151 : vector<16x64xf32>
    %cst_63 = arith.constant 1.000000e+00 : f32
    %153 = vector.broadcast %cst_63 : f32 to vector<16x64xf32>
    %154 = arith.addf %153, %152 : vector<16x64xf32>
    %155 = arith.mulf %149, %154 : vector<16x64xf32>
    %156 = arith.index_cast %c0_i32 : i32 to index
    %c0_64 = arith.constant 0 : index
    %c0_65 = arith.constant 0 : index
    %157 = vector.load %arg20[%156, %c0_64, %c0_65] : memref<2x64x32xf32, #tpu.memory_space<vmem>>, vector<1x64x32xf32>
    %158 = vector.shape_cast %157 : vector<1x64x32xf32> to vector<64x32xf32>
    %cst_66 = arith.constant dense<0.000000e+00> : vector<16x32xf32>
    %159 = tpu.matmul %155, %158, %cst_66 {dimension_numbers = #tpu.dot_dimension_numbers<[1], [0], [0], [1], [0, 0, 1, 1], [], []>} : vector<16x64xf32>, vector<64x32xf32>, vector<16x32xf32> -> vector<16x32xf32>
    %160 = arith.index_cast %c0_i32 : i32 to index
    %c0_67 = arith.constant 0 : index
    %c0_68 = arith.constant 0 : index
    %161 = vector.load %arg21[%160, %c0_67, %c0_68] : memref<2x1x32xf32, #tpu.memory_space<vmem>>, vector<1x1x32xf32>
    %162 = vector.shape_cast %161 : vector<1x1x32xf32> to vector<1x32xf32>
    %163 = vector.broadcast %162 : vector<1x32xf32> to vector<16x32xf32>
    %164 = arith.addf %159, %163 : vector<16x32xf32>
    %165 = arith.addf %110, %164 : vector<16x32xf32>
    %c1_i32 = arith.constant 1 : i32
    %166 = arith.index_cast %c1_i32 : i32 to index
    %c0_69 = arith.constant 0 : index
    %c0_70 = arith.constant 0 : index
    %167 = vector.load %arg6[%166, %c0_69, %c0_70] : memref<2x1x32xf32, #tpu.memory_space<vmem>>, vector<1x1x32xf32>
    %168 = vector.shape_cast %167 : vector<1x1x32xf32> to vector<1x32xf32>
    %169 = arith.index_cast %c1_i32 : i32 to index
    %c0_71 = arith.constant 0 : index
    %c0_72 = arith.constant 0 : index
    %170 = vector.load %arg7[%169, %c0_71, %c0_72] : memref<2x1x32xf32, #tpu.memory_space<vmem>>, vector<1x1x32xf32>
    %171 = vector.shape_cast %170 : vector<1x1x32xf32> to vector<1x32xf32>
    %cst_73 = arith.constant dense<0.000000e+00> : vector<16xf32>
    %172 = vector.multi_reduction <add>, %165, %cst_73 [1] : vector<16x32xf32> to vector<16xf32>
    %173 = vector.shape_cast %172 : vector<16xf32> to vector<16x1xf32>
    %cst_74 = arith.constant 3.200000e+01 : f32
    %174 = vector.broadcast %cst_74 : f32 to vector<16x1xf32>
    %175 = arith.divf %173, %174 : vector<16x1xf32>
    %176 = vector.broadcast %175 : vector<16x1xf32> to vector<16x32xf32>
    %177 = arith.subf %165, %176 : vector<16x32xf32>
    %178 = arith.mulf %177, %177 : vector<16x32xf32>
    %cst_75 = arith.constant dense<0.000000e+00> : vector<16xf32>
    %179 = vector.multi_reduction <add>, %178, %cst_75 [1] : vector<16x32xf32> to vector<16xf32>
    %180 = vector.shape_cast %179 : vector<16xf32> to vector<16x1xf32>
    %cst_76 = arith.constant 3.200000e+01 : f32
    %181 = vector.broadcast %cst_76 : f32 to vector<16x1xf32>
    %182 = arith.divf %180, %181 : vector<16x1xf32>
    %183 = vector.broadcast %175 : vector<16x1xf32> to vector<16x32xf32>
    %184 = arith.subf %165, %183 : vector<16x32xf32>
    %cst_77 = arith.constant 9.99999997E-7 : f32
    %185 = vector.broadcast %cst_77 : f32 to vector<16x1xf32>
    %186 = arith.addf %182, %185 : vector<16x1xf32>
    %187 = math.rsqrt %186 : vector<16x1xf32>
    %188 = vector.broadcast %187 : vector<16x1xf32> to vector<16x32xf32>
    %189 = arith.mulf %184, %188 : vector<16x32xf32>
    %190 = vector.broadcast %168 : vector<1x32xf32> to vector<16x32xf32>
    %191 = arith.mulf %189, %190 : vector<16x32xf32>
    %192 = vector.broadcast %171 : vector<1x32xf32> to vector<16x32xf32>
    %193 = arith.addf %191, %192 : vector<16x32xf32>
    %194 = arith.index_cast %c1_i32 : i32 to index
    %c0_78 = arith.constant 0 : index
    %c0_79 = arith.constant 0 : index
    %195 = vector.load %arg8[%194, %c0_78, %c0_79] : memref<2x32x32xf32, #tpu.memory_space<vmem>>, vector<1x32x32xf32>
    %196 = vector.shape_cast %195 : vector<1x32x32xf32> to vector<32x32xf32>
    %cst_80 = arith.constant dense<0.000000e+00> : vector<16x32xf32>
    %197 = tpu.matmul %193, %196, %cst_80 {dimension_numbers = #tpu.dot_dimension_numbers<[1], [0], [0], [1], [0, 0, 1, 1], [], []>} : vector<16x32xf32>, vector<32x32xf32>, vector<16x32xf32> -> vector<16x32xf32>
    %198 = arith.index_cast %c1_i32 : i32 to index
    %c0_81 = arith.constant 0 : index
    %c0_82 = arith.constant 0 : index
    %199 = vector.load %arg9[%198, %c0_81, %c0_82] : memref<2x1x32xf32, #tpu.memory_space<vmem>>, vector<1x1x32xf32>
    %200 = vector.shape_cast %199 : vector<1x1x32xf32> to vector<1x32xf32>
    %201 = vector.broadcast %200 : vector<1x32xf32> to vector<16x32xf32>
    %202 = arith.addf %197, %201 : vector<16x32xf32>
    %cst_83 = arith.constant 0.353553385 : f32
    %203 = vector.broadcast %cst_83 : f32 to vector<16x32xf32>
    %204 = arith.mulf %202, %203 : vector<16x32xf32>
    %205 = arith.index_cast %c1_i32 : i32 to index
    %c0_84 = arith.constant 0 : index
    %c0_85 = arith.constant 0 : index
    %206 = vector.load %arg10[%205, %c0_84, %c0_85] : memref<2x32x32xf32, #tpu.memory_space<vmem>>, vector<1x32x32xf32>
    %207 = vector.shape_cast %206 : vector<1x32x32xf32> to vector<32x32xf32>
    %cst_86 = arith.constant dense<0.000000e+00> : vector<16x32xf32>
    %208 = tpu.matmul %193, %207, %cst_86 {dimension_numbers = #tpu.dot_dimension_numbers<[1], [0], [0], [1], [0, 0, 1, 1], [], []>} : vector<16x32xf32>, vector<32x32xf32>, vector<16x32xf32> -> vector<16x32xf32>
    %209 = arith.index_cast %c1_i32 : i32 to index
    %c0_87 = arith.constant 0 : index
    %c0_88 = arith.constant 0 : index
    %210 = vector.load %arg11[%209, %c0_87, %c0_88] : memref<2x1x32xf32, #tpu.memory_space<vmem>>, vector<1x1x32xf32>
    %211 = vector.shape_cast %210 : vector<1x1x32xf32> to vector<1x32xf32>
    %212 = vector.broadcast %211 : vector<1x32xf32> to vector<16x32xf32>
    %213 = arith.addf %208, %212 : vector<16x32xf32>
    %214 = arith.index_cast %c1_i32 : i32 to index
    %c0_89 = arith.constant 0 : index
    %c0_90 = arith.constant 0 : index
    %215 = vector.load %arg12[%214, %c0_89, %c0_90] : memref<2x32x32xf32, #tpu.memory_space<vmem>>, vector<1x32x32xf32>
    %216 = vector.shape_cast %215 : vector<1x32x32xf32> to vector<32x32xf32>
    %cst_91 = arith.constant dense<0.000000e+00> : vector<16x32xf32>
    %217 = tpu.matmul %193, %216, %cst_91 {dimension_numbers = #tpu.dot_dimension_numbers<[1], [0], [0], [1], [0, 0, 1, 1], [], []>} : vector<16x32xf32>, vector<32x32xf32>, vector<16x32xf32> -> vector<16x32xf32>
    %218 = arith.index_cast %c1_i32 : i32 to index
    %c0_92 = arith.constant 0 : index
    %c0_93 = arith.constant 0 : index
    %219 = vector.load %arg13[%218, %c0_92, %c0_93] : memref<2x1x32xf32, #tpu.memory_space<vmem>>, vector<1x1x32xf32>
    %220 = vector.shape_cast %219 : vector<1x1x32xf32> to vector<1x32xf32>
    %221 = vector.broadcast %220 : vector<1x32xf32> to vector<16x32xf32>
    %222 = arith.addf %217, %221 : vector<16x32xf32>
    %223 = vector.shape_cast %204 : vector<16x32xf32> to vector<2x8x4x8xf32>
    %224 = tpu.transpose %223, [0, 2, 1, 3] : vector<2x8x4x8xf32> -> vector<2x4x8x8xf32>
    %225 = vector.shape_cast %224 : vector<2x4x8x8xf32> to vector<8x8x8xf32>
    %226 = vector.shape_cast %213 : vector<16x32xf32> to vector<2x8x4x8xf32>
    %227 = tpu.transpose %226, [0, 2, 1, 3] : vector<2x8x4x8xf32> -> vector<2x4x8x8xf32>
    %228 = vector.shape_cast %227 : vector<2x4x8x8xf32> to vector<8x8x8xf32>
    %229 = vector.shape_cast %222 : vector<16x32xf32> to vector<2x8x4x8xf32>
    %230 = tpu.transpose %229, [0, 2, 1, 3] : vector<2x8x4x8xf32> -> vector<2x4x8x8xf32>
    %231 = vector.shape_cast %230 : vector<2x4x8x8xf32> to vector<8x8x8xf32>
    "tpu.trace_start"() <{level = 10 : i32, message = "bqd,bkd->bqk"}> : () -> ()
    %cst_94 = arith.constant dense<0.000000e+00> : vector<8x8x8xf32>
    %232 = tpu.matmul %225, %228, %cst_94 {dimension_numbers = #tpu.dot_dimension_numbers<[2], [2], [1], [1], [0, 0, 0, 1, 1, 1], [0], [0]>} : vector<8x8x8xf32>, vector<8x8x8xf32>, vector<8x8x8xf32> -> vector<8x8x8xf32>
    "tpu.trace_stop"() : () -> ()
    %233 = vector.broadcast %18 : vector<1x1x8xf32> to vector<8x8x8xf32>
    %234 = arith.addf %232, %233 : vector<8x8x8xf32>
    %cst_95 = arith.constant dense<0xFF800000> : vector<8x8xf32>
    %235 = vector.multi_reduction <maximumf>, %234, %cst_95 [2] : vector<8x8x8xf32> to vector<8x8xf32>
    %236 = vector.shape_cast %235 : vector<8x8xf32> to vector<8x8x1xf32>
    %237 = vector.broadcast %236 : vector<8x8x1xf32> to vector<8x8x8xf32>
    %238 = arith.subf %234, %237 : vector<8x8x8xf32>
    %239 = math.exp %238 : vector<8x8x8xf32>
    %cst_96 = arith.constant dense<0.000000e+00> : vector<8x8xf32>
    %240 = vector.multi_reduction <add>, %239, %cst_96 [2] : vector<8x8x8xf32> to vector<8x8xf32>
    %241 = vector.shape_cast %240 : vector<8x8xf32> to vector<8x8x1xf32>
    %242 = vector.broadcast %241 : vector<8x8x1xf32> to vector<8x8x8xf32>
    %243 = arith.divf %239, %242 : vector<8x8x8xf32>
    "tpu.trace_start"() <{level = 10 : i32, message = "bqk,bkd->bqd"}> : () -> ()
    %cst_97 = arith.constant dense<0.000000e+00> : vector<8x8x8xf32>
    %244 = tpu.matmul %243, %231, %cst_97 {dimension_numbers = #tpu.dot_dimension_numbers<[2], [1], [1], [2], [0, 0, 0, 1, 1, 2], [0], [0]>} : vector<8x8x8xf32>, vector<8x8x8xf32>, vector<8x8x8xf32> -> vector<8x8x8xf32>
    "tpu.trace_stop"() : () -> ()
    %245 = vector.shape_cast %244 : vector<8x8x8xf32> to vector<2x4x8x8xf32>
    %246 = tpu.transpose %245, [0, 2, 1, 3] : vector<2x4x8x8xf32> -> vector<2x8x4x8xf32>
    %247 = vector.shape_cast %246 : vector<2x8x4x8xf32> to vector<16x32xf32>
    %248 = arith.index_cast %c1_i32 : i32 to index
    %c0_98 = arith.constant 0 : index
    %c0_99 = arith.constant 0 : index
    %249 = vector.load %arg14[%248, %c0_98, %c0_99] : memref<2x32x32xf32, #tpu.memory_space<vmem>>, vector<1x32x32xf32>
    %250 = vector.shape_cast %249 : vector<1x32x32xf32> to vector<32x32xf32>
    %cst_100 = arith.constant dense<0.000000e+00> : vector<16x32xf32>
    %251 = tpu.matmul %247, %250, %cst_100 {dimension_numbers = #tpu.dot_dimension_numbers<[1], [0], [0], [1], [0, 0, 1, 1], [], []>} : vector<16x32xf32>, vector<32x32xf32>, vector<16x32xf32> -> vector<16x32xf32>
    %252 = arith.index_cast %c1_i32 : i32 to index
    %c0_101 = arith.constant 0 : index
    %c0_102 = arith.constant 0 : index
    %253 = vector.load %arg15[%252, %c0_101, %c0_102] : memref<2x1x32xf32, #tpu.memory_space<vmem>>, vector<1x1x32xf32>
    %254 = vector.shape_cast %253 : vector<1x1x32xf32> to vector<1x32xf32>
    %255 = vector.broadcast %254 : vector<1x32xf32> to vector<16x32xf32>
    %256 = arith.addf %251, %255 : vector<16x32xf32>
    %257 = arith.addf %165, %256 : vector<16x32xf32>
    %258 = arith.index_cast %c1_i32 : i32 to index
    %c0_103 = arith.constant 0 : index
    %c0_104 = arith.constant 0 : index
    %259 = vector.load %arg16[%258, %c0_103, %c0_104] : memref<2x1x32xf32, #tpu.memory_space<vmem>>, vector<1x1x32xf32>
    %260 = vector.shape_cast %259 : vector<1x1x32xf32> to vector<1x32xf32>
    %261 = arith.index_cast %c1_i32 : i32 to index
    %c0_105 = arith.constant 0 : index
    %c0_106 = arith.constant 0 : index
    %262 = vector.load %arg17[%261, %c0_105, %c0_106] : memref<2x1x32xf32, #tpu.memory_space<vmem>>, vector<1x1x32xf32>
    %263 = vector.shape_cast %262 : vector<1x1x32xf32> to vector<1x32xf32>
    %cst_107 = arith.constant dense<0.000000e+00> : vector<16xf32>
    %264 = vector.multi_reduction <add>, %257, %cst_107 [1] : vector<16x32xf32> to vector<16xf32>
    %265 = vector.shape_cast %264 : vector<16xf32> to vector<16x1xf32>
    %cst_108 = arith.constant 3.200000e+01 : f32
    %266 = vector.broadcast %cst_108 : f32 to vector<16x1xf32>
    %267 = arith.divf %265, %266 : vector<16x1xf32>
    %268 = vector.broadcast %267 : vector<16x1xf32> to vector<16x32xf32>
    %269 = arith.subf %257, %268 : vector<16x32xf32>
    %270 = arith.mulf %269, %269 : vector<16x32xf32>
    %cst_109 = arith.constant dense<0.000000e+00> : vector<16xf32>
    %271 = vector.multi_reduction <add>, %270, %cst_109 [1] : vector<16x32xf32> to vector<16xf32>
    %272 = vector.shape_cast %271 : vector<16xf32> to vector<16x1xf32>
    %cst_110 = arith.constant 3.200000e+01 : f32
    %273 = vector.broadcast %cst_110 : f32 to vector<16x1xf32>
    %274 = arith.divf %272, %273 : vector<16x1xf32>
    %275 = vector.broadcast %267 : vector<16x1xf32> to vector<16x32xf32>
    %276 = arith.subf %257, %275 : vector<16x32xf32>
    %cst_111 = arith.constant 9.99999997E-7 : f32
    %277 = vector.broadcast %cst_111 : f32 to vector<16x1xf32>
    %278 = arith.addf %274, %277 : vector<16x1xf32>
    %279 = math.rsqrt %278 : vector<16x1xf32>
    %280 = vector.broadcast %279 : vector<16x1xf32> to vector<16x32xf32>
    %281 = arith.mulf %276, %280 : vector<16x32xf32>
    %282 = vector.broadcast %260 : vector<1x32xf32> to vector<16x32xf32>
    %283 = arith.mulf %281, %282 : vector<16x32xf32>
    %284 = vector.broadcast %263 : vector<1x32xf32> to vector<16x32xf32>
    %285 = arith.addf %283, %284 : vector<16x32xf32>
    %286 = arith.index_cast %c1_i32 : i32 to index
    %c0_112 = arith.constant 0 : index
    %c0_113 = arith.constant 0 : index
    %287 = vector.load %arg18[%286, %c0_112, %c0_113] : memref<2x32x64xf32, #tpu.memory_space<vmem>>, vector<1x32x64xf32>
    %288 = vector.shape_cast %287 : vector<1x32x64xf32> to vector<32x64xf32>
    %cst_114 = arith.constant dense<0.000000e+00> : vector<16x64xf32>
    %289 = tpu.matmul %285, %288, %cst_114 {dimension_numbers = #tpu.dot_dimension_numbers<[1], [0], [0], [1], [0, 0, 1, 1], [], []>} : vector<16x32xf32>, vector<32x64xf32>, vector<16x64xf32> -> vector<16x64xf32>
    %290 = arith.index_cast %c1_i32 : i32 to index
    %c0_115 = arith.constant 0 : index
    %c0_116 = arith.constant 0 : index
    %291 = vector.load %arg19[%290, %c0_115, %c0_116] : memref<2x1x64xf32, #tpu.memory_space<vmem>>, vector<1x1x64xf32>
    %292 = vector.shape_cast %291 : vector<1x1x64xf32> to vector<1x64xf32>
    %293 = vector.broadcast %292 : vector<1x64xf32> to vector<16x64xf32>
    %294 = arith.addf %289, %293 : vector<16x64xf32>
    %cst_117 = arith.constant 5.000000e-01 : f32
    %295 = vector.broadcast %cst_117 : f32 to vector<16x64xf32>
    %296 = arith.mulf %295, %294 : vector<16x64xf32>
    %cst_118 = arith.constant 1.41421354 : f32
    %297 = vector.broadcast %cst_118 : f32 to vector<16x64xf32>
    %298 = arith.divf %294, %297 : vector<16x64xf32>
    %299 = math.erf %298 : vector<16x64xf32>
    %cst_119 = arith.constant 1.000000e+00 : f32
    %300 = vector.broadcast %cst_119 : f32 to vector<16x64xf32>
    %301 = arith.addf %300, %299 : vector<16x64xf32>
    %302 = arith.mulf %296, %301 : vector<16x64xf32>
    %303 = arith.index_cast %c1_i32 : i32 to index
    %c0_120 = arith.constant 0 : index
    %c0_121 = arith.constant 0 : index
    %304 = vector.load %arg20[%303, %c0_120, %c0_121] : memref<2x64x32xf32, #tpu.memory_space<vmem>>, vector<1x64x32xf32>
    %305 = vector.shape_cast %304 : vector<1x64x32xf32> to vector<64x32xf32>
    %cst_122 = arith.constant dense<0.000000e+00> : vector<16x32xf32>
    %306 = tpu.matmul %302, %305, %cst_122 {dimension_numbers = #tpu.dot_dimension_numbers<[1], [0], [0], [1], [0, 0, 1, 1], [], []>} : vector<16x64xf32>, vector<64x32xf32>, vector<16x32xf32> -> vector<16x32xf32>
    %307 = arith.index_cast %c1_i32 : i32 to index
    %c0_123 = arith.constant 0 : index
    %c0_124 = arith.constant 0 : index
    %308 = vector.load %arg21[%307, %c0_123, %c0_124] : memref<2x1x32xf32, #tpu.memory_space<vmem>>, vector<1x1x32xf32>
    %309 = vector.shape_cast %308 : vector<1x1x32xf32> to vector<1x32xf32>
    %310 = vector.broadcast %309 : vector<1x32xf32> to vector<16x32xf32>
    %311 = arith.addf %306, %310 : vector<16x32xf32>
    %312 = arith.addf %257, %311 : vector<16x32xf32>
    %c2_i32 = arith.constant 2 : i32
    %313 = vector.shape_cast %312 : vector<16x32xf32> to vector<2x8x32xf32>
    %314 = vector.extract_strided_slice %313 {offsets = [0, 0, 0], sizes = [2, 1, 32], strides = [1, 1, 1]} : vector<2x8x32xf32> to vector<2x1x32xf32>
    %315 = vector.shape_cast %314 : vector<2x1x32xf32> to vector<2x32xf32>
    %c0_125 = arith.constant 0 : index
    %c0_126 = arith.constant 0 : index
    %316 = vector.load %arg22[%c0_125, %c0_126] : memref<1x32xf32, #tpu.memory_space<vmem>>, vector<1x32xf32>
    %c0_127 = arith.constant 0 : index
    %c0_128 = arith.constant 0 : index
    %317 = vector.load %arg23[%c0_127, %c0_128] : memref<1x32xf32, #tpu.memory_space<vmem>>, vector<1x32xf32>
    %cst_129 = arith.constant dense<0.000000e+00> : vector<2xf32>
    %318 = vector.multi_reduction <add>, %315, %cst_129 [1] : vector<2x32xf32> to vector<2xf32>
    %319 = vector.shape_cast %318 : vector<2xf32> to vector<2x1xf32>
    %cst_130 = arith.constant 3.200000e+01 : f32
    %320 = vector.broadcast %cst_130 : f32 to vector<2x1xf32>
    %321 = arith.divf %319, %320 : vector<2x1xf32>
    %322 = vector.broadcast %321 : vector<2x1xf32> to vector<2x32xf32>
    %323 = arith.subf %315, %322 : vector<2x32xf32>
    %324 = arith.mulf %323, %323 : vector<2x32xf32>
    %cst_131 = arith.constant dense<0.000000e+00> : vector<2xf32>
    %325 = vector.multi_reduction <add>, %324, %cst_131 [1] : vector<2x32xf32> to vector<2xf32>
    %326 = vector.shape_cast %325 : vector<2xf32> to vector<2x1xf32>
    %cst_132 = arith.constant 3.200000e+01 : f32
    %327 = vector.broadcast %cst_132 : f32 to vector<2x1xf32>
    %328 = arith.divf %326, %327 : vector<2x1xf32>
    %329 = vector.broadcast %321 : vector<2x1xf32> to vector<2x32xf32>
    %330 = arith.subf %315, %329 : vector<2x32xf32>
    %cst_133 = arith.constant 9.99999997E-7 : f32
    %331 = vector.broadcast %cst_133 : f32 to vector<2x1xf32>
    %332 = arith.addf %328, %331 : vector<2x1xf32>
    %333 = math.rsqrt %332 : vector<2x1xf32>
    %334 = vector.broadcast %333 : vector<2x1xf32> to vector<2x32xf32>
    %335 = arith.mulf %330, %334 : vector<2x32xf32>
    %336 = vector.broadcast %316 : vector<1x32xf32> to vector<2x32xf32>
    %337 = arith.mulf %335, %336 : vector<2x32xf32>
    %338 = vector.broadcast %317 : vector<1x32xf32> to vector<2x32xf32>
    %339 = arith.addf %337, %338 : vector<2x32xf32>
    %c0_134 = arith.constant 0 : index
    %c0_135 = arith.constant 0 : index
    %340 = vector.load %arg26[%c0_134, %c0_135] : memref<2x32xf32, #tpu.memory_space<vmem>>, vector<2x32xf32>
    tpu.vector_store %arg26[%c0_134, %c0_135], %339 {strides = array<i32>} : memref<2x32xf32, #tpu.memory_space<vmem>>, vector<2x32xf32>,
    %c0_136 = arith.constant 0 : index
    %c0_137 = arith.constant 0 : index
    %341 = vector.load %arg24[%c0_136, %c0_137] : memref<32x128xf32, #tpu.memory_space<vmem>>, vector<32x128xf32>
    %cst_138 = arith.constant dense<0.000000e+00> : vector<2x128xf32>
    %342 = tpu.matmul %339, %341, %cst_138 {dimension_numbers = #tpu.dot_dimension_numbers<[1], [0], [0], [1], [0, 0, 1, 1], [], []>} : vector<2x32xf32>, vector<32x128xf32>, vector<2x128xf32> -> vector<2x128xf32>
    %c0_139 = arith.constant 0 : index
    %c0_140 = arith.constant 0 : index
    %343 = vector.load %arg25[%c0_139, %c0_140] : memref<1x128xf32, #tpu.memory_space<vmem>>, vector<1x128xf32>
    %344 = vector.broadcast %343 : vector<1x128xf32> to vector<2x128xf32>
    %345 = arith.addf %342, %344 : vector<2x128xf32>
    %c0_141 = arith.constant 0 : index
    %c0_142 = arith.constant 0 : index
    %346 = vector.load %arg27[%c0_141, %c0_142] : memref<2x128xf32, #tpu.memory_space<vmem>>, vector<2x128xf32>
    tpu.vector_store %arg27[%c0_141, %c0_142], %345 {strides = array<i32>} : memref<2x128xf32, #tpu.memory_space<vmem>>, vector<2x128xf32>,
    return
  }
}

</mosaic_0001>

<bundles_post_ra>
// kernel: vision_transformer_forward.1
= control target key start
LH: loop header
LB: loop body
LE: loop exit
PB: predicated region body
PF: predicated region fallthrough
CT: control target
= control target key end

     0   :  { %s8902_s0 = inlined_call_operand.vmem [shape: f32[8,192], index: 0, kind: input, shape index: {}]   ;;  %s8903_s1 = inlined_call_operand.vmem [shape: f32[192,32], index: 1, kind: input, shape index: {}]   ;;  %s8904_s2 = inlined_call_operand.vmem [shape: f32[1,32], index: 2, kind: input, shape index: {}]   ;;  %s8905_s3 = inlined_call_operand.vmem [shape: f32[1,32], index: 3, kind: input, shape index: {}]   ;;  %s8906_s4 = inlined_call_operand.vmem [shape: f32[1,8,32], index: 4, kind: input, shape index: {}]   ;;  %s8907_s5 = inlined_call_operand.vmem [shape: f32[1,8], index: 5, kind: input, shape index: {}]   ;;  %s8908_s6 = inlined_call_operand.vmem [shape: f32[2,1,32], index: 6, kind: input, shape index: {}]   ;;  %s8909_s7 = inlined_call_operand.vmem [shape: f32[2,1,32], index: 7, kind: input, shape index: {}]   ;;  %s8910_s8 = inlined_call_operand.vmem [shape: f32[2,32,32], index: 8, kind: input, shape index: {}]   ;;  %s8911_s9 = inlined_call_operand.vmem [shape: f32[2,1,32], index: 9, kind: input, shape index: {}]   ;;  %s8912_s10 = inlined_call_operand.vmem [shape: f32[2,32,32], index: 10, kind: input, shape index: {}]   ;;  %s8913_s11 = inlined_call_operand.vmem [shape: f32[2,1,32], index: 11, kind: input, shape index: {}]   ;;  %s8914_s12 = inlined_call_operand.vmem [shape: f32[2,32,32], index: 12, kind: input, shape index: {}]   ;;  %s8915_s13 = inlined_call_operand.vmem [shape: f32[2,1,32], index: 13, kind: input, shape index: {}]   ;;  %s8916_s14 = inlined_call_operand.vmem [shape: f32[2,32,32], index: 14, kind: input, shape index: {}]   ;;  %s8917_s15 = inlined_call_operand.vmem [shape: f32[2,1,32], index: 15, kind: input, shape index: {}]   ;;  %s8918_s16 = inlined_call_operand.vmem [shape: f32[2,1,32], index: 16, kind: input, shape index: {}]   ;;  %s8919_s17 = inlined_call_operand.vmem [shape: f32[2,1,32], index: 17, kind: input, shape index: {}]   ;;  %s8920_s18 = inlined_call_operand.vmem [shape: f32[2,32,64], index: 18, kind: input, shape index: {}]   ;;  %s8921_s19 = inlined_call_operand.vmem [shape: f32[2,1,64], index: 19, kind: input, shape index: {}]   ;;  %s8922_s20 = inlined_call_operand.vmem [shape: f32[2,64,32], index: 20, kind: input, shape index: {}]   ;;  %s8923_s21 = inlined_call_operand.vmem [shape: f32[2,1,32], index: 21, kind: input, shape index: {}]   ;;  %s8924_s22 = inlined_call_operand.vmem [shape: f32[1,32], index: 22, kind: input, shape index: {}]   ;;  %s8925_s23 = inlined_call_operand.vmem [shape: f32[1,32], index: 23, kind: input, shape index: {}]   ;;  %s8926_s24 = inlined_call_operand.vmem [shape: f32[32,128], index: 24, kind: input, shape index: {}]   ;;  %s8927_s25 = inlined_call_operand.vmem [shape: f32[1,128], index: 25, kind: input, shape index: {}]   ;;  %s8928_s26 = inlined_call_operand.hbm [shape: f32[2,32], index: 26, kind: output, shape index: {0}]   ;;  %s8929_s27 = inlined_call_operand.hbm [shape: f32[2,128], index: 27, kind: output, shape index: {1}]  }
   0x1   :  { %8953 = sst [smem:[#allocation8_spill]] %s8902_s0 }
   0x2   :  { %8954 = sst [smem:[#allocation9_spill]] %s8903_s1 }
   0x3   :  { %8955 = sst [smem:[#allocation10_spill]] %s8904_s2 }
   0x4   :  { %8956 = sst [smem:[#allocation11_spill]] %s8905_s3 }
   0x5   :  { %8957 = sst [smem:[#allocation12_spill]] %s8906_s4 }
   0x6   :  { %8958 = sst [smem:[#allocation13_spill]] %s8907_s5 }
   0x7   :  { %8959 = sst [smem:[#allocation14_spill]] %s8908_s6 }
   0x8   :  { %8960 = sst [smem:[#allocation15_spill]] %s8909_s7 }
   0x9   :  { %8961 = sst [smem:[#allocation16_spill]] %s8910_s8 }
   0xa   :  { %8962 = sst [smem:[#allocation17_spill]] %s8911_s9 }
   0xb   :  { %8963 = sst [smem:[#allocation18_spill]] %s8912_s10 }
   0xc   :  { %8964 = sst [smem:[#allocation19_spill]] %s8913_s11 }
   0xd   :  { %8965 = sst [smem:[#allocation20_spill]] %s8927_s25 }
   0xe   :  { %8966 = sst [smem:[#allocation21_spill]] %s8928_s26 }
   0xf   :  { %8967 = sst [smem:[#allocation22_spill]] %s8929_s27 }
  0x10   :  { %33 = vsyncpa [#allocation3], 0  ;;  %s8968_s8 = sld [smem:[#allocation9_spill]]  ;;  %v7566_v3 = vmov 0.0|0.0   ;;  %vm120_vm0 = vcmask 523264   ;;  %s8969_s5 = sld [smem:[#allocation8_spill]] }
  0x11   :  { %7260 = vmatprep.subr.bf16.mxu0 %v7566_v3 }
  0x16   :  { %v89_v0 = vld [vmem:[%s8968_s8] sm:$0xff]  ;;  %v90_v1 = vld [vmem:[%s8968_s8 + $0x8] sm:$0xff]  ;;  %v91_v2 = vld [vmem:[%s8968_s8 + $0x10] sm:$0xff] }
  0x17   :  { %v7261_v4 = vpack.c.bf16 %v90_v1, %v89_v0  ;;  %v92_v5 = vld [vmem:[%s8968_s8 + $0x18] sm:$0xff]  ;;  %v93_v7 = vld [vmem:[%s8968_s8 + $0x20] sm:$0xff]  ;;  %v94_v8 = vld [vmem:[%s8968_s8 + $0x28] sm:$0xff] }
  0x18   :  { %v7264_v6 = vpack.c.bf16 %v92_v5, %v91_v2  ;;  %v7267_v9 = vpack.c.bf16 %v94_v8, %v93_v7  ;;  %v95_v10 = vld [vmem:[%s8968_s8 + $0x30] sm:$0xff]  ;;  %v96_v11 = vld [vmem:[%s8968_s8 + $0x38] sm:$0xff]  ;;  %v88_v12 = vld [vmem:[%s8969_s5 + $0x8] sm:$0xff] }
  0x19   :  { %7262 = vmatpush1.bf16.msra.mxu0 %v7261_v4  ;;  %6624 = vmatprep.mubr.msk.f32.mxu0 %vm120_vm0, %v88_v12 }
  0x1a   :  { %7263 = vmatprep.subr.bf16.mxu0 %v7566_v3 }
  0x1d   :  { %7265 = vmatpush1.bf16.msra.mxu0 %v7264_v6 }
  0x1e   :  { %7266 = vmatprep.subr.bf16.mxu0 %v7566_v3 }
  0x1f   :  { %34 = vsyncpa [#allocation5], 0  ;;  %v7270_v13 = vpack.c.bf16 %v96_v11, %v95_v10  ;;  %v97_v14 = vld [vmem:[%s8968_s8 + $0x40] sm:$0xff]  ;;  %v98_v15 = vld [vmem:[%s8968_s8 + $0x48] sm:$0xff]  ;;  %s8970_s4 = sld [smem:[#allocation10_spill]]  ;;  %vm201_vm1 = vcmask 1040384  }
  0x20   :  { %v7273_v16 = vpack.c.bf16 %v98_v15, %v97_v14  ;;  %v99_v17 = vld [vmem:[%s8968_s8 + $0x50] sm:$0xff]  ;;  %v100_v18 = vld [vmem:[%s8968_s8 + $0x58] sm:$0xff]  ;;  %v101_v20 = vld [vmem:[%s8968_s8 + $0x60] sm:$0xff]  ;;  %vm204_vm2 = vcmask 1044480   ;;  %s8972_s10 = sld [smem:[#allocation12_spill]]  ;;  %vm213_vm3 = vcmask 261120  }
  0x21   :  { %7268 = vmatpush1.bf16.msra.mxu0 %v7267_v9  ;;  %v7276_v19 = vpack.c.bf16 %v100_v18, %v99_v17  ;;  %v102_v21 = vld [vmem:[%s8968_s8 + $0x68] sm:$0xff]  ;;  %v103_v23 = vld [vmem:[%s8968_s8 + $0x70] sm:$0xff]  ;;  %v104_v24 = vld [vmem:[%s8968_s8 + $0x78] sm:$0xff]  ;;  %s8973_s1 = sld [smem:[#allocation16_spill]]  ;;  %s8975_s29 = sld [smem:[#allocation14_spill]]  ;;  %vm7571_vm4 = vmmov 0  }
  0x22   :  { %7269 = vmatprep.subr.bf16.mxu0 %v7566_v3  ;;  %v7279_v22 = vpack.c.bf16 %v102_v21, %v101_v20  ;;  %v7282_v25 = vpack.c.bf16 %v104_v24, %v103_v23  ;;  %v105_v26 = vld [vmem:[%s8968_s8 + $0x80] sm:$0xff]  ;;  %v106_v27 = vld [vmem:[%s8968_s8 + $0x88] sm:$0xff]  ;;  %v107_v29 = vld [vmem:[%s8968_s8 + $0x90] sm:$0xff]  ;;  %s8976_s2 = sld [smem:[#allocation15_spill]]  ;;  %s8977_s30 = sld [smem:[#allocation17_spill]]  ;;  %vm1405_vm5 = vcmask 64512  }
  0x23   :  { %v7285_v28 = vpack.c.bf16 %v106_v27, %v105_v26  ;;  %v108_v30 = vld [vmem:[%s8968_s8 + $0x98] sm:$0xff]  ;;  %v109_v32 = vld [vmem:[%s8968_s8 + $0xa0] sm:$0xff]  ;;  %v110_v33 = vld [vmem:[%s8968_s8 + $0xa8] sm:$0xff]  ;;  %s8949_s9 = smov 120   ;;  %s8939_s6 = smov 104   ;;  %vm2984_vm6 = vcmask 130048  }
  0x24   :  { %v7288_v31 = vpack.c.bf16 %v108_v30, %v107_v29  ;;  %v7291_v34 = vpack.c.bf16 %v110_v33, %v109_v32  ;;  %v111_v35 = vld [vmem:[%s8968_s8 + $0xb0] sm:$0xff]  ;;  %v112_v36 = vld [vmem:[%s8968_s8 + $0xb8] sm:$0xff]  ;;  %v87_v38 = vld [vmem:[%s8969_s5] sm:$0xff]  ;;  %s8971_s8 = sld [smem:[#allocation11_spill]]  ;;  %s8941_s5 = smov 112   ;;  %vm2987_vm7 = vcmask 195584  }
  0x25   :  { %7271 = vmatpush1.bf16.msra.mxu0 %v7270_v13  ;;  %v7294_v37 = vpack.c.bf16 %v112_v36, %v111_v35  ;;  %v6623_v39 = vld [vmem:[%s8970_s4] ss:$0 sm:$0xff]  ;;  %v438_v32 = vld [vmem:[%s8914_s12 + $0x8] sm:$0xff]  ;;  %v440_v35 = vld [vmem:[%s8914_s12 + $0x18] sm:$0xff]  ;;  %s8979_s7 = sld [smem:[#allocation13_spill]]  ;;  %s8947_s0 = smov 16  }
  0x26   :  { %7272 = vmatprep.subr.bf16.mxu0 %v7566_v3  ;;  %v207_v46 = vld [vmem:[%s8972_s10] sm:$0xff]  ;;  %s8978_s10 = sld [smem:[#allocation19_spill]]  ;;  %s8945_s11 = smov 8   ;;  %vm6456_vm8 = vcmask 1041409   ;;  %vm6459_vm9 = vcmask 254976  }
  0x27   :  { %v257_v2 = vld [vmem:[%s8973_s1] sm:$0xff]  ;;  %v258_v4 = vld [vmem:[%s8973_s1 + $0x8] sm:$0xff]  ;;  %v259_v5 = vld [vmem:[%s8973_s1 + $0x10] sm:$0xff]  ;;  %s8943_s3 = smov 24   ;;  %s8982_s26 = smov 104  }
  0x28   :  { %v7296_v6 = vpack.c.bf16 %v258_v4, %v257_v2  ;;  %v260_v7 = vld [vmem:[%s8973_s1 + $0x18] sm:$0xff]  ;;  %v6626_v21 = vld [vmem:[%s8976_s2] ss:$0 sm:$0xff] }
  0x29   :  { %7274 = vmatpush1.bf16.msra.mxu0 %v7273_v16  ;;  %v7300_v8 = vpack.c.bf16 %v260_v7, %v259_v5 }
  0x2a   :  { %7275 = vmatprep.subr.bf16.mxu0 %v7566_v3  ;;  %v196_v43 = vld [vmem:[%s8971_s8] sm:$0x1]  ;;  %7297 = vmatprep.subr.bf16.mxu1 %v7296_v6  ;;  %s8974_s8 = sld [smem:[#allocation18_spill]] }
  0x2b   :  { %7299 = vmatpush3.bf16.msra.mxu1 %v7296_v6 }
  0x2c   :  { %7301 = vmatprep.subr.bf16.mxu1 %v7300_v8 }
  0x2d   :  { %7277 = vmatpush1.bf16.msra.mxu0 %v7276_v19  ;;  %v6625_v19 = vld [vmem:[%s8975_s29] ss:$0 sm:$0xff] }
  0x2e   :  { %7278 = vmatprep.subr.bf16.mxu0 %v7566_v3 }
  0x2f   :  { %7303 = vmatpush3.bf16.msra.mxu1 %v7300_v8 }
  0x30   :  { %v351_v9 = vld [vmem:[%s8974_s8] sm:$0xff]  ;;  %v352_v10 = vld [vmem:[%s8974_s8 + $0x8] sm:$0xff]  ;;  %v353_v26 = vld [vmem:[%s8974_s8 + $0x10] sm:$0xff] }
  0x31   :  { %7280 = vmatpush1.bf16.msra.mxu0 %v7279_v22  ;;  %v7304_v11 = vpack.c.bf16 %v352_v10, %v351_v9  ;;  %v354_v27 = vld [vmem:[%s8974_s8 + $0x18] sm:$0xff] }
  0x32   :  { %7281 = vmatprep.subr.bf16.mxu0 %v7566_v3  ;;  %v7308_v30 = vpack.c.bf16 %v354_v27, %v353_v26 }
  0x33   :  { %7305 = vmatprep.subr.bf16.mxu1 %v7304_v11 }
  0x35   :  { %7283 = vmatpush1.bf16.msra.mxu0 %v7282_v25 }
  0x36   :  { %7284 = vmatprep.subr.bf16.mxu0 %v7566_v3 }
  0x39   :  { %7286 = vmatpush1.bf16.msra.mxu0 %v7285_v28 }
  0x3a   :  { %7287 = vmatprep.subr.bf16.mxu0 %v7566_v3 }
  0x3d   :  { %7289 = vmatpush1.bf16.msra.mxu0 %v7288_v31  ;;  %v437_v31 = vld [vmem:[%s8914_s12] sm:$0xff] }
  0x3e   :  { %7290 = vmatprep.subr.bf16.mxu0 %v7566_v3  ;;  %v7312_v33 = vpack.c.bf16 %v438_v32, %v437_v31 }
  0x41   :  { %7292 = vmatpush1.bf16.msra.mxu0 %v7291_v34  ;;  %v439_v34 = vld [vmem:[%s8914_s12 + $0x10] sm:$0xff] }
  0x42   :  { %7293 = vmatprep.subr.bf16.mxu0 %v7566_v3  ;;  %v7316_v36 = vpack.c.bf16 %v440_v35, %v439_v34 }
  0x45   :  { %7295 = vmatpush1.bf16.msra.mxu0 %v7294_v37  ;;  %v6627_v37 = vld [vmem:[%s8977_s30] ss:$0 sm:$0xff] }
  0x48   :  { %189 = vmatmul.mubr.f32.vlgmr.msra.gmra.mrb[0].mxu0 %v87_v38 }
 0x11b   :  { %v190_v40 = vpop.f32.mrb[0].mxu0 }
 0x11c   :  { %v191_v41 = vadd.f32 %v6623_v39, %v190_v40  ;;  %v192_v42 = vpop.f32.mrb[1].mxu0 }
 0x11d   :  { %v6630_v42 = vld [vmem:[%s8978_s10] ss:$0 sm:$0xff] }
 0x11e   :  { %v195_v44 = vcombine.high %v191_v41, %v191_v41  ;;  %v197_v45 = vrot.slane %v191_v41, 7 }
 0x120   :  { %v198_v47 = vrot.slane %v195_v44, 7  ;;  %v202_v48 = vsel %vm201_vm1, %v196_v43, %v197_v45 }
 0x121   :  { %v205_v49 = vsel %vm204_vm2, %v202_v48, 0.0 }
 0x122   :  { %v7819_v50 = vadd.f32 %v207_v46, %v205_v49  ;;  %v203_v51 = vsel %vm201_vm1, %v196_v43, %v198_v47 }
 0x123   :  { %v206_v52 = vsel %vm204_vm2, %v203_v51, 0.0 }
 0x124   :  { %v214_v53 = vsel %vm213_vm3, %v7819_v50, 0.0  ;;  %v7823_v54 = vadd.f32 %v207_v46, %v206_v52  ;;  %v7570_v52 = vmov 0.0  }
 0x125   :  { %215 = vadd.xlane.f32.xlu0 %v214_v53  ;;  %7014 = vmatprep.subr.mxu0 %v7570_v52 }
 0x126   :  { %v217_v55 = vsel %vm213_vm3, %v7823_v54, 0.0  ;;  %7016 = vmatprep.mubr.msk.f32.mxu0 %vm7571_vm4, %v7570_v52 }
 0x129   :  { %218 = vadd.xlane.f32.xlu0 %v217_v55  ;;  %v7572_v55 = vmov 1983009808  }
 0x1b2   :  { %v216_v56 = vpop.xlane.xlu0 %215 }
 0x1b3   :  { %v221_v57 = vmul.f32 0.03125, %v216_v56  ;;  %v546_v56 = vunpack.c.l.s4 %v7572_v55 }
 0x1b5   :  { %v223_v58 = vsub.f32 %v7819_v50, %v221_v57  ;;  %v548_v57 = vlaneseq }
 0x1b6   :  { %v219_v59 = vpop.xlane.xlu0 %218 }
 0x1b7   :  { %v222_v60 = vmul.f32 0.03125, %v219_v59  ;;  %v225_v61 = vmul.f32 %v223_v58, %v223_v58  ;;  %v549_v59 = vshrl.u32 %v548_v57, 7 }
 0x1b9   :  { %v224_v62 = vsub.f32 %v7823_v54, %v222_v60  ;;  %v227_v63 = vsel %vm213_vm3, %v225_v61, 0.0 }
 0x1ba   :  { %228 = vadd.xlane.f32.xlu1 %v227_v63 }
 0x1bb   :  { %v226_v0 = vmul.f32 %v224_v62, %v224_v62 }
 0x1bd   :  { %v230_v1 = vsel %vm213_vm3, %v226_v0, 0.0 }
 0x1be   :  { %231 = vadd.xlane.f32.xlu1 %v230_v1 }
 0x247   :  { %v229_v12 = vpop.xlane.xlu1 %228 }
 0x248   :  { %v233_v13 = vmul.f32 0.03125, %v229_v12 }
 0x24a   :  { %v235_v14 = vadd.f32 1e-06, %v233_v13 }
 0x24b   :  { %v232_v15 = vpop.xlane.xlu1 %231 }
 0x24c   :  { %7427 = vrsqrt.f32 %v235_v14  ;;  %v234_v16 = vmul.f32 0.03125, %v232_v15 }
 0x24e   :  { %v236_v17 = vadd.f32 1e-06, %v234_v16 }
 0x250   :  { %7429 = vrsqrt.f32 %v236_v17 }
 0x256   :  { %v7428_v18 = vpop.eup %7427 }
 0x257   :  { %v239_v20 = vmul.f32 %v7428_v18, %v223_v58  ;;  %v547_v58 = vunpack.c.0.s8 %v546_v56 }
 0x259   :  { %v247_v22 = vmul.f32 %v6625_v19, %v239_v20  ;;  %v7922_v0 = vsub.s32 %v547_v58, %v549_v59 }
 0x25a   :  { %v7430_v23 = vpop.eup %7429 }
 0x25b   :  { %v240_v24 = vmul.f32 %v7430_v23, %v224_v62  ;;  %v255_v25 = vadd.f32 %v6626_v21, %v247_v22  ;;  %v7573_v62 = vmov 1934713408  }
 0x25c   :  { %v578_v63 = vunpack.c.l.s4 %v7573_v62 }
 0x25d   :  { %v248_v28 = vmul.f32 %v6625_v19, %v240_v24  ;;  %6949 = vmatprep.mubr.msk.f32.mxu1 %vm213_vm3, %v255_v25 }
 0x25e   :  { %v579_v5 = vunpack.c.0.s8 %v578_v63 }
 0x25f   :  { %v256_v29 = vadd.f32 %v6626_v21, %v248_v28 }
 0x260   :  { %v7930_v15 = vsub.s32 %v579_v5, %v549_v59 }
 0x261   :  { %6950 = vmatmul.mubr.msk.f32.vlgmr.msra.gmra.mrb[0].mxu1 %vm213_vm3, %v256_v29 }
 0x262   :  { %7307 = vmatpush3.bf16.msra.mxu1 %v7304_v11  ;;  %6960 = vmatprep.mubr.msk.f32.mxu1 %vm213_vm3, %v255_v25 }
 0x263   :  { %7309 = vmatprep.subr.bf16.mxu1 %v7308_v30 }
 0x266   :  { %7311 = vmatpush3.bf16.msra.mxu1 %v7308_v30 }
 0x267   :  { %7313 = vmatprep.subr.bf16.mxu1 %v7312_v33 }
 0x269   :  { %6961 = vmatmul.mubr.msk.f32.vlgmr.msra.gmra.mrb[2].mxu1 %vm213_vm3, %v256_v29 }
 0x26a   :  { %7315 = vmatpush3.bf16.msra.mxu1 %v7312_v33  ;;  %6971 = vmatprep.mubr.msk.f32.mxu1 %vm213_vm3, %v255_v25 }
 0x26b   :  { %7317 = vmatprep.subr.bf16.mxu1 %v7316_v36 }
 0x26e   :  { %7319 = vmatpush3.bf16.msra.mxu1 %v7316_v36 }
 0x26f   :  { %6974 = vmatprep.subr.mxu1 %v7570_v52 }
 0x271   :  { %6972 = vmatmul.mubr.msk.f32.vlgmr.msra.gmra.mrb[4].mxu1 %vm213_vm3, %v256_v29 }
 0x272   :  { %6976 = vmatprep.mubr.msk.f32.mxu1 %vm7571_vm4, %v7570_v52 }
 0x334   :  { %v6951_v38 = vpop.f32.mrb[0].mxu1 }
 0x335   :  { %v340_v39 = vpop.f32.mrb[1].mxu1  ;;  %v346_v49 = vadd.f32 %v6951_v38, %v6627_v37 }
 0x336   :  { %v341_v40 = vadd.f32 %v6627_v37, %v340_v39 }
 0x337   :  { %v7908_v51 = vmul.f32 0.35355338, %v346_v49 }
 0x338   :  { %v7882_v41 = vmul.f32 0.35355338, %v341_v40 }
 0x33a   :  { %525 = vrot.lane.b32.xlu1 %v7882_v41, %s8949_s9 }
 0x33c   :  { %v6962_v43 = vpop.f32.mrb[2].mxu1 }
 0x33d   :  { %v428_v44 = vpop.f32.mrb[3].mxu1  ;;  %v7898_v48 = vadd.f32 %v6962_v43, %v6630_v42 }
 0x33e   :  { %v429_v45 = vadd.f32 %v6630_v42, %v428_v44 }
 0x340   :  { %817 = vrot.lane.b32.xlu0 %v429_v45, %s8949_s9  ;;  %823 = vrot.lane.b32.xlu1 %v429_v45, %s8941_s5 }
 0x344   :  { %v7891_v46 = vpop.f32.mrb[4].mxu1  ;;  %531 = vrot.lane.b32.xlu0 %v7882_v41, %s8941_s5  ;;  %829 = vrot.lane.b32.xlu1 %v429_v45, %s8939_s6 }
 0x345   :  { %v7896_v47 = vpop.f32.mrb[5].mxu1 }
 0x348   :  { %819 = vrot.lane.b32.xlu0 %v7898_v48, %s8949_s9  ;;  %537 = vrot.lane.b32.xlu1 %v7882_v41, %s8939_s6 }
 0x34c   :  { %831 = vrot.lane.b32.xlu0 %v7898_v48, %s8939_s6  ;;  %825 = vrot.lane.b32.xlu1 %v7898_v48, %s8941_s5 }
 0x350   :  { %533 = vrot.lane.b32.xlu0 %v7908_v51, %s8941_s5  ;;  %527 = vrot.lane.b32.xlu1 %v7908_v51, %s8949_s9 }
 0x354   :  { %539 = vrot.lane.b32.xlu1 %v7908_v51, %s8939_s6 }
 0x3ac   :  { %v526_v53 = vpop.permute.xlu1 %525 }
 0x3b2   :  { %v818_v60 = vpop.permute.xlu0 %817  ;;  %v824_v61 = vpop.permute.xlu1 %823 }
 0x3b3   :  { %v835_v1 = vcombine.low %v429_v45, %v824_v61  ;;  %v836_v2 = vcombine.high %v429_v45, %v824_v61 }
 0x3b5   :  { %v843_v9 = vrot.slane %v835_v1, %v7922_v0  ;;  %v850_v10 = vrot.slane %v836_v2, %v7922_v0 }
 0x3b6   :  { %v532_v4 = vpop.permute.xlu0 %531  ;;  %v830_v6 = vpop.permute.xlu1 %829 }
 0x3b7   :  { %v851_v7 = vcombine.low %v818_v60, %v830_v6  ;;  %v852_v8 = vcombine.high %v818_v60, %v830_v6  ;;  %v543_v13 = vcombine.low %v7882_v41, %v532_v4  ;;  %v544_v14 = vcombine.high %v7882_v41, %v532_v4 }
 0x3b9   :  { %v859_v11 = vrot.slane %v851_v7, %v7922_v0  ;;  %v866_v12 = vrot.slane %v852_v8, %v7922_v0  ;;  %v551_v24 = vrot.slane %v543_v13, %v7922_v0  ;;  %v558_v25 = vrot.slane %v544_v14, %v7922_v0 }
 0x3ba   :  { %v538_v16 = vpop.permute.xlu1 %537  ;;  %v820_v21 = vpop.permute.xlu0 %819 }
 0x3bb   :  { %v867_v17 = vcombine.low %v843_v9, %v859_v11  ;;  %v868_v18 = vcombine.high %v843_v9, %v859_v11  ;;  %v883_v19 = vcombine.low %v850_v10, %v866_v12  ;;  %v884_v20 = vcombine.high %v850_v10, %v866_v12 }
 0x3bc   :  { %v559_v22 = vcombine.low %v526_v53, %v538_v16  ;;  %v560_v23 = vcombine.high %v526_v53, %v538_v16 }
 0x3bd   :  { %v875_v29 = vrot.slane %v867_v17, %v7930_v15  ;;  %v882_v30 = vrot.slane %v868_v18, %v7930_v15  ;;  %v891_v31 = vrot.slane %v883_v19, %v7930_v15  ;;  %v898_v32 = vrot.slane %v884_v20, %v7930_v15 }
 0x3be   :  { %v567_v26 = vrot.slane %v559_v22, %v7922_v0  ;;  %v574_v27 = vrot.slane %v560_v23, %v7922_v0  ;;  %v826_v28 = vpop.permute.xlu1 %825  ;;  %v832_v37 = vpop.permute.xlu0 %831 }
 0x3bf   :  { %v971_v43 = vcombine.low %v875_v29, %v882_v30  ;;  %v6640_v44 = vcombine.high %v875_v29, %v882_v30  ;;  %v987_v45 = vcombine.low %v891_v31, %v898_v32  ;;  %v6641_v49 = vcombine.high %v891_v31, %v898_v32 }
 0x3c0   :  { %v575_v33 = vcombine.low %v551_v24, %v567_v26  ;;  %v576_v34 = vcombine.high %v551_v24, %v567_v26  ;;  %v591_v35 = vcombine.low %v558_v25, %v574_v27  ;;  %v592_v36 = vcombine.high %v558_v25, %v574_v27 }
 0x3c1   :  { %v919_v58 = vcombine.low %v820_v21, %v832_v37  ;;  %v920_v59 = vcombine.high %v820_v21, %v832_v37  ;;  %v903_v60 = vcombine.low %v7898_v48, %v826_v28  ;;  %v904_v61 = vcombine.high %v7898_v48, %v826_v28 }
 0x3c2   :  { %v583_v38 = vrot.slane %v575_v33, %v7930_v15  ;;  %v590_v39 = vrot.slane %v576_v34, %v7930_v15  ;;  %v599_v40 = vrot.slane %v591_v35, %v7930_v15  ;;  %v606_v41 = vrot.slane %v592_v36, %v7930_v15  ;;  %v528_v42 = vpop.permute.xlu1 %527  ;;  %v534_v4 = vpop.permute.xlu0 %533 }
 0x3c3   :  { %v927_v62 = vrot.slane %v919_v58, %v7922_v0  ;;  %v934_v63 = vrot.slane %v920_v59, %v7922_v0  ;;  %v911_v1 = vrot.slane %v903_v60, %v7922_v0  ;;  %v918_v2 = vrot.slane %v904_v61, %v7922_v0 }
 0x3c4   :  { %v679_v53 = vcombine.low %v583_v38, %v590_v39  ;;  %v6636_v55 = vcombine.high %v583_v38, %v590_v39  ;;  %v695_v56 = vcombine.low %v599_v40, %v606_v41  ;;  %v6637_v57 = vcombine.high %v599_v40, %v606_v41 }
 0x3c5   :  { %v7951_v6 = vrot.slane %v971_v43, %v7922_v0  ;;  %v986_v7 = vrot.slane %v6640_v44, %v7922_v0  ;;  %v994_v8 = vrot.slane %v987_v45, %v7922_v0  ;;  %v1002_v9 = vrot.slane %v6641_v49, %v7922_v0 }
 0x3c6   :  { %v540_v5 = vpop.permute.xlu1 %539  ;;  %v7957_v48 = vrot.slane %v679_v53, %v7922_v0  ;;  %v7960_v10 = vrot.slane %v6636_v55, %v7922_v0  ;;  %v7963_v11 = vrot.slane %v695_v56, %v7922_v0  ;;  %v7966_v12 = vrot.slane %v6637_v57, %v7922_v0 }
 0x3c7   :  { %v611_v13 = vcombine.low %v7908_v51, %v534_v4  ;;  %v612_v14 = vcombine.high %v7908_v51, %v534_v4  ;;  %v627_v16 = vcombine.low %v528_v42, %v540_v5  ;;  %v628_v17 = vcombine.high %v528_v42, %v540_v5 }
 0x3c8   :  { %v935_v18 = vcombine.low %v911_v1, %v927_v62  ;;  %v936_v19 = vcombine.high %v911_v1, %v927_v62  ;;  %v951_v20 = vcombine.low %v918_v2, %v934_v63  ;;  %v952_v21 = vcombine.high %v918_v2, %v934_v63 }
 0x3c9   :  { %v619_v22 = vrot.slane %v611_v13, %v7922_v0  ;;  %v626_v23 = vrot.slane %v612_v14, %v7922_v0  ;;  %v635_v24 = vrot.slane %v627_v16, %v7922_v0  ;;  %v642_v25 = vrot.slane %v628_v17, %v7922_v0 }
 0x3ca   :  { %v1003_v51 = vcombine.low %v7951_v6, %v986_v7  ;;  %v1019_v30 = vcombine.low %v994_v8, %v1002_v9  ;;  %v711_v31 = vcombine.low %v7957_v48, %v7960_v10  ;;  %v727_v32 = vcombine.low %v7963_v11, %v7966_v12 }
 0x3cb   :  { %v643_v26 = vcombine.low %v619_v22, %v635_v24  ;;  %v644_v27 = vcombine.high %v619_v22, %v635_v24  ;;  %v659_v28 = vcombine.low %v626_v23, %v642_v25  ;;  %v660_v29 = vcombine.high %v626_v23, %v642_v25 }
 0x3cc   :  { %v943_v33 = vrot.slane %v935_v18, %v7930_v15  ;;  %v950_v34 = vrot.slane %v936_v19, %v7930_v15  ;;  %v959_v35 = vrot.slane %v951_v20, %v7930_v15  ;;  %v966_v36 = vrot.slane %v952_v21, %v7930_v15 }
 0x3cd   :  { %v651_v37 = vrot.slane %v643_v26, %v7930_v15  ;;  %v658_v38 = vrot.slane %v644_v27, %v7930_v15  ;;  %v667_v39 = vrot.slane %v659_v28, %v7930_v15  ;;  %v674_v40 = vrot.slane %v660_v29, %v7930_v15 }
 0x3ce   :  { %v1011_v41 = vrot.slane %v1003_v51, %v7930_v15  ;;  %v1027_v42 = vrot.slane %v1019_v30, %v7930_v15  ;;  %v719_v43 = vrot.slane %v711_v31, %v7930_v15  ;;  %v735_v44 = vrot.slane %v727_v32, %v7930_v15 }
 0x3cf   :  { %v1039_v45 = vcombine.low %v943_v33, %v950_v34  ;;  %v6642_v49 = vcombine.high %v943_v33, %v950_v34  ;;  %v1055_v53 = vcombine.low %v959_v35, %v966_v36  ;;  %v1004_v55 = vcombine.high %v7951_v6, %v986_v7 }
 0x3d0   :  { %v1020_v56 = vcombine.high %v994_v8, %v1002_v9  ;;  %v6643_v57 = vcombine.high %v959_v35, %v966_v36  ;;  %v1035_v58 = vcombine.low %v1011_v41, %v1027_v42  ;;  %v712_v59 = vcombine.high %v7957_v48, %v7960_v10 }
 0x3d1   :  { %v743_v60 = vcombine.low %v719_v43, %v735_v44  ;;  %v728_v61 = vcombine.high %v7963_v11, %v7966_v12  ;;  %v747_v62 = vcombine.low %v651_v37, %v658_v38  ;;  %v6638_v63 = vcombine.high %v651_v37, %v658_v38 }
 0x3d2   :  { %v763_v1 = vcombine.low %v667_v39, %v674_v40  ;;  %6975 = vmatpush3.xpose.msk.msra.mxu1 %vm1405_vm5, %v1035_v58  ;;  %v1046_v2 = vrot.slane %v1039_v45, %v7922_v0  ;;  %v1054_v4 = vrot.slane %v6642_v49, %v7922_v0  ;;  %v1062_v5 = vrot.slane %v1055_v53, %v7922_v0  ;;  %v6648_v45 = vld [vmem:[%s8979_s7] ss:$0 sm:$0xff] }
 0x3d3   :  { %v6639_v6 = vcombine.high %v667_v39, %v674_v40  ;;  %6979 = vmatprep.subr.mxu1 %v7570_v52  ;;  %v1070_v7 = vrot.slane %v6643_v57, %v7922_v0  ;;  %v1036_v8 = vcombine.high %v1011_v41, %v1027_v42  ;;  %v1018_v9 = vrot.slane %v1004_v55, %v7930_v15 }
 0x3d4   :  { %v1034_v48 = vrot.slane %v1020_v56, %v7930_v15  ;;  %v754_v10 = vrot.slane %v747_v62, %v7922_v0  ;;  %v762_v11 = vrot.slane %v6638_v63, %v7922_v0  ;;  %v770_v12 = vrot.slane %v763_v1, %v7922_v0 }
 0x3d5   :  { %6977 = vmatmul.mubr.msk.f32.vlgmr.msra.gmra.mrb[6].mxu1 %vm1405_vm5, %v743_v60  ;;  %v778_v13 = vrot.slane %v6639_v6, %v7922_v0  ;;  %v744_v14 = vcombine.high %v719_v43, %v735_v44  ;;  %v726_v16 = vrot.slane %v712_v59, %v7930_v15  ;;  %v742_v17 = vrot.slane %v728_v61, %v7930_v15 }
 0x3d6   :  { %6980 = vmatpush3.xpose.msk.msra.mxu1 %vm1405_vm5, %v1036_v8  ;;  %6981 = vmatprep.mubr.msk.f32.mxu1 %vm7571_vm4, %v7570_v52  ;;  %v1071_v18 = vcombine.low %v1046_v2, %v1054_v4  ;;  %v1087_v19 = vcombine.low %v1062_v5, %v1070_v7  ;;  %v1037_v20 = vcombine.low %v1018_v9, %v1034_v48 }
 0x3d7   :  { %6984 = vmatprep.subr.mxu1 %v7570_v52  ;;  %v779_v21 = vcombine.low %v754_v10, %v762_v11  ;;  %v795_v22 = vcombine.low %v770_v12, %v778_v13  ;;  %v745_v23 = vcombine.low %v726_v16, %v742_v17  ;;  %v1038_v24 = vcombine.high %v1018_v9, %v1034_v48 }
 0x3d8   :  { %v1079_v25 = vrot.slane %v1071_v18, %v7930_v15  ;;  %v1095_v26 = vrot.slane %v1087_v19, %v7930_v15  ;;  %v746_v27 = vcombine.high %v726_v16, %v742_v17  ;;  %v1072_v51 = vcombine.high %v1046_v2, %v1054_v4 }
 0x3d9   :  { %6982 = vmatmul.mubr.msk.f32.vlgmr.msra.gmra.mrb[8].mxu1 %vm1405_vm5, %v744_v14  ;;  %v787_v28 = vrot.slane %v779_v21, %v7930_v15  ;;  %v803_v29 = vrot.slane %v795_v22, %v7930_v15  ;;  %v1088_v30 = vcombine.high %v1062_v5, %v1070_v7  ;;  %v780_v32 = vcombine.high %v754_v10, %v762_v11  ;;  %v6633_v21 = vld [vmem:[%s8915_s13] ss:$0 sm:$0xff] }
 0x3da   :  { %6985 = vmatpush3.xpose.msk.msra.mxu1 %vm1405_vm5, %v1037_v20  ;;  %6986 = vmatprep.mubr.msk.f32.mxu1 %vm7571_vm4, %v7570_v52  ;;  %v1103_v31 = vcombine.low %v1079_v25, %v1095_v26  ;;  %v796_v33 = vcombine.high %v770_v12, %v778_v13  ;;  %v1104_v35 = vcombine.high %v1079_v25, %v1095_v26 }
 0x3db   :  { %6989 = vmatprep.subr.mxu1 %v7570_v52  ;;  %v811_v34 = vcombine.low %v787_v28, %v803_v29  ;;  %v1086_v36 = vrot.slane %v1072_v51, %v7930_v15  ;;  %v1102_v37 = vrot.slane %v1088_v30, %v7930_v15  ;;  %v812_v38 = vcombine.high %v787_v28, %v803_v29 }
 0x3dc   :  { %v794_v39 = vrot.slane %v780_v32, %v7930_v15  ;;  %v810_v40 = vrot.slane %v796_v33, %v7930_v15  ;;  %v515_v22 = vadd.f32 %v6633_v21, %v7896_v47  ;;  %v8078_v25 = vadd.f32 %v7891_v46, %v6633_v21 }
 0x3dd   :  { %6987 = vmatmul.mubr.msk.f32.vlgmr.msra.gmra.mrb[10].mxu1 %vm1405_vm5, %v745_v23  ;;  %v1105_v41 = vcombine.low %v1086_v36, %v1102_v37  ;;  %v1106_v43 = vcombine.high %v1086_v36, %v1102_v37 }
 0x3de   :  { %6990 = vmatpush3.xpose.msk.msra.mxu1 %vm1405_vm5, %v1038_v24  ;;  %6991 = vmatprep.mubr.msk.f32.mxu1 %vm7571_vm4, %v7570_v52  ;;  %v813_v42 = vcombine.low %v794_v39, %v810_v40  ;;  %v814_v44 = vcombine.high %v794_v39, %v810_v40 }
 0x3df   :  { %6994 = vmatprep.subr.mxu1 %v7570_v52 }
 0x3e1   :  { %6992 = vmatmul.mubr.msk.f32.vlgmr.msra.gmra.mrb[12].mxu1 %vm1405_vm5, %v746_v27 }
 0x3e2   :  { %6995 = vmatpush3.xpose.msk.msra.mxu1 %vm1405_vm5, %v1103_v31  ;;  %6996 = vmatprep.mubr.msk.f32.mxu1 %vm7571_vm4, %v7570_v52 }
 0x3e3   :  { %6999 = vmatprep.subr.mxu1 %v7570_v52 }
 0x3e5   :  { %6997 = vmatmul.mubr.msk.f32.vlgmr.msra.gmra.mrb[14].mxu1 %vm1405_vm5, %v811_v34 }
 0x3e6   :  { %7000 = vmatpush3.xpose.msk.msra.mxu1 %vm1405_vm5, %v1104_v35  ;;  %7001 = vmatprep.mubr.msk.f32.mxu1 %vm7571_vm4, %v7570_v52 }
 0x3e7   :  { %7004 = vmatprep.subr.mxu1 %v7570_v52 }
 0x3e9   :  { %7002 = vmatmul.mubr.msk.f32.vlgmr.msra.gmra.mrb[16].mxu1 %vm1405_vm5, %v812_v38 }
 0x3ea   :  { %7005 = vmatpush3.xpose.msk.msra.mxu1 %vm1405_vm5, %v1105_v41  ;;  %7006 = vmatprep.mubr.msk.f32.mxu1 %vm7571_vm4, %v7570_v52 }
 0x3eb   :  { %7009 = vmatprep.subr.mxu1 %v7570_v52 }
 0x3ed   :  { %7007 = vmatmul.mubr.msk.f32.vlgmr.msra.gmra.mrb[18].mxu1 %vm1405_vm5, %v813_v42 }
 0x3ee   :  { %7010 = vmatpush3.xpose.msk.msra.mxu1 %vm1405_vm5, %v1106_v43  ;;  %7011 = vmatprep.mubr.msk.f32.mxu1 %vm7571_vm4, %v7570_v52 }
 0x3ef   :  { %7019 = vmatprep.subr.mxu1 %v7570_v52 }
 0x3f1   :  { %7012 = vmatmul.mubr.msk.f32.vlgmr.msra.gmra.mrb[20].mxu1 %vm1405_vm5, %v814_v44 }
 0x3f2   :  { %7021 = vmatprep.mubr.msk.f32.mxu1 %vm7571_vm4, %v7570_v52 }
 0x4a8   :  { %v1478_v49 = vpop.f32.mrb[6].mxu1 }
 0x4a9   :  { %v1479_v53 = vadd.f32 %v6648_v45, %v1478_v49  ;;  %v6978_v55 = vpop.f32.mrb[7].mxu1 }
 0x4ab   :  { %v2014_v56 = vsel %vm1405_vm5, %v1479_v53, -inf }
 0x4ac   :  { %2015 = vmax.xlane.f32.xlu0 %v2014_v56  ;;  %v1554_v57 = vpop.f32.mrb[8].mxu1 }
 0x4ad   :  { %v1555_v58 = vadd.f32 %v6648_v45, %v1554_v57  ;;  %v6983_v59 = vpop.f32.mrb[9].mxu1 }
 0x4af   :  { %v2017_v60 = vsel %vm1405_vm5, %v1555_v58, -inf }
 0x4b0   :  { %2018 = vmax.xlane.f32.xlu1 %v2017_v60  ;;  %v1630_v61 = vpop.f32.mrb[10].mxu1 }
 0x4b1   :  { %v1631_v62 = vadd.f32 %v6648_v45, %v1630_v61  ;;  %v6988_v63 = vpop.f32.mrb[11].mxu1 }
 0x4b3   :  { %v2020_v1 = vsel %vm1405_vm5, %v1631_v62, -inf }
 0x4b4   :  { %2021 = vmax.xlane.f32.xlu0 %v2020_v1  ;;  %v1706_v2 = vpop.f32.mrb[12].mxu1 }
 0x4b5   :  { %v1707_v4 = vadd.f32 %v6648_v45, %v1706_v2  ;;  %v6993_v5 = vpop.f32.mrb[13].mxu1 }
 0x4b7   :  { %v2023_v6 = vsel %vm1405_vm5, %v1707_v4, -inf }
 0x4b8   :  { %2024 = vmax.xlane.f32.xlu0 %v2023_v6  ;;  %v1782_v7 = vpop.f32.mrb[14].mxu1 }
 0x4b9   :  { %v1783_v8 = vadd.f32 %v6648_v45, %v1782_v7  ;;  %v6998_v9 = vpop.f32.mrb[15].mxu1 }
 0x4bb   :  { %v2026_v48 = vsel %vm1405_vm5, %v1783_v8, -inf }
 0x4bc   :  { %2027 = vmax.xlane.f32.xlu0 %v2026_v48  ;;  %v1858_v10 = vpop.f32.mrb[16].mxu1 }
 0x4bd   :  { %v1859_v11 = vadd.f32 %v6648_v45, %v1858_v10  ;;  %v7003_v12 = vpop.f32.mrb[17].mxu1 }
 0x4bf   :  { %v2029_v13 = vsel %vm1405_vm5, %v1859_v11, -inf }
 0x4c0   :  { %2030 = vmax.xlane.f32.xlu1 %v2029_v13  ;;  %v1934_v14 = vpop.f32.mrb[18].mxu1 }
 0x4c1   :  { %v1935_v16 = vadd.f32 %v6648_v45, %v1934_v14  ;;  %v7008_v17 = vpop.f32.mrb[19].mxu1 }
 0x4c3   :  { %v2032_v18 = vsel %vm1405_vm5, %v1935_v16, -inf }
 0x4c4   :  { %2033 = vmax.xlane.f32.xlu0 %v2032_v18  ;;  %v2010_v19 = vpop.f32.mrb[20].mxu1 }
 0x4c5   :  { %v7013_v20 = vpop.f32.mrb[21].mxu1  ;;  %v8073_v23 = vadd.f32 %v6648_v45, %v2010_v19 }
 0x4c7   :  { %v2035_v24 = vsel %vm1405_vm5, %v8073_v23, -inf }
 0x4d1   :  { %1115 = vrot.lane.b32.xlu1 %v515_v22, %s8941_s5 }
 0x4d5   :  { %1121 = vrot.lane.b32.xlu1 %v515_v22, %s8939_s6 }
 0x4da   :  { %1109 = vrot.lane.b32.xlu0 %v515_v22, %s8949_s9 }
 0x4f9   :  { %2036 = vmax.xlane.f32.xlu1 %v2035_v24 }
 0x50a   :  { %1111 = vrot.lane.b32.xlu1 %v8078_v25, %s8949_s9 }
 0x539   :  { %v2016_v26 = vpop.xlane.xlu0 %2015 }
 0x53a   :  { %v2038_v47 = vsub.f32 %v1479_v53, %v2016_v26 }
 0x53c   :  { %v2046_v27 = vmul.f32 1.442695, %v2038_v47 }
 0x53d   :  { %v2019_v28 = vpop.xlane.xlu1 %2018 }
 0x53e   :  { %7431 = vpow2.f32 %v2046_v27  ;;  %v2039_v29 = vsub.f32 %v1555_v58, %v2019_v28 }
 0x540   :  { %v2048_v51 = vmul.f32 1.442695, %v2039_v29 }
 0x541   :  { %v2022_v30 = vpop.xlane.xlu0 %2021 }
 0x542   :  { %7433 = vpow2.f32 %v2048_v51  ;;  %v2040_v31 = vsub.f32 %v1631_v62, %v2022_v30 }
 0x544   :  { %v2050_v32 = vmul.f32 1.442695, %v2040_v31 }
 0x545   :  { %v2025_v33 = vpop.xlane.xlu0 %2024 }
 0x546   :  { %7435 = vpow2.f32 %v2050_v32  ;;  %v2041_v34 = vsub.f32 %v1707_v4, %v2025_v33 }
 0x548   :  { %v8082_v35 = vpop.eup %7431  ;;  %v2052_v46 = vmul.f32 1.442695, %v2041_v34 }
 0x549   :  { %v2028_v36 = vpop.xlane.xlu0 %2027  ;;  %v2062_v37 = vsel %vm1405_vm5, %v8082_v35, 0.0 }
 0x54a   :  { %7437 = vpow2.f32 %v2052_v46  ;;  %v2042_v38 = vsub.f32 %v1783_v8, %v2028_v36  ;;  %2063 = vadd.xlane.f32.xlu0 %v2062_v37 }
 0x54c   :  { %v8086_v39 = vpop.eup %7433  ;;  %v2054_v40 = vmul.f32 1.442695, %v2042_v38 }
 0x54d   :  { %v2031_v41 = vpop.xlane.xlu1 %2030  ;;  %v2065_v42 = vsel %vm1405_vm5, %v8086_v39, 0.0 }
 0x54e   :  { %7439 = vpow2.f32 %v2054_v40  ;;  %v2043_v43 = vsub.f32 %v1859_v11, %v2031_v41  ;;  %2066 = vadd.xlane.f32.xlu1 %v2065_v42 }
 0x550   :  { %v8090_v44 = vpop.eup %7435  ;;  %v2056_v45 = vmul.f32 1.442695, %v2043_v43 }
 0x551   :  { %v2034_v49 = vpop.xlane.xlu0 %2033  ;;  %v1116_v53 = vpop.permute.xlu1 %1115  ;;  %v2068_v55 = vsel %vm1405_vm5, %v8090_v44, 0.0 }
 0x552   :  { %7441 = vpow2.f32 %v2056_v45  ;;  %v2044_v56 = vsub.f32 %v1935_v16, %v2034_v49  ;;  %2069 = vadd.xlane.f32.xlu0 %v2068_v55  ;;  %v1127_v59 = vcombine.low %v515_v22, %v1116_v53  ;;  %v1128_v60 = vcombine.high %v515_v22, %v1116_v53 }
 0x554   :  { %v8094_v57 = vpop.eup %7437  ;;  %v2058_v58 = vmul.f32 1.442695, %v2044_v56  ;;  %v1135_v5 = vrot.slane %v1127_v59, %v7922_v0  ;;  %v1142_v6 = vrot.slane %v1128_v60, %v7922_v0 }
 0x555   :  { %v1110_v61 = vpop.permute.xlu0 %1109  ;;  %v1122_v62 = vpop.permute.xlu1 %1121  ;;  %v2071_v63 = vsel %vm1405_vm5, %v8094_v57, 0.0 }
 0x556   :  { %7443 = vpow2.f32 %v2058_v58  ;;  %v1143_v1 = vcombine.low %v1110_v61, %v1122_v62  ;;  %v1144_v2 = vcombine.high %v1110_v61, %v1122_v62  ;;  %2072 = vadd.xlane.f32.xlu1 %v2071_v63 }
 0x558   :  { %v8098_v4 = vpop.eup %7439  ;;  %v1151_v7 = vrot.slane %v1143_v1, %v7922_v0  ;;  %v1158_v8 = vrot.slane %v1144_v2, %v7922_v0 }
 0x559   :  { %v2074_v9 = vsel %vm1405_vm5, %v8098_v4, 0.0 }
 0x55a   :  { %v1159_v48 = vcombine.low %v1135_v5, %v1151_v7  ;;  %v1160_v10 = vcombine.high %v1135_v5, %v1151_v7  ;;  %v1175_v11 = vcombine.low %v1142_v6, %v1158_v8  ;;  %v1176_v12 = vcombine.high %v1142_v6, %v1158_v8  ;;  %2075 = vadd.xlane.f32.xlu1 %v2074_v9 }
 0x55c   :  { %v8106_v13 = vpop.eup %7441  ;;  %v1167_v14 = vrot.slane %v1159_v48, %v7930_v15  ;;  %v1174_v16 = vrot.slane %v1160_v10, %v7930_v15  ;;  %v1183_v17 = vrot.slane %v1175_v11, %v7930_v15  ;;  %v1190_v18 = vrot.slane %v1176_v12, %v7930_v15 }
 0x55d   :  { %v2077_v19 = vsel %vm1405_vm5, %v8106_v13, 0.0 }
 0x55e   :  { %v1263_v20 = vcombine.low %v1167_v14, %v1174_v16  ;;  %v6644_v21 = vcombine.high %v1167_v14, %v1174_v16  ;;  %v1279_v22 = vcombine.low %v1183_v17, %v1190_v18  ;;  %v6645_v24 = vcombine.high %v1183_v17, %v1190_v18  ;;  %2078 = vadd.xlane.f32.xlu0 %v2077_v19 }
 0x560   :  { %v8114_v26 = vpop.eup %7443  ;;  %v1270_v47 = vrot.slane %v1263_v20, %v7922_v0  ;;  %v1278_v27 = vrot.slane %v6644_v21, %v7922_v0  ;;  %v1286_v28 = vrot.slane %v1279_v22, %v7922_v0  ;;  %v1294_v29 = vrot.slane %v6645_v24, %v7922_v0 }
 0x561   :  { %v2080_v51 = vsel %vm1405_vm5, %v8114_v26, 0.0 }
 0x562   :  { %2081 = vadd.xlane.f32.xlu0 %v2080_v51  ;;  %v1295_v30 = vcombine.low %v1270_v47, %v1278_v27  ;;  %v1311_v31 = vcombine.low %v1286_v28, %v1294_v29  ;;  %v1296_v32 = vcombine.high %v1270_v47, %v1278_v27  ;;  %v1312_v33 = vcombine.high %v1286_v28, %v1294_v29 }
 0x564   :  { %v1303_v34 = vrot.slane %v1295_v30, %v7930_v15  ;;  %v1319_v46 = vrot.slane %v1311_v31, %v7930_v15  ;;  %v1310_v36 = vrot.slane %v1296_v32, %v7930_v15  ;;  %v1326_v37 = vrot.slane %v1312_v33, %v7930_v15 }
 0x566   :  { %v1327_v38 = vcombine.low %v1303_v34, %v1319_v46  ;;  %v1328_v40 = vcombine.high %v1303_v34, %v1319_v46  ;;  %v1329_v41 = vcombine.low %v1310_v36, %v1326_v37  ;;  %v1330_v42 = vcombine.high %v1310_v36, %v1326_v37 }
 0x568   :  { %7015 = vmatpush3.msra.mxu0 %v1327_v38  ;;  %7020 = vmatpush3.msra.mxu1 %v1328_v40 }
 0x569   :  { %7024 = vmatprep.subr.mxu0 %v7570_v52  ;;  %7029 = vmatprep.subr.mxu1 %v7570_v52 }
 0x56b   :  { %1123 = vrot.lane.b32.xlu1 %v8078_v25, %s8939_s6  ;;  %s7577_s6 = smov [#allocation2]  }
 0x586   :  { %v2037_v43 = vpop.xlane.xlu1 %2036 }
 0x587   :  { %v2045_v45 = vsub.f32 %v8073_v23, %v2037_v43 }
 0x589   :  { %v2060_v49 = vmul.f32 1.442695, %v2045_v45 }
 0x58a   :  { %v1112_v56 = vpop.permute.xlu1 %1111 }
 0x58b   :  { %7445 = vpow2.f32 %v2060_v49 }
 0x595   :  { %v8131_v53 = vpop.eup %7445 }
 0x596   :  { %v2083_v55 = vsel %vm1405_vm5, %v8131_v53, 0.0 }
 0x597   :  { %2084 = vadd.xlane.f32.xlu0 %v2083_v55 }
 0x5ad   :  { %1117 = vrot.lane.b32.xlu0 %v8078_v25, %s8941_s5  ;;  %s8985_s5 = smov 24  }
 0x5d7   :  { %v2064_v58 = vpop.xlane.xlu0 %2063 }
 0x5d8   :  { %7447 = vrcp.f32 %v2064_v58 }
 0x5db   :  { %v2067_v59 = vpop.xlane.xlu1 %2066 }
 0x5dc   :  { %7449 = vrcp.f32 %v2067_v59 }
 0x5df   :  { %v2070_v60 = vpop.xlane.xlu0 %2069 }
 0x5e0   :  { %7451 = vrcp.f32 %v2070_v60 }
 0x5e2   :  { %v7448_v61 = vpop.eup %7447 }
 0x5e3   :  { %v2087_v23 = vmul.f32 %v7448_v61, %v8082_v35  ;;  %v2073_v62 = vpop.xlane.xlu1 %2072 }
 0x5e4   :  { %7453 = vrcp.f32 %v2073_v62 }
 0x5e5   :  { %7017 = vmatmul.mubr.msk.f32.vlgmr.msra.gmra.mrb[2].mxu0 %vm1405_vm5, %v2087_v23 }
 0x5e6   :  { %v7450_v63 = vpop.eup %7449  ;;  %7025 = vmatpush3.msra.mxu0 %v1329_v41  ;;  %7026 = vmatprep.mubr.msk.f32.mxu0 %vm7571_vm4, %v7570_v52 }
 0x5e7   :  { %v2089_v1 = vmul.f32 %v7450_v63, %v8086_v39  ;;  %7034 = vmatprep.subr.mxu0 %v7570_v52  ;;  %v2076_v7 = vpop.xlane.xlu1 %2075 }
 0x5e8   :  { %7455 = vrcp.f32 %v2076_v7 }
 0x5e9   :  { %7022 = vmatmul.mubr.msk.f32.vlgmr.msra.gmra.mrb[22].mxu1 %vm1405_vm5, %v2089_v1 }
 0x5ea   :  { %v7452_v2 = vpop.eup %7451  ;;  %7030 = vmatpush3.msra.mxu1 %v1330_v42  ;;  %7031 = vmatprep.mubr.msk.f32.mxu1 %vm7571_vm4, %v7570_v52 }
 0x5eb   :  { %v2091_v35 = vmul.f32 %v7452_v2, %v8090_v44  ;;  %7039 = vmatprep.subr.mxu1 %v7570_v52  ;;  %v2079_v6 = vpop.xlane.xlu0 %2078  ;;  %v1124_v9 = vpop.permute.xlu1 %1123 }
 0x5ec   :  { %v1211_v48 = vcombine.low %v1112_v56, %v1124_v9  ;;  %v1212_v10 = vcombine.high %v1112_v56, %v1124_v9  ;;  %7457 = vrcp.f32 %v2079_v6 }
 0x5ed   :  { %7027 = vmatmul.mubr.msk.f32.vlgmr.msra.gmra.mrb[4].mxu0 %vm1405_vm5, %v2091_v35 }
 0x5ee   :  { %v7454_v5 = vpop.eup %7453  ;;  %7036 = vmatprep.mubr.msk.f32.mxu0 %vm7571_vm4, %v7570_v52  ;;  %v1226_v16 = vrot.slane %v1212_v10, %v7922_v0 }
 0x5ef   :  { %v2093_v39 = vmul.f32 %v7454_v5, %v8094_v57  ;;  %v2082_v8 = vpop.xlane.xlu0 %2081  ;;  %v1219_v57 = vrot.slane %v1211_v48, %v7922_v0 }
 0x5f0   :  { %7459 = vrcp.f32 %v2082_v8 }
 0x5f1   :  { %7032 = vmatmul.mubr.msk.f32.vlgmr.msra.gmra.mrb[24].mxu1 %vm1405_vm5, %v2093_v39 }
 0x5f2   :  { %7041 = vmatprep.mubr.msk.f32.mxu1 %vm7571_vm4, %v7570_v52  ;;  %v7456_v46 = vpop.eup %7455 }
 0x5f3   :  { %v2095_v60 = vmul.f32 %v7456_v46, %v8098_v4 }
 0x5f6   :  { %v7458_v41 = vpop.eup %7457 }
 0x5f7   :  { %v2097_v61 = vmul.f32 %v7458_v41, %v8106_v13 }
 0x5fa   :  { %v7460_v45 = vpop.eup %7459 }
 0x5fb   :  { %v2099_v63 = vmul.f32 %v7460_v45, %v8114_v26 }
 0x624   :  { %v2085_v44 = vpop.xlane.xlu0 %2084 }
 0x625   :  { %7461 = vrcp.f32 %v2085_v44 }
 0x628   :  { %v1118_v11 = vpop.permute.xlu0 %1117 }
 0x629   :  { %v1195_v12 = vcombine.low %v8078_v25, %v1118_v11  ;;  %v1196_v14 = vcombine.high %v8078_v25, %v1118_v11 }
 0x62b   :  { %v1203_v17 = vrot.slane %v1195_v12, %v7922_v0  ;;  %v1210_v18 = vrot.slane %v1196_v14, %v7922_v0 }
 0x62d   :  { %v1227_v19 = vcombine.low %v1203_v17, %v1219_v57  ;;  %v1228_v20 = vcombine.high %v1203_v17, %v1219_v57  ;;  %v1243_v21 = vcombine.low %v1210_v18, %v1226_v16  ;;  %v1244_v22 = vcombine.high %v1210_v18, %v1226_v16 }
 0x62f   :  { %v1235_v24 = vrot.slane %v1227_v19, %v7930_v15  ;;  %v1242_v47 = vrot.slane %v1228_v20, %v7930_v15  ;;  %v1251_v25 = vrot.slane %v1243_v21, %v7930_v15  ;;  %v1258_v27 = vrot.slane %v1244_v22, %v7930_v15  ;;  %v7462_v59 = vpop.eup %7461 }
 0x630   :  { %v2101_v1 = vmul.f32 %v7462_v59, %v8131_v53 }
 0x631   :  { %v1331_v28 = vcombine.low %v1235_v24, %v1242_v47  ;;  %v6646_v29 = vcombine.high %v1235_v24, %v1242_v47  ;;  %v1347_v51 = vcombine.low %v1251_v25, %v1258_v27  ;;  %v6647_v30 = vcombine.high %v1251_v25, %v1258_v27 }
 0x633   :  { %v1338_v31 = vrot.slane %v1331_v28, %v7922_v0  ;;  %v1346_v32 = vrot.slane %v6646_v29, %v7922_v0  ;;  %v1354_v33 = vrot.slane %v1347_v51, %v7922_v0  ;;  %v1362_v34 = vrot.slane %v6647_v30, %v7922_v0 }
 0x635   :  { %v1363_v36 = vcombine.low %v1338_v31, %v1346_v32  ;;  %v1379_v37 = vcombine.low %v1354_v33, %v1362_v34  ;;  %v1364_v38 = vcombine.high %v1338_v31, %v1346_v32  ;;  %v1380_v40 = vcombine.high %v1354_v33, %v1362_v34 }
 0x637   :  { %v1371_v42 = vrot.slane %v1363_v36, %v7930_v15  ;;  %v1387_v43 = vrot.slane %v1379_v37, %v7930_v15  ;;  %v1378_v49 = vrot.slane %v1364_v38, %v7930_v15  ;;  %v1394_v55 = vrot.slane %v1380_v40, %v7930_v15 }
 0x639   :  { %v1395_v56 = vcombine.low %v1371_v42, %v1387_v43  ;;  %v1396_v58 = vcombine.high %v1371_v42, %v1387_v43  ;;  %v1397_v23 = vcombine.low %v1378_v49, %v1394_v55  ;;  %v1398_v62 = vcombine.high %v1378_v49, %v1394_v55 }
 0x63b   :  { %7035 = vmatpush3.msra.mxu0 %v1395_v56  ;;  %7040 = vmatpush3.msra.mxu1 %v1396_v58 }
 0x63c   :  { %7037 = vmatmul.mubr.msk.f32.vlgmr.msra.gmra.mrb[6].mxu0 %vm1405_vm5, %v2095_v60  ;;  %7042 = vmatmul.mubr.msk.f32.vlgmr.msra.gmra.mrb[26].mxu1 %vm1405_vm5, %v2097_v61 }
 0x63d   :  { %7044 = vmatprep.subr.mxu0 %v7570_v52  ;;  %7049 = vmatprep.subr.mxu1 %v7570_v52 }
 0x63e   :  { %7045 = vmatpush3.msra.mxu0 %v1397_v23  ;;  %7050 = vmatpush3.msra.mxu1 %v1398_v62 }
 0x63f   :  { %7046 = vmatprep.mubr.msk.f32.mxu0 %vm7571_vm4, %v7570_v52  ;;  %7051 = vmatprep.mubr.msk.f32.mxu1 %vm7571_vm4, %v7570_v52 }
 0x640   :  { %7047 = vmatmul.mubr.msk.f32.vlgmr.msra.gmra.mrb[8].mxu0 %vm1405_vm5, %v2099_v63  ;;  %7052 = vmatmul.mubr.msk.f32.vlgmr.msra.gmra.mrb[28].mxu1 %vm1405_vm5, %v2101_v1 }
 0x6b8   :  { %v2171_v4 = vpop.f32.mrb[2].mxu0 }
 0x6b9   :  { %v7018_v13 = vpop.f32.mrb[3].mxu0 }
 0x6bc   :  { %v2244_v2 = vpop.f32.mrb[22].mxu1 }
 0x6bd   :  { %v7023_v35 = vpop.f32.mrb[23].mxu1 }
 0x6c0   :  { %v2317_v5 = vpop.f32.mrb[4].mxu0 }
 0x6c1   :  { %v2686_v26 = vcombine.low %v2171_v4, %v2317_v5  ;;  %v2687_v39 = vcombine.high %v2171_v4, %v2317_v5  ;;  %v7028_v53 = vpop.f32.mrb[5].mxu0 }
 0x6c2   :  { %v2991_v53 = vld [vmem:[%s8916_s14 + $0x8] sm:$0xff] }
 0x6c3   :  { %v2694_v44 = vrot.slane %v2686_v26, %v7922_v0  ;;  %v2701_v48 = vrot.slane %v2687_v39, %v7922_v0  ;;  %v2990_v39 = vld [vmem:[%s8916_s14] sm:$0xff] }
 0x6c4   :  { %v2390_v6 = vpop.f32.mrb[24].mxu1 }
 0x6c5   :  { %v2702_v7 = vcombine.low %v2244_v2, %v2390_v6  ;;  %v2703_v8 = vcombine.high %v2244_v2, %v2390_v6  ;;  %v7033_v9 = vpop.f32.mrb[25].mxu1 }
 0x6c7   :  { %v2710_v10 = vrot.slane %v2702_v7, %v7922_v0  ;;  %v2717_v11 = vrot.slane %v2703_v8, %v7922_v0 }
 0x6c9   :  { %v2718_v12 = vcombine.low %v2694_v44, %v2710_v10  ;;  %v2719_v14 = vcombine.high %v2694_v44, %v2710_v10  ;;  %v2734_v57 = vcombine.low %v2701_v48, %v2717_v11  ;;  %v2735_v16 = vcombine.high %v2701_v48, %v2717_v11 }
 0x6ca   :  { %v7320_v44 = vpack.c.bf16 %v2991_v53, %v2990_v39  ;;  %v3128_v53 = vld [vmem:[%s8920_s18] sm:$0xff] }
 0x6cb   :  { %v2726_v17 = vrot.slane %v2718_v12, %v7930_v15  ;;  %v2733_v18 = vrot.slane %v2719_v14, %v7930_v15  ;;  %v2742_v19 = vrot.slane %v2734_v57, %v7930_v15  ;;  %v2749_v20 = vrot.slane %v2735_v16, %v7930_v15  ;;  %v2992_v14 = vld [vmem:[%s8916_s14 + $0x10] sm:$0xff]  ;;  %v2993_v57 = vld [vmem:[%s8916_s14 + $0x18] sm:$0xff] }
 0x6cc   :  { %7321 = vmatprep.subr.bf16.mxu0 %v7320_v44 }
 0x6cd   :  { %v2822_v21 = vcombine.low %v2726_v17, %v2733_v18  ;;  %v6673_v22 = vcombine.high %v2726_v17, %v2733_v18  ;;  %v2838_v24 = vcombine.low %v2742_v19, %v2749_v20  ;;  %v6674_v47 = vcombine.high %v2742_v19, %v2749_v20  ;;  %7323 = vmatpush3.bf16.msra.mxu0 %v7320_v44 }
 0x6ce   :  { %v7324_v20 = vpack.c.bf16 %v2993_v57, %v2992_v14 }
 0x6cf   :  { %v2829_v25 = vrot.slane %v2822_v21, %v7922_v0  ;;  %v2837_v27 = vrot.slane %v6673_v22, %v7922_v0  ;;  %v2845_v28 = vrot.slane %v2838_v24, %v7922_v0  ;;  %v2853_v29 = vrot.slane %v6674_v47, %v7922_v0 }
 0x6d0   :  { %7325 = vmatprep.subr.bf16.mxu0 %v7324_v20 }
 0x6d1   :  { %v2855_v51 = vcombine.high %v2829_v25, %v2837_v27  ;;  %v2871_v30 = vcombine.high %v2845_v28, %v2853_v29  ;;  %v2854_v31 = vcombine.low %v2829_v25, %v2837_v27  ;;  %v2870_v32 = vcombine.low %v2845_v28, %v2853_v29  ;;  %7327 = vmatpush3.bf16.msra.mxu0 %v7324_v20 }
 0x6d3   :  { %v2869_v33 = vrot.slane %v2855_v51, %v7930_v15  ;;  %v2885_v34 = vrot.slane %v2871_v30, %v7930_v15  ;;  %v8202_v46 = vrot.slane %v2854_v31, %v7930_v15  ;;  %v8205_v36 = vrot.slane %v2870_v32, %v7930_v15 }
 0x6d5   :  { %v2888_v37 = vcombine.low %v2869_v33, %v2885_v34  ;;  %v2887_v38 = vcombine.high %v8202_v46, %v8205_v36  ;;  %v2889_v40 = vcombine.high %v2869_v33, %v2885_v34  ;;  %v2886_v41 = vcombine.low %v8202_v46, %v8205_v36  ;;  %v6677_v36 = vld [vmem:[%s8917_s15] ss:$0 sm:$0xff] }
 0x6d7   :  { %2968 = vrot.lane.b32.xlu0 %v2888_v37, %s8947_s0  ;;  %2960 = vrot.lane.b32.xlu1 %v2887_v38, %s8945_s11 }
 0x6db   :  { %2976 = vrot.lane.b32.xlu0 %v2889_v40, %s8943_s3 }
 0x70f   :  { %v2463_v42 = vpop.f32.mrb[6].mxu0  ;;  %v2536_v43 = vpop.f32.mrb[26].mxu1 }
 0x710   :  { %v7038_v45 = vpop.f32.mrb[7].mxu0  ;;  %v7043_v49 = vpop.f32.mrb[27].mxu1 }
 0x713   :  { %v2609_v55 = vpop.f32.mrb[8].mxu0  ;;  %v2682_v56 = vpop.f32.mrb[28].mxu1 }
 0x714   :  { %v2754_v58 = vcombine.low %v2463_v42, %v2609_v55  ;;  %v2755_v59 = vcombine.high %v2463_v42, %v2609_v55  ;;  %v2770_v60 = vcombine.low %v2536_v43, %v2682_v56  ;;  %v2771_v61 = vcombine.high %v2536_v43, %v2682_v56  ;;  %v7048_v23 = vpop.f32.mrb[9].mxu0  ;;  %v7053_v62 = vpop.f32.mrb[29].mxu1 }
 0x716   :  { %v2762_v63 = vrot.slane %v2754_v58, %v7922_v0  ;;  %v2769_v1 = vrot.slane %v2755_v59, %v7922_v0  ;;  %v2778_v4 = vrot.slane %v2770_v60, %v7922_v0  ;;  %v2785_v13 = vrot.slane %v2771_v61, %v7922_v0 }
 0x718   :  { %v2786_v2 = vcombine.low %v2762_v63, %v2778_v4  ;;  %v2787_v35 = vcombine.high %v2762_v63, %v2778_v4  ;;  %v2802_v5 = vcombine.low %v2769_v1, %v2785_v13  ;;  %v2803_v26 = vcombine.high %v2769_v1, %v2785_v13 }
 0x71a   :  { %v2794_v6 = vrot.slane %v2786_v2, %v7930_v15  ;;  %v2801_v7 = vrot.slane %v2787_v35, %v7930_v15  ;;  %v2810_v8 = vrot.slane %v2802_v5, %v7930_v15  ;;  %v2817_v9 = vrot.slane %v2803_v26, %v7930_v15 }
 0x71c   :  { %v2890_v48 = vcombine.low %v2794_v6, %v2801_v7  ;;  %v6675_v10 = vcombine.high %v2794_v6, %v2801_v7  ;;  %v2906_v11 = vcombine.low %v2810_v8, %v2817_v9  ;;  %v6676_v12 = vcombine.high %v2810_v8, %v2817_v9  ;;  %v3129_v6 = vld [vmem:[%s8920_s18 + $0x8] sm:$0xff]  ;;  %v3130_v7 = vld [vmem:[%s8920_s18 + $0x10] sm:$0xff]  ;;  %v3131_v9 = vld [vmem:[%s8920_s18 + $0x18] sm:$0xff] }
 0x71d   :  { %v7328_v8 = vpack.c.bf16 %v3129_v6, %v3128_v53  ;;  %v7332_v44 = vpack.c.bf16 %v3131_v9, %v3130_v7 }
 0x71e   :  { %v2897_v16 = vrot.slane %v2890_v48, %v7922_v0  ;;  %v2905_v17 = vrot.slane %v6675_v10, %v7922_v0  ;;  %v2913_v18 = vrot.slane %v2906_v11, %v7922_v0  ;;  %v2921_v19 = vrot.slane %v6676_v12, %v7922_v0 }
 0x71f   :  { %7329 = vmatprep.subr.bf16.mxu1 %v7328_v8 }
 0x720   :  { %v2922_v21 = vcombine.low %v2897_v16, %v2905_v17  ;;  %v2938_v22 = vcombine.low %v2913_v18, %v2921_v19  ;;  %v2923_v24 = vcombine.high %v2897_v16, %v2905_v17  ;;  %v2939_v47 = vcombine.high %v2913_v18, %v2921_v19  ;;  %7331 = vmatpush3.bf16.msra.mxu1 %v7328_v8  ;;  %v6680_v17 = vld [vmem:[%s8918_s16] ss:$0 sm:$0xff] }
 0x721   :  { %7333 = vmatprep.subr.bf16.mxu1 %v7332_v44  ;;  %v6681_v19 = vld [vmem:[%s8919_s17] ss:$0 sm:$0xff] }
 0x722   :  { %v2930_v25 = vrot.slane %v2922_v21, %v7930_v15  ;;  %v2946_v27 = vrot.slane %v2938_v22, %v7930_v15  ;;  %v2937_v28 = vrot.slane %v2923_v24, %v7930_v15  ;;  %v2953_v29 = vrot.slane %v2939_v47, %v7930_v15 }
 0x724   :  { %v2955_v51 = vcombine.high %v2930_v25, %v2946_v27  ;;  %v2956_v30 = vcombine.low %v2937_v28, %v2953_v29  ;;  %v2957_v31 = vcombine.high %v2937_v28, %v2953_v29  ;;  %v2954_v32 = vcombine.low %v2930_v25, %v2946_v27  ;;  %7335 = vmatpush3.bf16.msra.mxu1 %v7332_v44  ;;  %v3231_v27 = vld [vmem:[%s8922_s20] sm:$0xff]  ;;  %v3232_v28 = vld [vmem:[%s8922_s20 + $0x8] sm:$0xff] }
 0x725   :  { %v7336_v29 = vpack.c.bf16 %v3232_v28, %v3231_v27 }
 0x726   :  { %2962 = vrot.lane.b32.xlu1 %v2955_v51, %s8945_s11  ;;  %v3233_v51 = vld [vmem:[%s8922_s20 + $0x10] sm:$0xff] }
 0x727   :  { %7337 = vmatprep.subr.bf16.mxu0 %v7336_v29 }
 0x72a   :  { %2970 = vrot.lane.b32.xlu1 %v2956_v30, %s8947_s0  ;;  %v3234_v30 = vld [vmem:[%s8922_s20 + $0x18] sm:$0xff] }
 0x72e   :  { %2978 = vrot.lane.b32.xlu1 %v2957_v31, %s8943_s3  ;;  %v7340_v31 = vpack.c.bf16 %v3234_v30, %v3233_v51 }
 0x749   :  { %v2969_v33 = vpop.permute.xlu0 %2968  ;;  %v2961_v34 = vpop.permute.xlu1 %2960 }
 0x74a   :  { %v2982_v37 = vsel %vm1405_vm5, %v2886_v41, %v2961_v34 }
 0x74b   :  { %v2985_v40 = vsel %vm2984_vm6, %v2982_v37, %v2969_v33  ;;  %v3236_v33 = vld [vmem:[%s8922_s20 + $0x28] sm:$0xff]  ;;  %v3237_v37 = vld [vmem:[%s8922_s20 + $0x30] sm:$0xff] }
 0x74d   :  { %v2977_v38 = vpop.permute.xlu0 %2976 }
 0x74e   :  { %v2988_v42 = vsel %vm2987_vm7, %v2985_v40, %v2977_v38  ;;  %v3238_v38 = vld [vmem:[%s8922_s20 + $0x38] sm:$0xff] }
 0x74f   :  { %7062 = vmatprep.mubr.msk.f32.mxu0 %vm213_vm3, %v2988_v42  ;;  %v7348_v40 = vpack.c.bf16 %v3238_v38, %v3237_v37  ;;  %v6682_v42 = vld [vmem:[%s8921_s19] ss:$0 sm:$0xff] }
 0x798   :  { %v2963_v43 = vpop.permute.xlu1 %2962 }
 0x799   :  { %v2983_v49 = vsel %vm1405_vm5, %v2954_v32, %v2963_v43  ;;  %v3235_v32 = vld [vmem:[%s8922_s20 + $0x20] sm:$0xff] }
 0x79a   :  { %v7344_v34 = vpack.c.bf16 %v3236_v33, %v3235_v32 }
 0x79c   :  { %v2971_v45 = vpop.permute.xlu1 %2970 }
 0x79d   :  { %v2986_v55 = vsel %vm2984_vm6, %v2983_v49, %v2971_v45 }
 0x7a0   :  { %v2979_v56 = vpop.permute.xlu1 %2978 }
 0x7a1   :  { %v2989_v46 = vsel %vm2987_vm7, %v2986_v55, %v2979_v56 }
 0x7a2   :  { %7063 = vmatmul.mubr.msk.f32.vlgmr.msra.gmra.mrb[10].mxu0 %vm213_vm3, %v2989_v46 }
 0x7a3   :  { %7339 = vmatpush3.bf16.msra.mxu0 %v7336_v29 }
 0x7a4   :  { %7341 = vmatprep.subr.bf16.mxu0 %v7340_v31 }
 0x7a7   :  { %7343 = vmatpush3.bf16.msra.mxu0 %v7340_v31 }
 0x7a8   :  { %7345 = vmatprep.subr.bf16.mxu0 %v7344_v34 }
 0x7ab   :  { %7347 = vmatpush3.bf16.msra.mxu0 %v7344_v34  ;;  %v6690_v34 = vld [vmem:[%s8975_s29 + $0x1] ss:$0 sm:$0xff] }
 0x7ac   :  { %7349 = vmatprep.subr.bf16.mxu0 %v7348_v40 }
 0x7af   :  { %7351 = vmatpush3.bf16.msra.mxu0 %v7348_v40 }
 0x875   :  { %v7064_v41 = vpop.f32.mrb[10].mxu0 }
 0x876   :  { %v3079_v58 = vadd.f32 %v7064_v41, %v6677_v36  ;;  %v3073_v59 = vpop.f32.mrb[11].mxu0 }
 0x877   :  { %v3074_v60 = vadd.f32 %v6677_v36, %v3073_v59 }
 0x878   :  { %v8260_v61 = vadd.f32 %v3079_v58, %v7823_v54 }
 0x879   :  { %v8263_v23 = vadd.f32 %v3074_v60, %v7819_v50 }
 0x87a   :  { %v3089_v62 = vsel %vm213_vm3, %v8260_v61, 0.0 }
 0x87b   :  { %3090 = vadd.xlane.f32.xlu1 %v3089_v62  ;;  %v3086_v63 = vsel %vm213_vm3, %v8263_v23, 0.0 }
 0x87c   :  { %3087 = vadd.xlane.f32.xlu0 %v3086_v63 }
 0x908   :  { %v3091_v1 = vpop.xlane.xlu1 %3090 }
 0x909   :  { %v3093_v4 = vmul.f32 0.03125, %v3091_v1  ;;  %v3088_v13 = vpop.xlane.xlu0 %3087 }
 0x90a   :  { %v3092_v2 = vmul.f32 0.03125, %v3088_v13 }
 0x90b   :  { %v3095_v35 = vsub.f32 %v8260_v61, %v3093_v4  ;;  %v6685_v4 = vld [vmem:[%s8923_s21] ss:$0 sm:$0xff] }
 0x90c   :  { %v3094_v54 = vsub.f32 %v8263_v23, %v3092_v2 }
 0x90d   :  { %v3097_v26 = vmul.f32 %v3095_v35, %v3095_v35 }
 0x90e   :  { %v3096_v5 = vmul.f32 %v3094_v54, %v3094_v54 }
 0x90f   :  { %v3101_v39 = vsel %vm213_vm3, %v3097_v26, 0.0 }
 0x910   :  { %v3098_v50 = vsel %vm213_vm3, %v3096_v5, 0.0 }
 0x911   :  { %3099 = vadd.xlane.f32.xlu0 %v3098_v50 }
 0x915   :  { %3102 = vadd.xlane.f32.xlu0 %v3101_v39 }
 0x99e   :  { %v3100_v48 = vpop.xlane.xlu0 %3099 }
 0x99f   :  { %v3104_v10 = vmul.f32 0.03125, %v3100_v48 }
 0x9a1   :  { %v3106_v11 = vadd.f32 1e-06, %v3104_v10 }
 0x9a2   :  { %v3103_v12 = vpop.xlane.xlu0 %3102 }
 0x9a3   :  { %7463 = vrsqrt.f32 %v3106_v11  ;;  %v3105_v14 = vmul.f32 0.03125, %v3103_v12  ;;  %v6692_v11 = vld [vmem:[%s8973_s1 + $0x20] sm:$0xff]  ;;  %v6693_v12 = vld [vmem:[%s8973_s1 + $0x28] sm:$0xff] }
 0x9a5   :  { %v3107_v57 = vadd.f32 1e-06, %v3105_v14  ;;  %v6708_v14 = vld [vmem:[%s8914_s12 + $0x20] sm:$0xff] }
 0x9a7   :  { %7465 = vrsqrt.f32 %v3107_v57  ;;  %v7352_v57 = vpack.c.bf16 %v6693_v12, %v6692_v11 }
 0x9a9   :  { %7353 = vmatprep.subr.bf16.mxu1 %v7352_v57 }
 0x9ad   :  { %v7464_v16 = vpop.eup %7463 }
 0x9ae   :  { %v3110_v18 = vmul.f32 %v7464_v16, %v3094_v54  ;;  %v6709_v16 = vld [vmem:[%s8914_s12 + $0x28] sm:$0xff] }
 0x9b0   :  { %v3118_v20 = vmul.f32 %v6680_v17, %v3110_v18  ;;  %v6695_v18 = vld [vmem:[%s8973_s1 + $0x38] sm:$0xff] }
 0x9b1   :  { %v7466_v21 = vpop.eup %7465 }
 0x9b2   :  { %v3111_v22 = vmul.f32 %v7466_v21, %v3095_v35  ;;  %v3126_v24 = vadd.f32 %v6681_v19, %v3118_v20  ;;  %v6710_v21 = vld [vmem:[%s8914_s12 + $0x30] sm:$0xff] }
 0x9b4   :  { %v3119_v47 = vmul.f32 %v6680_v17, %v3111_v22  ;;  %7073 = vmatprep.mubr.msk.f32.mxu1 %vm213_vm3, %v3126_v24  ;;  %v6694_v17 = vld [vmem:[%s8973_s1 + $0x30] sm:$0xff]  ;;  %v6711_v22 = vld [vmem:[%s8914_s12 + $0x38] sm:$0xff]  ;;  %s8984_s12 = smov 8  }
 0x9b5   :  { %v7356_v20 = vpack.c.bf16 %v6695_v18, %v6694_v17  ;;  %v7372_v24 = vpack.c.bf16 %v6711_v22, %v6710_v21 }
 0x9b6   :  { %v3127_v25 = vadd.f32 %v6681_v19, %v3119_v47  ;;  %v7368_v19 = vpack.c.bf16 %v6709_v16, %v6708_v14  ;;  %v6700_v47 = vld [vmem:[%s8974_s8 + $0x20] sm:$0xff] }
 0x9b8   :  { %7074 = vmatmul.mubr.msk.f32.vlgmr.msra.gmra.mrb[30].mxu1 %vm213_vm3, %v3127_v25  ;;  %7369 = vmatprep.subr.bf16.mxu0 %v7368_v19  ;;  %v6701_v25 = vld [vmem:[%s8974_s8 + $0x28] sm:$0xff] }
 0x9b9   :  { %7355 = vmatpush3.bf16.msra.mxu1 %v7352_v57  ;;  %v7360_v27 = vpack.c.bf16 %v6701_v25, %v6700_v47 }
 0x9ba   :  { %7357 = vmatprep.subr.bf16.mxu1 %v7356_v20 }
 0x9bd   :  { %7359 = vmatpush3.bf16.msra.mxu1 %v7356_v20 }
 0x9be   :  { %7361 = vmatprep.subr.bf16.mxu1 %v7360_v27 }
 0xa8b   :  { %v7075_v43 = vpop.f32.mrb[30].mxu1 }
 0xa8c   :  { %v3217_v45 = vadd.f32 %v7075_v43, %v6682_v42  ;;  %v3211_v49 = vpop.f32.mrb[31].mxu1 }
 0xa8d   :  { %v3212_v55 = vadd.f32 %v6682_v42, %v3211_v49  ;;  %v6691_v42 = vld [vmem:[%s8976_s2 + $0x1] ss:$0 sm:$0xff]  ;;  %v6702_v49 = vld [vmem:[%s8974_s8 + $0x30] sm:$0xff]  ;;  %s8980_s2 = smov 120  }
 0xa8e   :  { %v3224_v56 = vmul.f32 0.70710677, %v3217_v45  ;;  %v3221_v62 = vmul.f32 0.5, %v3217_v45 }
 0xa8f   :  { %v3223_v46 = vmul.f32 0.70710677, %v3212_v55  ;;  %v3220_v59 = vmul.f32 0.5, %v3212_v55  ;;  %v6703_v55 = vld [vmem:[%s8974_s8 + $0x38] sm:$0xff] }
 0xa90   :  { %7467 = verf.f32 %v3224_v56 }
 0xa91   :  { %7469 = verf.f32 %v3223_v46 }
 0xa9a   :  { %v7468_v36 = vpop.eup %7467 }
 0xa9b   :  { %v7470_v41 = vpop.eup %7469  ;;  %v3228_v58 = vadd.f32 1.0, %v7468_v36  ;;  %v7364_v36 = vpack.c.bf16 %v6703_v55, %v6702_v49 }
 0xa9c   :  { %v3227_v60 = vadd.f32 1.0, %v7470_v41  ;;  %v6697_v41 = vld [vmem:[%s8977_s30 + $0x1] ss:$0 sm:$0xff]  ;;  %s8981_s30 = smov 112  }
 0xa9d   :  { %v3230_v1 = vmul.f32 %v3228_v58, %v3221_v62 }
 0xa9e   :  { %v3229_v63 = vmul.f32 %v3227_v60, %v3220_v59 }
 0xaa0   :  { %7092 = vmatprep.mubr.msk.f32.mxu0 %vm120_vm0, %v3229_v63 }
 0xaa1   :  { %7093 = vmatmul.mubr.msk.f32.vlgmr.msra.gmra.mrb[12].mxu0 %vm120_vm0, %v3230_v1 }
 0xaa2   :  { %7371 = vmatpush3.bf16.msra.mxu0 %v7368_v19 }
 0xaa3   :  { %7373 = vmatprep.subr.bf16.mxu0 %v7372_v24 }
 0xaa6   :  { %7375 = vmatpush3.bf16.msra.mxu0 %v7372_v24 }
 0xaa7   :  { %7138 = vmatprep.subr.mxu0 %v7570_v52 }
 0xb74   :  { %v7094_v13 = vpop.f32.mrb[12].mxu0 }
 0xb75   :  { %v3324_v2 = vadd.f32 %v7094_v13, %v6685_v4  ;;  %v3318_v35 = vpop.f32.mrb[13].mxu0 }
 0xb76   :  { %v3319_v54 = vadd.f32 %v6685_v4, %v3318_v35  ;;  %v6705_v4 = vld [vmem:[%s8978_s10 + $0x1] ss:$0 sm:$0xff] }
 0xb77   :  { %v8326_v5 = vadd.f32 %v3324_v2, %v8260_v61 }
 0xb78   :  { %v8329_v50 = vadd.f32 %v3319_v54, %v8263_v23 }
 0xb79   :  { %v3336_v26 = vsel %vm213_vm3, %v8326_v5, 0.0 }
 0xb7a   :  { %3337 = vadd.xlane.f32.xlu1 %v3336_v26  ;;  %v3333_v39 = vsel %vm213_vm3, %v8329_v50, 0.0 }
 0xb7b   :  { %3334 = vadd.xlane.f32.xlu0 %v3333_v39 }
 0xc07   :  { %v3338_v53 = vpop.xlane.xlu1 %3337 }
 0xc08   :  { %v3340_v6 = vmul.f32 0.03125, %v3338_v53  ;;  %v3335_v7 = vpop.xlane.xlu0 %3334 }
 0xc09   :  { %v3339_v8 = vmul.f32 0.03125, %v3335_v7 }
 0xc0a   :  { %v3342_v9 = vsub.f32 %v8326_v5, %v3340_v6 }
 0xc0b   :  { %v3341_v61 = vsub.f32 %v8329_v50, %v3339_v8 }
 0xc0c   :  { %v3344_v44 = vmul.f32 %v3342_v9, %v3342_v9 }
 0xc0d   :  { %v3343_v48 = vmul.f32 %v3341_v61, %v3341_v61 }
 0xc0e   :  { %v3348_v23 = vsel %vm213_vm3, %v3344_v44, 0.0 }
 0xc0f   :  { %3349 = vadd.xlane.f32.xlu1 %v3348_v23  ;;  %v3345_v10 = vsel %vm213_vm3, %v3343_v48, 0.0 }
 0xc10   :  { %3346 = vadd.xlane.f32.xlu0 %v3345_v10 }
 0xc9c   :  { %v3350_v28 = vpop.xlane.xlu1 %3349 }
 0xc9d   :  { %v3352_v29 = vmul.f32 0.03125, %v3350_v28  ;;  %v3347_v51 = vpop.xlane.xlu0 %3346 }
 0xc9e   :  { %v3351_v30 = vmul.f32 0.03125, %v3347_v51 }
 0xc9f   :  { %v3354_v31 = vadd.f32 1e-06, %v3352_v29 }
 0xca0   :  { %v3353_v32 = vadd.f32 1e-06, %v3351_v30 }
 0xca1   :  { %7471 = vrsqrt.f32 %v3354_v31 }
 0xca2   :  { %7473 = vrsqrt.f32 %v3353_v32 }
 0xcab   :  { %v7472_v33 = vpop.eup %7471 }
 0xcac   :  { %v7474_v37 = vpop.eup %7473  ;;  %v3358_v38 = vmul.f32 %v7472_v33, %v3342_v9 }
 0xcad   :  { %v3357_v40 = vmul.f32 %v7474_v37, %v3341_v61 }
 0xcae   :  { %v3366_v43 = vmul.f32 %v6690_v34, %v3358_v38 }
 0xcaf   :  { %v3365_v45 = vmul.f32 %v6690_v34, %v3357_v40 }
 0xcb0   :  { %v3374_v46 = vadd.f32 %v6691_v42, %v3366_v43 }
 0xcb1   :  { %v3373_v56 = vadd.f32 %v6691_v42, %v3365_v45 }
 0xcb3   :  { %7103 = vmatprep.mubr.msk.f32.mxu1 %vm213_vm3, %v3373_v56  ;;  %7125 = vmatprep.mubr.msk.f32.mxu0 %vm213_vm3, %v3373_v56 }
 0xcb4   :  { %7104 = vmatmul.mubr.msk.f32.vlgmr.msra.gmra.mrb[32].mxu1 %vm213_vm3, %v3374_v46  ;;  %7126 = vmatmul.mubr.msk.f32.vlgmr.msra.gmra.mrb[14].mxu0 %vm213_vm3, %v3374_v46 }
 0xcb5   :  { %7363 = vmatpush3.bf16.msra.mxu1 %v7360_v27  ;;  %7114 = vmatprep.mubr.msk.f32.mxu1 %vm213_vm3, %v3373_v56 }
 0xcb6   :  { %7365 = vmatprep.subr.bf16.mxu1 %v7364_v36  ;;  %7140 = vmatprep.mubr.msk.f32.mxu0 %vm7571_vm4, %v7570_v52 }
 0xcb9   :  { %7367 = vmatpush3.bf16.msra.mxu1 %v7364_v36 }
 0xcba   :  { %7128 = vmatprep.subr.mxu1 %v7570_v52 }
 0xcbc   :  { %7115 = vmatmul.mubr.msk.f32.vlgmr.msra.gmra.mrb[34].mxu1 %vm213_vm3, %v3374_v46 }
 0xcbd   :  { %7130 = vmatprep.mubr.msk.f32.mxu1 %vm7571_vm4, %v7570_v52 }
 0xd87   :  { %v7105_v58 = vpop.f32.mrb[32].mxu1  ;;  %v8396_v59 = vpop.f32.mrb[14].mxu0 }
 0xd88   :  { %v3460_v60 = vpop.f32.mrb[33].mxu1  ;;  %v8398_v62 = vpop.f32.mrb[15].mxu0  ;;  %v3466_v26 = vadd.f32 %v7105_v58, %v6697_v41 }
 0xd89   :  { %v3461_v63 = vadd.f32 %v6697_v41, %v3460_v60 }
 0xd8a   :  { %v8417_v39 = vmul.f32 0.35355338, %v3466_v26 }
 0xd8b   :  { %v3469_v1 = vmul.f32 0.35355338, %v3461_v63 }
 0xd8d   :  { %3649 = vrot.lane.b32.xlu1 %v3469_v1, %s8980_s2 }
 0xd8f   :  { %v7116_v13 = vpop.f32.mrb[34].mxu1 }
 0xd90   :  { %v3550_v2 = vpop.f32.mrb[35].mxu1  ;;  %v8408_v54 = vadd.f32 %v7116_v13, %v6705_v4 }
 0xd91   :  { %v3551_v35 = vadd.f32 %v6705_v4, %v3550_v2 }
 0xd93   :  { %3941 = vrot.lane.b32.xlu0 %v3551_v35, %s8980_s2  ;;  %3947 = vrot.lane.b32.xlu1 %v3551_v35, %s8981_s30 }
 0xd97   :  { %3655 = vrot.lane.b32.xlu0 %v3469_v1, %s8981_s30  ;;  %3953 = vrot.lane.b32.xlu1 %v3551_v35, %s8982_s26 }
 0xd9b   :  { %3943 = vrot.lane.b32.xlu0 %v8408_v54, %s8980_s2  ;;  %3661 = vrot.lane.b32.xlu1 %v3469_v1, %s8982_s26 }
 0xd9f   :  { %3955 = vrot.lane.b32.xlu0 %v8408_v54, %s8982_s26  ;;  %3949 = vrot.lane.b32.xlu1 %v8408_v54, %s8981_s30 }
 0xda3   :  { %3657 = vrot.lane.b32.xlu0 %v8417_v39, %s8981_s30  ;;  %3651 = vrot.lane.b32.xlu1 %v8417_v39, %s8980_s2 }
 0xda7   :  { %3663 = vrot.lane.b32.xlu1 %v8417_v39, %s8982_s26 }
 0xdff   :  { %v3650_v53 = vpop.permute.xlu1 %3649 }
 0xe05   :  { %v3942_v6 = vpop.permute.xlu0 %3941  ;;  %v3948_v7 = vpop.permute.xlu1 %3947 }
 0xe06   :  { %v3959_v8 = vcombine.low %v3551_v35, %v3948_v7  ;;  %v3960_v9 = vcombine.high %v3551_v35, %v3948_v7 }
 0xe08   :  { %v3967_v10 = vrot.slane %v3959_v8, %v7922_v0  ;;  %v3974_v11 = vrot.slane %v3960_v9, %v7922_v0 }
 0xe09   :  { %v3656_v61 = vpop.permute.xlu0 %3655  ;;  %v3954_v44 = vpop.permute.xlu1 %3953 }
 0xe0a   :  { %v3975_v48 = vcombine.low %v3942_v6, %v3954_v44  ;;  %v3976_v23 = vcombine.high %v3942_v6, %v3954_v44  ;;  %v3667_v57 = vcombine.low %v3469_v1, %v3656_v61  ;;  %v3668_v16 = vcombine.high %v3469_v1, %v3656_v61 }
 0xe0c   :  { %v3983_v12 = vrot.slane %v3975_v48, %v7922_v0  ;;  %v3990_v14 = vrot.slane %v3976_v23, %v7922_v0  ;;  %v3675_v51 = vrot.slane %v3667_v57, %v7922_v0  ;;  %v3682_v30 = vrot.slane %v3668_v16, %v7922_v0 }
 0xe0d   :  { %v3662_v17 = vpop.permute.xlu1 %3661  ;;  %v3944_v22 = vpop.permute.xlu0 %3943 }
 0xe0e   :  { %v3991_v18 = vcombine.low %v3967_v10, %v3983_v12  ;;  %v3992_v19 = vcombine.high %v3967_v10, %v3983_v12  ;;  %v4007_v20 = vcombine.low %v3974_v11, %v3990_v14  ;;  %v4008_v21 = vcombine.high %v3974_v11, %v3990_v14 }
 0xe0f   :  { %v3683_v24 = vcombine.low %v3650_v53, %v3662_v17  ;;  %v3684_v47 = vcombine.high %v3650_v53, %v3662_v17 }
 0xe10   :  { %v3999_v25 = vrot.slane %v3991_v18, %v7930_v15  ;;  %v4006_v27 = vrot.slane %v3992_v19, %v7930_v15  ;;  %v4015_v28 = vrot.slane %v4007_v20, %v7930_v15  ;;  %v4022_v29 = vrot.slane %v4008_v21, %v7930_v15 }
 0xe11   :  { %v3691_v31 = vrot.slane %v3683_v24, %v7922_v0  ;;  %v3698_v32 = vrot.slane %v3684_v47, %v7922_v0  ;;  %v3950_v33 = vpop.permute.xlu1 %3949  ;;  %v3956_v41 = vpop.permute.xlu0 %3955 }
 0xe12   :  { %v4095_v34 = vcombine.low %v3999_v25, %v4006_v27  ;;  %v6720_v37 = vcombine.high %v3999_v25, %v4006_v27  ;;  %v4111_v38 = vcombine.low %v4015_v28, %v4022_v29  ;;  %v6721_v40 = vcombine.high %v4015_v28, %v4022_v29 }
 0xe13   :  { %v3699_v42 = vcombine.low %v3675_v51, %v3691_v31  ;;  %v3700_v43 = vcombine.high %v3675_v51, %v3691_v31  ;;  %v3715_v45 = vcombine.low %v3682_v30, %v3698_v32  ;;  %v3716_v49 = vcombine.high %v3682_v30, %v3698_v32 }
 0xe14   :  { %v8438_v55 = vrot.slane %v4095_v34, %v7922_v0  ;;  %v8441_v56 = vrot.slane %v6720_v37, %v7922_v0  ;;  %v8444_v46 = vrot.slane %v4111_v38, %v7922_v0  ;;  %v8447_v36 = vrot.slane %v6721_v40, %v7922_v0 }
 0xe15   :  { %v3707_v58 = vrot.slane %v3699_v42, %v7930_v15  ;;  %v3714_v60 = vrot.slane %v3700_v43, %v7930_v15  ;;  %v3723_v63 = vrot.slane %v3715_v45, %v7930_v15  ;;  %v3730_v1 = vrot.slane %v3716_v49, %v7930_v15  ;;  %v3652_v4 = vpop.permute.xlu1 %3651  ;;  %v3658_v57 = vpop.permute.xlu0 %3657 }
 0xe16   :  { %v4127_v13 = vcombine.low %v8438_v55, %v8441_v56  ;;  %v4128_v2 = vcombine.high %v8438_v55, %v8441_v56  ;;  %v4043_v7 = vcombine.low %v3944_v22, %v3956_v41  ;;  %v4044_v8 = vcombine.high %v3944_v22, %v3956_v41 }
 0xe17   :  { %v3803_v35 = vcombine.low %v3707_v58, %v3714_v60  ;;  %v6716_v26 = vcombine.high %v3707_v58, %v3714_v60  ;;  %v3819_v53 = vcombine.low %v3723_v63, %v3730_v1  ;;  %v6717_v6 = vcombine.high %v3723_v63, %v3730_v1 }
 0xe18   :  { %v4027_v9 = vcombine.low %v8408_v54, %v3950_v33  ;;  %v4028_v61 = vcombine.high %v8408_v54, %v3950_v33  ;;  %v4143_v44 = vcombine.low %v8444_v46, %v8447_v36  ;;  %v4144_v48 = vcombine.high %v8444_v46, %v8447_v36 }
 0xe19   :  { %v8464_v23 = vrot.slane %v3803_v35, %v7922_v0  ;;  %v8467_v10 = vrot.slane %v6716_v26, %v7922_v0  ;;  %v4051_v11 = vrot.slane %v4043_v7, %v7922_v0  ;;  %v4058_v12 = vrot.slane %v4044_v8, %v7922_v0  ;;  %v3664_v16 = vpop.permute.xlu1 %3663 }
 0xe1a   :  { %v4035_v14 = vrot.slane %v4027_v9, %v7922_v0  ;;  %v4042_v54 = vrot.slane %v4028_v61, %v7922_v0  ;;  %v8474_v17 = vrot.slane %v3819_v53, %v7922_v0  ;;  %v8477_v18 = vrot.slane %v6717_v6, %v7922_v0 }
 0xe1b   :  { %v3835_v19 = vcombine.low %v8464_v23, %v8467_v10  ;;  %v3836_v20 = vcombine.high %v8464_v23, %v8467_v10  ;;  %v3735_v25 = vcombine.low %v8417_v39, %v3658_v57  ;;  %v3736_v27 = vcombine.high %v8417_v39, %v3658_v57 }
 0xe1c   :  { %v4059_v21 = vcombine.low %v4035_v14, %v4051_v11  ;;  %v4060_v22 = vcombine.high %v4035_v14, %v4051_v11  ;;  %v4075_v24 = vcombine.low %v4042_v54, %v4058_v12  ;;  %v4076_v47 = vcombine.high %v4042_v54, %v4058_v12 }
 0xe1d   :  { %v3751_v28 = vcombine.low %v3652_v4, %v3664_v16  ;;  %v3752_v29 = vcombine.high %v3652_v4, %v3664_v16  ;;  %v3743_v33 = vrot.slane %v3735_v25, %v7922_v0  ;;  %v3750_v34 = vrot.slane %v3736_v27, %v7922_v0 }
 0xe1e   :  { %v4067_v51 = vrot.slane %v4059_v21, %v7930_v15  ;;  %v4074_v30 = vrot.slane %v4060_v22, %v7930_v15  ;;  %v4083_v31 = vrot.slane %v4075_v24, %v7930_v15  ;;  %v4090_v32 = vrot.slane %v4076_v47, %v7930_v15 }
 0xe1f   :  { %v3759_v37 = vrot.slane %v3751_v28, %v7922_v0  ;;  %v3766_v38 = vrot.slane %v3752_v29, %v7922_v0  ;;  %v3851_v53 = vcombine.low %v8474_v17, %v8477_v18  ;;  %v3852_v6 = vcombine.high %v8474_v17, %v8477_v18 }
 0xe20   :  { %v4163_v40 = vcombine.low %v4067_v51, %v4074_v30  ;;  %v6722_v39 = vcombine.high %v4067_v51, %v4074_v30  ;;  %v4179_v42 = vcombine.low %v4083_v31, %v4090_v32  ;;  %v6723_v43 = vcombine.high %v4083_v31, %v4090_v32 }
 0xe21   :  { %v3767_v45 = vcombine.low %v3743_v33, %v3759_v37  ;;  %v3768_v49 = vcombine.high %v3743_v33, %v3759_v37  ;;  %v3783_v46 = vcombine.low %v3750_v34, %v3766_v38  ;;  %v3784_v36 = vcombine.high %v3750_v34, %v3766_v38 }
 0xe22   :  { %v4170_v41 = vrot.slane %v4163_v40, %v7922_v0  ;;  %v4178_v58 = vrot.slane %v6722_v39, %v7922_v0  ;;  %v4186_v60 = vrot.slane %v4179_v42, %v7922_v0  ;;  %v4194_v63 = vrot.slane %v6723_v43, %v7922_v0 }
 0xe23   :  { %v3775_v1 = vrot.slane %v3767_v45, %v7930_v15  ;;  %v3782_v4 = vrot.slane %v3768_v49, %v7930_v15  ;;  %v3791_v35 = vrot.slane %v3783_v46, %v7930_v15  ;;  %v3798_v26 = vrot.slane %v3784_v36, %v7930_v15 }
 0xe24   :  { %v4195_v7 = vcombine.low %v4170_v41, %v4178_v58  ;;  %v4211_v8 = vcombine.low %v4186_v60, %v4194_v63  ;;  %v4135_v11 = vrot.slane %v4127_v13, %v7930_v15  ;;  %v4151_v12 = vrot.slane %v4143_v44, %v7930_v15 }
 0xe25   :  { %v3871_v9 = vcombine.low %v3775_v1, %v3782_v4  ;;  %v6718_v61 = vcombine.high %v3775_v1, %v3782_v4  ;;  %v3887_v23 = vcombine.low %v3791_v35, %v3798_v26  ;;  %v6719_v10 = vcombine.high %v3791_v35, %v3798_v26 }
 0xe26   :  { %v4142_v14 = vrot.slane %v4128_v2, %v7930_v15  ;;  %v4158_v54 = vrot.slane %v4144_v48, %v7930_v15  ;;  %v4159_v21 = vcombine.low %v4135_v11, %v4151_v12  ;;  %v3843_v13 = vrot.slane %v3835_v19, %v7930_v15 }
 0xe27   :  { %v3878_v57 = vrot.slane %v3871_v9, %v7922_v0  ;;  %v3886_v16 = vrot.slane %v6718_v61, %v7922_v0  ;;  %v3894_v17 = vrot.slane %v3887_v23, %v7922_v0  ;;  %v3902_v18 = vrot.slane %v6719_v10, %v7922_v0 }
 0xe28   :  { %v4161_v22 = vcombine.low %v4142_v14, %v4158_v54  ;;  %v3859_v44 = vrot.slane %v3851_v53, %v7930_v15  ;;  %v4196_v24 = vcombine.high %v4170_v41, %v4178_v58  ;;  %v4212_v56 = vcombine.high %v4186_v60, %v4194_v63  ;;  %7129 = vmatpush3.xpose.msk.msra.mxu1 %vm1405_vm5, %v4159_v21  ;;  %v7517_v63 = vld [vmem:[%s8979_s7] ss:$0 sm:$0xff] }
 0xe29   :  { %v3903_v47 = vcombine.low %v3878_v57, %v3886_v16  ;;  %v3919_v55 = vcombine.low %v3894_v17, %v3902_v18  ;;  %v3850_v48 = vrot.slane %v3836_v20, %v7930_v15  ;;  %7133 = vmatprep.subr.mxu1 %v7570_v52  ;;  %v4160_v25 = vcombine.high %v4135_v11, %v4151_v12 }
 0xe2a   :  { %7139 = vmatpush3.xpose.msk.msra.mxu0 %vm1405_vm5, %v4161_v22  ;;  %v3867_v2 = vcombine.low %v3843_v13, %v3859_v44  ;;  %v3866_v27 = vrot.slane %v3852_v6, %v7930_v15  ;;  %v4203_v19 = vrot.slane %v4195_v7, %v7930_v15  ;;  %v4219_v28 = vrot.slane %v4211_v8, %v7930_v15 }
 0xe2b   :  { %7148 = vmatprep.subr.mxu0 %v7570_v52  ;;  %v3911_v29 = vrot.slane %v3903_v47, %v7930_v15  ;;  %v3927_v51 = vrot.slane %v3919_v55, %v7930_v15  ;;  %v3904_v30 = vcombine.high %v3878_v57, %v3886_v16  ;;  %v3920_v31 = vcombine.high %v3894_v17, %v3902_v18 }
 0xe2c   :  { %7131 = vmatmul.mubr.msk.f32.vlgmr.msra.gmra.mrb[36].mxu1 %vm1405_vm5, %v3867_v2  ;;  %v3869_v20 = vcombine.low %v3850_v48, %v3866_v27  ;;  %v4227_v32 = vcombine.low %v4203_v19, %v4219_v28  ;;  %v4210_v33 = vrot.slane %v4196_v24, %v7930_v15  ;;  %v4226_v34 = vrot.slane %v4212_v56, %v7930_v15  ;;  %v6713_v56 = vld [vmem:[%s8915_s13 + $0x1] ss:$0 sm:$0xff]  ;;  %s8983_s13 = smov 16  }
 0xe2d   :  { %7134 = vmatpush3.xpose.msk.msra.mxu1 %vm1405_vm5, %v4160_v25  ;;  %7135 = vmatprep.mubr.msk.f32.mxu1 %vm7571_vm4, %v7570_v52  ;;  %v3868_v37 = vcombine.high %v3843_v13, %v3859_v44  ;;  %v3935_v38 = vcombine.low %v3911_v29, %v3927_v51  ;;  %v4162_v40 = vcombine.high %v4142_v14, %v4158_v54 }
 0xe2e   :  { %7141 = vmatmul.mubr.msk.f32.vlgmr.msra.gmra.mrb[16].mxu0 %vm1405_vm5, %v3869_v20  ;;  %7143 = vmatprep.subr.mxu1 %v7570_v52  ;;  %v3918_v39 = vrot.slane %v3904_v30, %v7930_v15  ;;  %v3934_v42 = vrot.slane %v3920_v31, %v7930_v15  ;;  %v4229_v43 = vcombine.low %v4210_v33, %v4226_v34 }
 0xe2f   :  { %7149 = vmatpush3.xpose.msk.msra.mxu0 %vm1405_vm5, %v4227_v32  ;;  %7150 = vmatprep.mubr.msk.f32.mxu0 %vm7571_vm4, %v7570_v52  ;;  %v3870_v45 = vcombine.high %v3850_v48, %v3866_v27  ;;  %v4228_v49 = vcombine.high %v4203_v19, %v4219_v28  ;;  %v3936_v46 = vcombine.high %v3911_v29, %v3927_v51 }
 0xe30   :  { %7136 = vmatmul.mubr.msk.f32.vlgmr.msra.gmra.mrb[38].mxu1 %vm1405_vm5, %v3868_v37  ;;  %7158 = vmatprep.subr.mxu0 %v7570_v52  ;;  %v3937_v36 = vcombine.low %v3918_v39, %v3934_v42  ;;  %v4230_v41 = vcombine.high %v4210_v33, %v4226_v34  ;;  %v3938_v58 = vcombine.high %v3918_v39, %v3934_v42 }
 0xe31   :  { %7144 = vmatpush3.xpose.msk.msra.mxu1 %vm1405_vm5, %v4162_v40  ;;  %7145 = vmatprep.mubr.msk.f32.mxu1 %vm7571_vm4, %v7570_v52  ;;  %v3639_v2 = vadd.f32 %v6713_v56, %v8398_v62  ;;  %v8596_v62 = vadd.f32 %v8396_v59, %v6713_v56 }
 0xe32   :  { %7153 = vmatprep.subr.mxu1 %v7570_v52  ;;  %7151 = vmatmul.mubr.msk.f32.vlgmr.msra.gmra.mrb[18].mxu0 %vm1405_vm5, %v3935_v38 }
 0xe33   :  { %7159 = vmatpush3.xpose.msk.msra.mxu0 %vm1405_vm5, %v4229_v43  ;;  %7160 = vmatprep.mubr.msk.f32.mxu0 %vm7571_vm4, %v7570_v52 }
 0xe34   :  { %7146 = vmatmul.mubr.msk.f32.vlgmr.msra.gmra.mrb[40].mxu1 %vm1405_vm5, %v3870_v45  ;;  %7168 = vmatprep.subr.mxu0 %v7570_v52 }
 0xe35   :  { %7154 = vmatpush3.xpose.msk.msra.mxu1 %vm1405_vm5, %v4228_v49  ;;  %7155 = vmatprep.mubr.msk.f32.mxu1 %vm7571_vm4, %v7570_v52 }
 0xe36   :  { %7163 = vmatprep.subr.mxu1 %v7570_v52  ;;  %7161 = vmatmul.mubr.msk.f32.vlgmr.msra.gmra.mrb[20].mxu0 %vm1405_vm5, %v3937_v36 }
 0xe37   :  { %7170 = vmatprep.mubr.msk.f32.mxu0 %vm7571_vm4, %v7570_v52 }
 0xe38   :  { %7156 = vmatmul.mubr.msk.f32.vlgmr.msra.gmra.mrb[42].mxu1 %vm1405_vm5, %v3936_v46 }
 0xe39   :  { %7164 = vmatpush3.xpose.msk.msra.mxu1 %vm1405_vm5, %v4230_v41  ;;  %7165 = vmatprep.mubr.msk.f32.mxu1 %vm7571_vm4, %v7570_v52 }
 0xe3a   :  { %7173 = vmatprep.subr.mxu1 %v7570_v52 }
 0xe3c   :  { %7166 = vmatmul.mubr.msk.f32.vlgmr.msra.gmra.mrb[44].mxu1 %vm1405_vm5, %v3938_v58 }
 0xe3d   :  { %7175 = vmatprep.mubr.msk.f32.mxu1 %vm7571_vm4, %v7570_v52 }
 0xeff   :  { %v4595_v60 = vpop.f32.mrb[36].mxu1 }
 0xf00   :  { %v4596_v1 = vadd.f32 %v7517_v63, %v4595_v60  ;;  %v7132_v4 = vpop.f32.mrb[37].mxu1 }
 0xf01   :  { %v4747_v35 = vpop.f32.mrb[16].mxu0 }
 0xf02   :  { %v4748_v26 = vadd.f32 %v7517_v63, %v4747_v35  ;;  %v7142_v53 = vpop.f32.mrb[17].mxu0  ;;  %v5131_v6 = vsel %vm1405_vm5, %v4596_v1, -inf }
 0xf03   :  { %5132 = vmax.xlane.f32.xlu0 %v5131_v6  ;;  %v4671_v7 = vpop.f32.mrb[38].mxu1 }
 0xf04   :  { %v4672_v8 = vadd.f32 %v7517_v63, %v4671_v7  ;;  %v7137_v9 = vpop.f32.mrb[39].mxu1  ;;  %v5137_v23 = vsel %vm1405_vm5, %v4748_v26, -inf }
 0xf05   :  { %v4899_v61 = vpop.f32.mrb[18].mxu0 }
 0xf06   :  { %v5134_v10 = vsel %vm1405_vm5, %v4672_v8, -inf  ;;  %v4900_v11 = vadd.f32 %v7517_v63, %v4899_v61  ;;  %v7152_v12 = vpop.f32.mrb[19].mxu0 }
 0xf07   :  { %5138 = vmax.xlane.f32.xlu0 %v5137_v23  ;;  %5135 = vmax.xlane.f32.xlu1 %v5134_v10  ;;  %v4823_v14 = vpop.f32.mrb[40].mxu1 }
 0xf08   :  { %v7147_v54 = vpop.f32.mrb[41].mxu1  ;;  %v5143_v57 = vsel %vm1405_vm5, %v4900_v11, -inf  ;;  %v4824_v17 = vadd.f32 %v7517_v63, %v4823_v14 }
 0xf09   :  { %v5051_v16 = vpop.f32.mrb[20].mxu0 }
 0xf0a   :  { %v7162_v18 = vpop.f32.mrb[21].mxu0  ;;  %v5052_v13 = vadd.f32 %v7517_v63, %v5051_v16  ;;  %v5140_v44 = vsel %vm1405_vm5, %v4824_v17, -inf }
 0xf0b   :  { %v4975_v21 = vpop.f32.mrb[42].mxu1  ;;  %5144 = vmax.xlane.f32.xlu0 %v5143_v57 }
 0xf0c   :  { %v7157_v22 = vpop.f32.mrb[43].mxu1  ;;  %v5149_v55 = vsel %vm1405_vm5, %v5052_v13, -inf  ;;  %v8587_v48 = vadd.f32 %v7517_v63, %v4975_v21 }
 0xf0e   :  { %v5146_v27 = vsel %vm1405_vm5, %v8587_v48, -inf }
 0xf0f   :  { %v5127_v24 = vpop.f32.mrb[44].mxu1  ;;  %5141 = vmax.xlane.f32.xlu0 %v5140_v44 }
 0xf10   :  { %v7167_v47 = vpop.f32.mrb[45].mxu1  ;;  %v8589_v25 = vadd.f32 %v7517_v63, %v5127_v24 }
 0xf12   :  { %v5152_v19 = vsel %vm1405_vm5, %v8589_v25, -inf }
 0xf13   :  { %5150 = vmax.xlane.f32.xlu0 %v5149_v55 }
 0xf18   :  { %4239 = vrot.lane.b32.xlu1 %v3639_v2, %s8981_s30 }
 0xf1c   :  { %4245 = vrot.lane.b32.xlu1 %v3639_v2, %s8982_s26 }
 0xf29   :  { %4233 = vrot.lane.b32.xlu0 %v3639_v2, %s8980_s2 }
 0xf40   :  { %5147 = vmax.xlane.f32.xlu1 %v5146_v27 }
 0xf44   :  { %5153 = vmax.xlane.f32.xlu1 %v5152_v19 }
 0xf55   :  { %4235 = vrot.lane.b32.xlu1 %v8596_v62, %s8980_s2 }
 0xf90   :  { %v5133_v28 = vpop.xlane.xlu0 %5132 }
 0xf91   :  { %v5155_v29 = vsub.f32 %v4596_v1, %v5133_v28 }
 0xf93   :  { %v5163_v51 = vmul.f32 1.442695, %v5155_v29 }
 0xf94   :  { %v5139_v30 = vpop.xlane.xlu0 %5138  ;;  %v5136_v31 = vpop.xlane.xlu1 %5135 }
 0xf95   :  { %7475 = vpow2.f32 %v5163_v51  ;;  %v5157_v20 = vsub.f32 %v4748_v26, %v5139_v30  ;;  %v5156_v32 = vsub.f32 %v4672_v8, %v5136_v31 }
 0xf97   :  { %v5167_v33 = vmul.f32 1.442695, %v5157_v20  ;;  %v5165_v34 = vmul.f32 1.442695, %v5156_v32 }
 0xf98   :  { %v5145_v37 = vpop.xlane.xlu0 %5144  ;;  %v4240_v42 = vpop.permute.xlu1 %4239 }
 0xf99   :  { %7477 = vpow2.f32 %v5167_v33  ;;  %v5159_v38 = vsub.f32 %v4900_v11, %v5145_v37  ;;  %v4251_v58 = vcombine.low %v3639_v2, %v4240_v42  ;;  %v4252_v60 = vcombine.high %v3639_v2, %v4240_v42 }
 0xf9a   :  { %7479 = vpow2.f32 %v5165_v34 }
 0xf9b   :  { %v5171_v40 = vmul.f32 1.442695, %v5159_v38  ;;  %v4259_v9 = vrot.slane %v4251_v58, %v7922_v0  ;;  %v4266_v61 = vrot.slane %v4252_v60, %v7922_v0 }
 0xf9c   :  { %v5142_v59 = vpop.xlane.xlu0 %5141  ;;  %v4246_v4 = vpop.permute.xlu1 %4245 }
 0xf9d   :  { %7481 = vpow2.f32 %v5171_v40  ;;  %v5158_v39 = vsub.f32 %v4824_v17, %v5142_v59 }
 0xf9f   :  { %v8600_v43 = vpop.eup %7475  ;;  %v5169_v45 = vmul.f32 1.442695, %v5158_v39 }
 0xfa0   :  { %v5179_v49 = vsel %vm1405_vm5, %v8600_v43, 0.0  ;;  %v5151_v46 = vpop.xlane.xlu0 %5150 }
 0xfa1   :  { %7483 = vpow2.f32 %v5169_v45  ;;  %5180 = vadd.xlane.f32.xlu0 %v5179_v49  ;;  %v5161_v36 = vsub.f32 %v5052_v13, %v5151_v46 }
 0xfa3   :  { %v8604_v41 = vpop.eup %7477  ;;  %v5175_v63 = vmul.f32 1.442695, %v5161_v36 }
 0xfa4   :  { %v8606_v1 = vpop.eup %7479  ;;  %v5185_v35 = vsel %vm1405_vm5, %v8604_v41, 0.0  ;;  %v4234_v26 = vpop.permute.xlu0 %4233 }
 0xfa5   :  { %7485 = vpow2.f32 %v5175_v63  ;;  %5186 = vadd.xlane.f32.xlu0 %v5185_v35  ;;  %v5182_v53 = vsel %vm1405_vm5, %v8606_v1, 0.0  ;;  %v4267_v6 = vcombine.low %v4234_v26, %v4246_v4  ;;  %v4268_v7 = vcombine.high %v4234_v26, %v4246_v4 }
 0xfa6   :  { %5183 = vadd.xlane.f32.xlu1 %v5182_v53 }
 0xfa7   :  { %v8612_v8 = vpop.eup %7481  ;;  %v4275_v23 = vrot.slane %v4267_v6, %v7922_v0  ;;  %v4282_v10 = vrot.slane %v4268_v7, %v7922_v0 }
 0xfa8   :  { %v5191_v11 = vsel %vm1405_vm5, %v8612_v8, 0.0 }
 0xfa9   :  { %v4283_v12 = vcombine.low %v4259_v9, %v4275_v23  ;;  %v4284_v14 = vcombine.high %v4259_v9, %v4275_v23  ;;  %v4299_v54 = vcombine.low %v4266_v61, %v4282_v10  ;;  %v4300_v57 = vcombine.high %v4266_v61, %v4282_v10 }
 0xfaa   :  { %5192 = vadd.xlane.f32.xlu1 %v5191_v11 }
 0xfab   :  { %v8620_v16 = vpop.eup %7483  ;;  %v4291_v17 = vrot.slane %v4283_v12, %v7930_v15  ;;  %v4298_v18 = vrot.slane %v4284_v14, %v7930_v15  ;;  %v4307_v21 = vrot.slane %v4299_v54, %v7930_v15  ;;  %v4314_v22 = vrot.slane %v4300_v57, %v7930_v15 }
 0xfac   :  { %v5188_v13 = vsel %vm1405_vm5, %v8620_v16, 0.0 }
 0xfad   :  { %v4387_v44 = vcombine.low %v4291_v17, %v4298_v18  ;;  %v6724_v24 = vcombine.high %v4291_v17, %v4298_v18  ;;  %v4403_v47 = vcombine.low %v4307_v21, %v4314_v22  ;;  %v6725_v55 = vcombine.high %v4307_v21, %v4314_v22 }
 0xfae   :  { %5189 = vadd.xlane.f32.xlu1 %v5188_v13 }
 0xfaf   :  { %v8628_v56 = vpop.eup %7485  ;;  %v4394_v2 = vrot.slane %v4387_v44, %v7922_v0  ;;  %v4402_v27 = vrot.slane %v6724_v24, %v7922_v0  ;;  %v4410_v19 = vrot.slane %v4403_v47, %v7922_v0  ;;  %v4418_v28 = vrot.slane %v6725_v55, %v7922_v0 }
 0xfb0   :  { %v5197_v29 = vsel %vm1405_vm5, %v8628_v56, 0.0 }
 0xfb1   :  { %5198 = vadd.xlane.f32.xlu0 %v5197_v29  ;;  %v4419_v51 = vcombine.low %v4394_v2, %v4402_v27  ;;  %v4435_v30 = vcombine.low %v4410_v19, %v4418_v28  ;;  %v4420_v31 = vcombine.high %v4394_v2, %v4402_v27  ;;  %v4436_v20 = vcombine.high %v4410_v19, %v4418_v28 }
 0xfb3   :  { %v4427_v32 = vrot.slane %v4419_v51, %v7930_v15  ;;  %v4443_v33 = vrot.slane %v4435_v30, %v7930_v15  ;;  %v4434_v34 = vrot.slane %v4420_v31, %v7930_v15  ;;  %v4450_v37 = vrot.slane %v4436_v20, %v7930_v15 }
 0xfb5   :  { %v4451_v38 = vcombine.low %v4427_v32, %v4443_v33  ;;  %v4452_v40 = vcombine.high %v4427_v32, %v4443_v33  ;;  %v4453_v59 = vcombine.low %v4434_v34, %v4450_v37  ;;  %v4454_v39 = vcombine.high %v4434_v34, %v4450_v37 }
 0xfb7   :  { %7169 = vmatpush3.msra.mxu0 %v4451_v38  ;;  %7174 = vmatpush3.msra.mxu1 %v4452_v40 }
 0xfb8   :  { %7178 = vmatprep.subr.mxu0 %v7570_v52  ;;  %7183 = vmatprep.subr.mxu1 %v7570_v52 }
 0xfbf   :  { %4247 = vrot.lane.b32.xlu1 %v8596_v62, %s8982_s26 }
 0xfcd   :  { %v5148_v42 = vpop.xlane.xlu1 %5147 }
 0xfce   :  { %v5160_v45 = vsub.f32 %v8587_v48, %v5148_v42 }
 0xfd0   :  { %v5173_v49 = vmul.f32 1.442695, %v5160_v45 }
 0xfd1   :  { %v5154_v46 = vpop.xlane.xlu1 %5153 }
 0xfd2   :  { %7487 = vpow2.f32 %v5173_v49  ;;  %v5162_v36 = vsub.f32 %v8589_v25, %v5154_v46 }
 0xfd4   :  { %v5177_v58 = vmul.f32 1.442695, %v5162_v36 }
 0xfd5   :  { %v4236_v26 = vpop.permute.xlu1 %4235 }
 0xfd6   :  { %7489 = vpow2.f32 %v5177_v58 }
 0xfdc   :  { %v8646_v60 = vpop.eup %7487 }
 0xfdd   :  { %v5194_v63 = vsel %vm1405_vm5, %v8646_v60, 0.0 }
 0xfde   :  { %5195 = vadd.xlane.f32.xlu0 %v5194_v63 }
 0xfe0   :  { %v8650_v4 = vpop.eup %7489 }
 0xfe1   :  { %v5200_v35 = vsel %vm1405_vm5, %v8650_v4, 0.0 }
 0xfe2   :  { %5201 = vadd.xlane.f32.xlu0 %v5200_v35 }
 0xff8   :  { %4241 = vrot.lane.b32.xlu0 %v8596_v62, %s8981_s30 }
0x102e   :  { %v5181_v48 = vpop.xlane.xlu0 %5180 }
0x102f   :  { %7491 = vrcp.f32 %v5181_v48 }
0x1032   :  { %v5187_v25 = vpop.xlane.xlu0 %5186 }
0x1033   :  { %7493 = vrcp.f32 %v5187_v25  ;;  %v5184_v53 = vpop.xlane.xlu1 %5183 }
0x1034   :  { %7495 = vrcp.f32 %v5184_v53 }
0x1037   :  { %v5193_v6 = vpop.xlane.xlu1 %5192 }
0x1039   :  { %v7492_v7 = vpop.eup %7491 }
0x103a   :  { %v5204_v9 = vmul.f32 %v7492_v7, %v8600_v43 }
0x103b   :  { %v5190_v61 = vpop.xlane.xlu1 %5189 }
0x103c   :  { %7171 = vmatmul.mubr.msk.f32.vlgmr.msra.gmra.mrb[22].mxu0 %vm1405_vm5, %v5204_v9  ;;  %7497 = vrcp.f32 %v5190_v61 }
0x103d   :  { %v7494_v23 = vpop.eup %7493  ;;  %7179 = vmatpush3.msra.mxu0 %v4453_v59  ;;  %7180 = vmatprep.mubr.msk.f32.mxu0 %vm7571_vm4, %v7570_v52  ;;  %7499 = vrcp.f32 %v5193_v6 }
0x103e   :  { %v7496_v10 = vpop.eup %7495  ;;  %v5208_v11 = vmul.f32 %v7494_v23, %v8604_v41  ;;  %7188 = vmatprep.subr.mxu0 %v7570_v52 }
0x103f   :  { %v5206_v12 = vmul.f32 %v7496_v10, %v8606_v1  ;;  %v5199_v1 = vpop.xlane.xlu0 %5198  ;;  %v4248_v54 = vpop.permute.xlu1 %4247 }
0x1040   :  { %7181 = vmatmul.mubr.msk.f32.vlgmr.msra.gmra.mrb[24].mxu0 %vm1405_vm5, %v5208_v11  ;;  %v4335_v17 = vcombine.low %v4236_v26, %v4248_v54  ;;  %v4336_v18 = vcombine.high %v4236_v26, %v4248_v54 }
0x1041   :  { %7176 = vmatmul.mubr.msk.f32.vlgmr.msra.gmra.mrb[46].mxu1 %vm1405_vm5, %v5206_v12  ;;  %7190 = vmatprep.mubr.msk.f32.mxu0 %vm7571_vm4, %v7570_v52 }
0x1042   :  { %7184 = vmatpush3.msra.mxu1 %v4454_v39  ;;  %7185 = vmatprep.mubr.msk.f32.mxu1 %vm7571_vm4, %v7570_v52  ;;  %v4343_v44 = vrot.slane %v4335_v17, %v7922_v0 }
0x1043   :  { %7193 = vmatprep.subr.mxu1 %v7570_v52 }
0x1046   :  { %v7498_v43 = vpop.eup %7497 }
0x1047   :  { %v5210_v41 = vmul.f32 %v7498_v43, %v8620_v16  ;;  %v4350_v16 = vrot.slane %v4336_v18, %v7922_v0  ;;  %v7500_v40 = vpop.eup %7499 }
0x1048   :  { %v5212_v53 = vmul.f32 %v7500_v40, %v8612_v8 }
0x1049   :  { %7186 = vmatmul.mubr.msk.f32.vlgmr.msra.gmra.mrb[48].mxu1 %vm1405_vm5, %v5210_v41 }
0x104a   :  { %7195 = vmatprep.mubr.msk.f32.mxu1 %vm7571_vm4, %v7570_v52 }
0x106b   :  { %v5196_v14 = vpop.xlane.xlu0 %5195 }
0x106c   :  { %7501 = vrcp.f32 %v5196_v14 }
0x106d   :  { %7503 = vrcp.f32 %v5199_v1 }
0x106f   :  { %v5202_v57 = vpop.xlane.xlu0 %5201 }
0x1070   :  { %7505 = vrcp.f32 %v5202_v57 }
0x1073   :  { %v4242_v21 = vpop.permute.xlu0 %4241 }
0x1074   :  { %v4319_v22 = vcombine.low %v8596_v62, %v4242_v21  ;;  %v4320_v13 = vcombine.high %v8596_v62, %v4242_v21 }
0x1076   :  { %v4327_v24 = vrot.slane %v4319_v22, %v7922_v0  ;;  %v4334_v47 = vrot.slane %v4320_v13, %v7922_v0  ;;  %v7502_v49 = vpop.eup %7501 }
0x1077   :  { %v7504_v58 = vpop.eup %7503  ;;  %v5214_v6 = vmul.f32 %v7502_v49, %v8646_v60 }
0x1078   :  { %v4351_v55 = vcombine.low %v4327_v24, %v4343_v44  ;;  %v4352_v2 = vcombine.high %v4327_v24, %v4343_v44  ;;  %v4367_v27 = vcombine.low %v4334_v47, %v4350_v16  ;;  %v4368_v19 = vcombine.high %v4334_v47, %v4350_v16 }
0x1079   :  { %v5216_v61 = vmul.f32 %v7504_v58, %v8628_v56 }
0x107a   :  { %v4359_v28 = vrot.slane %v4351_v55, %v7930_v15  ;;  %v4366_v29 = vrot.slane %v4352_v2, %v7930_v15  ;;  %v4375_v62 = vrot.slane %v4367_v27, %v7930_v15  ;;  %v4382_v51 = vrot.slane %v4368_v19, %v7930_v15  ;;  %v7506_v25 = vpop.eup %7505 }
0x107b   :  { %v5218_v23 = vmul.f32 %v7506_v25, %v8650_v4 }
0x107c   :  { %v4455_v30 = vcombine.low %v4359_v28, %v4366_v29  ;;  %v6726_v31 = vcombine.high %v4359_v28, %v4366_v29  ;;  %v4471_v20 = vcombine.low %v4375_v62, %v4382_v51  ;;  %v6727_v32 = vcombine.high %v4375_v62, %v4382_v51 }
0x107e   :  { %v4462_v33 = vrot.slane %v4455_v30, %v7922_v0  ;;  %v4470_v34 = vrot.slane %v6726_v31, %v7922_v0  ;;  %v4478_v37 = vrot.slane %v4471_v20, %v7922_v0  ;;  %v4486_v38 = vrot.slane %v6727_v32, %v7922_v0 }
0x1080   :  { %v4487_v59 = vcombine.low %v4462_v33, %v4470_v34  ;;  %v4503_v39 = vcombine.low %v4478_v37, %v4486_v38  ;;  %v4488_v42 = vcombine.high %v4462_v33, %v4470_v34  ;;  %v4504_v45 = vcombine.high %v4478_v37, %v4486_v38 }
0x1082   :  { %v4495_v46 = vrot.slane %v4487_v59, %v7930_v15  ;;  %v4511_v36 = vrot.slane %v4503_v39, %v7930_v15  ;;  %v4502_v63 = vrot.slane %v4488_v42, %v7930_v15  ;;  %v4518_v35 = vrot.slane %v4504_v45, %v7930_v15 }
0x1084   :  { %v4519_v48 = vcombine.low %v4495_v46, %v4511_v36  ;;  %v4520_v26 = vcombine.high %v4495_v46, %v4511_v36  ;;  %v4521_v7 = vcombine.low %v4502_v63, %v4518_v35  ;;  %v4522_v9 = vcombine.high %v4502_v63, %v4518_v35 }
0x1086   :  { %7189 = vmatpush3.msra.mxu0 %v4519_v48  ;;  %7194 = vmatpush3.msra.mxu1 %v4520_v26 }
0x1087   :  { %7191 = vmatmul.mubr.msk.f32.vlgmr.msra.gmra.mrb[26].mxu0 %vm1405_vm5, %v5212_v53  ;;  %7196 = vmatmul.mubr.msk.f32.vlgmr.msra.gmra.mrb[50].mxu1 %vm1405_vm5, %v5214_v6 }
0x1088   :  { %7198 = vmatprep.subr.mxu0 %v7570_v52  ;;  %7203 = vmatprep.subr.mxu1 %v7570_v52 }
0x1089   :  { %7199 = vmatpush3.msra.mxu0 %v4521_v7  ;;  %7204 = vmatpush3.msra.mxu1 %v4522_v9 }
0x108a   :  { %7200 = vmatprep.mubr.msk.f32.mxu0 %vm7571_vm4, %v7570_v52  ;;  %7205 = vmatprep.mubr.msk.f32.mxu1 %vm7571_vm4, %v7570_v52 }
0x108b   :  { %7201 = vmatmul.mubr.msk.f32.vlgmr.msra.gmra.mrb[28].mxu0 %vm1405_vm5, %v5216_v61  ;;  %7206 = vmatmul.mubr.msk.f32.vlgmr.msra.gmra.mrb[52].mxu1 %vm1405_vm5, %v5218_v23 }
0x110f   :  { %v5288_v8 = vpop.f32.mrb[22].mxu0 }
0x1110   :  { %v7172_v60 = vpop.f32.mrb[23].mxu0 }
0x1113   :  { %v5434_v10 = vpop.f32.mrb[24].mxu0 }
0x1114   :  { %v5361_v11 = vpop.f32.mrb[46].mxu1  ;;  %v5803_v12 = vcombine.low %v5288_v8, %v5434_v10  ;;  %v5804_v56 = vcombine.high %v5288_v8, %v5434_v10  ;;  %v7182_v43 = vpop.f32.mrb[25].mxu0 }
0x1115   :  { %v7177_v4 = vpop.f32.mrb[47].mxu1  ;;  %v6756_v43 = vld [vmem:[%s8916_s14 + $0x20] sm:$0xff] }
0x1116   :  { %v5811_v57 = vrot.slane %v5803_v12, %v7922_v0  ;;  %v5818_v17 = vrot.slane %v5804_v56, %v7922_v0  ;;  %v6757_v4 = vld [vmem:[%s8916_s14 + $0x28] sm:$0xff] }
0x111c   :  { %v5507_v41 = vpop.f32.mrb[48].mxu1 }
0x111d   :  { %v5819_v1 = vcombine.low %v5361_v11, %v5507_v41  ;;  %v5820_v14 = vcombine.high %v5361_v11, %v5507_v41  ;;  %v7187_v54 = vpop.f32.mrb[49].mxu1 }
0x111f   :  { %v5827_v18 = vrot.slane %v5819_v1, %v7922_v0  ;;  %v5834_v21 = vrot.slane %v5820_v14, %v7922_v0 }
0x1121   :  { %v5835_v22 = vcombine.low %v5811_v57, %v5827_v18  ;;  %v5836_v13 = vcombine.high %v5811_v57, %v5827_v18  ;;  %v5851_v44 = vcombine.low %v5818_v17, %v5834_v21  ;;  %v5852_v16 = vcombine.high %v5818_v17, %v5834_v21 }
0x1122   :  { %v7376_v57 = vpack.c.bf16 %v6757_v4, %v6756_v43  ;;  %v6769_v43 = vld [vmem:[%s8920_s18 + $0x28] sm:$0xff] }
0x1123   :  { %v5843_v24 = vrot.slane %v5835_v22, %v7930_v15  ;;  %v5850_v47 = vrot.slane %v5836_v13, %v7930_v15  ;;  %v5859_v55 = vrot.slane %v5851_v44, %v7930_v15  ;;  %v5866_v2 = vrot.slane %v5852_v16, %v7930_v15  ;;  %v6758_v13 = vld [vmem:[%s8916_s14 + $0x30] sm:$0xff]  ;;  %v6759_v44 = vld [vmem:[%s8916_s14 + $0x38] sm:$0xff] }
0x1124   :  { %7377 = vmatprep.subr.bf16.mxu0 %v7376_v57 }
0x1125   :  { %v5939_v27 = vcombine.low %v5843_v24, %v5850_v47  ;;  %v6752_v19 = vcombine.high %v5843_v24, %v5850_v47  ;;  %v5955_v28 = vcombine.low %v5859_v55, %v5866_v2  ;;  %v6753_v29 = vcombine.high %v5859_v55, %v5866_v2  ;;  %7379 = vmatpush3.bf16.msra.mxu0 %v7376_v57 }
0x1126   :  { %v7380_v2 = vpack.c.bf16 %v6759_v44, %v6758_v13  ;;  %v6766_v44 = vld [vmem:[%s8918_s16 + $0x1] ss:$0 sm:$0xff] }
0x1127   :  { %v5946_v62 = vrot.slane %v5939_v27, %v7922_v0  ;;  %v5954_v51 = vrot.slane %v6752_v19, %v7922_v0  ;;  %v5962_v30 = vrot.slane %v5955_v28, %v7922_v0  ;;  %v5970_v31 = vrot.slane %v6753_v29, %v7922_v0 }
0x1128   :  { %7381 = vmatprep.subr.bf16.mxu0 %v7380_v2 }
0x1129   :  { %v5972_v20 = vcombine.high %v5946_v62, %v5954_v51  ;;  %v5988_v32 = vcombine.high %v5962_v30, %v5970_v31  ;;  %v5971_v33 = vcombine.low %v5946_v62, %v5954_v51  ;;  %v5987_v34 = vcombine.low %v5962_v30, %v5970_v31  ;;  %7383 = vmatpush3.bf16.msra.mxu0 %v7380_v2 }
0x112b   :  { %v5986_v37 = vrot.slane %v5972_v20, %v7930_v15  ;;  %v6002_v38 = vrot.slane %v5988_v32, %v7930_v15  ;;  %v8721_v40 = vrot.slane %v5971_v33, %v7930_v15  ;;  %v8724_v59 = vrot.slane %v5987_v34, %v7930_v15 }
0x112d   :  { %v6005_v39 = vcombine.low %v5986_v37, %v6002_v38  ;;  %v6004_v42 = vcombine.high %v8721_v40, %v8724_v59  ;;  %v6006_v45 = vcombine.high %v5986_v37, %v6002_v38  ;;  %v6003_v49 = vcombine.low %v8721_v40, %v8724_v59  ;;  %v6761_v40 = vld [vmem:[%s8917_s15 + $0x1] ss:$0 sm:$0xff] }
0x112f   :  { %6085 = vrot.lane.b32.xlu0 %v6005_v39, %s8983_s13  ;;  %6077 = vrot.lane.b32.xlu1 %v6004_v42, %s8984_s12 }
0x1133   :  { %6093 = vrot.lane.b32.xlu0 %v6006_v45, %s8985_s5 }
0x115a   :  { %v5580_v46 = vpop.f32.mrb[26].mxu0  ;;  %v5653_v36 = vpop.f32.mrb[50].mxu1 }
0x115b   :  { %v7192_v58 = vpop.f32.mrb[27].mxu0  ;;  %v7197_v63 = vpop.f32.mrb[51].mxu1 }
0x115e   :  { %v5726_v35 = vpop.f32.mrb[28].mxu0  ;;  %v5799_v48 = vpop.f32.mrb[52].mxu1 }
0x115f   :  { %v5871_v26 = vcombine.low %v5580_v46, %v5726_v35  ;;  %v5872_v25 = vcombine.high %v5580_v46, %v5726_v35  ;;  %v5887_v53 = vcombine.low %v5653_v36, %v5799_v48  ;;  %v5888_v6 = vcombine.high %v5653_v36, %v5799_v48  ;;  %v7202_v7 = vpop.f32.mrb[29].mxu0  ;;  %v7207_v9 = vpop.f32.mrb[53].mxu1 }
0x1161   :  { %v5879_v61 = vrot.slane %v5871_v26, %v7922_v0  ;;  %v5886_v23 = vrot.slane %v5872_v25, %v7922_v0  ;;  %v5895_v8 = vrot.slane %v5887_v53, %v7922_v0  ;;  %v5902_v60 = vrot.slane %v5888_v6, %v7922_v0 }
0x1163   :  { %v5903_v10 = vcombine.low %v5879_v61, %v5895_v8  ;;  %v5904_v11 = vcombine.high %v5879_v61, %v5895_v8  ;;  %v5919_v12 = vcombine.low %v5886_v23, %v5902_v60  ;;  %v5920_v56 = vcombine.high %v5886_v23, %v5902_v60 }
0x1165   :  { %v5911_v41 = vrot.slane %v5903_v10, %v7930_v15  ;;  %v5918_v1 = vrot.slane %v5904_v11, %v7930_v15  ;;  %v5927_v14 = vrot.slane %v5919_v12, %v7930_v15  ;;  %v5934_v54 = vrot.slane %v5920_v56, %v7930_v15  ;;  %v6768_v56 = vld [vmem:[%s8920_s18 + $0x20] sm:$0xff] }
0x1166   :  { %v7384_v4 = vpack.c.bf16 %v6769_v43, %v6768_v56 }
0x1167   :  { %v6007_v17 = vcombine.low %v5911_v41, %v5918_v1  ;;  %v6754_v18 = vcombine.high %v5911_v41, %v5918_v1  ;;  %v6023_v21 = vcombine.low %v5927_v14, %v5934_v54  ;;  %v6755_v22 = vcombine.high %v5927_v14, %v5934_v54  ;;  %v6770_v41 = vld [vmem:[%s8920_s18 + $0x30] sm:$0xff]  ;;  %v6771_v1 = vld [vmem:[%s8920_s18 + $0x38] sm:$0xff] }
0x1168   :  { %v7388_v14 = vpack.c.bf16 %v6771_v1, %v6770_v41  ;;  %7385 = vmatprep.subr.bf16.mxu1 %v7384_v4 }
0x1169   :  { %v6014_v16 = vrot.slane %v6007_v17, %v7922_v0  ;;  %v6022_v24 = vrot.slane %v6754_v18, %v7922_v0  ;;  %v6030_v47 = vrot.slane %v6023_v21, %v7922_v0  ;;  %v6038_v55 = vrot.slane %v6755_v22, %v7922_v0  ;;  %7387 = vmatpush3.bf16.msra.mxu1 %v7384_v4 }
0x116a   :  { %7389 = vmatprep.subr.bf16.mxu1 %v7388_v14 }
0x116b   :  { %v6039_v27 = vcombine.low %v6014_v16, %v6022_v24  ;;  %v6055_v19 = vcombine.low %v6030_v47, %v6038_v55  ;;  %v6040_v28 = vcombine.high %v6014_v16, %v6022_v24  ;;  %v6056_v29 = vcombine.high %v6030_v47, %v6038_v55  ;;  %v6767_v24 = vld [vmem:[%s8919_s17 + $0x1] ss:$0 sm:$0xff]  ;;  %s6601_s17 = sshll.u32 %s7577_s6, 4  ;;  %s6602_s17 = int_to_ptr.vmem [resolvable:$true] %s6601_s17 }
0x116c   :  { %p7523_p1 = scmp.lt.s32.totalorder %s6602_s17, %s6602_s17 }
0x116d   :  { %v6047_v62 = vrot.slane %v6039_v27, %v7930_v15  ;;  %v6063_v51 = vrot.slane %v6055_v19, %v7930_v15  ;;  %v6054_v30 = vrot.slane %v6040_v28, %v7930_v15  ;;  %v6070_v31 = vrot.slane %v6056_v29, %v7930_v15  ;;  %7391 = vmatpush3.bf16.msra.mxu1 %v7388_v14  ;;  %v6776_v29 = vld [vmem:[%s8922_s20 + $0x40] sm:$0xff] }
0x116e   :  { %7408 = vmatprep.subr.bf16.mxu1 %v7566_v3 }
0x116f   :  { %v6072_v20 = vcombine.high %v6047_v62, %v6063_v51  ;;  %v6073_v32 = vcombine.low %v6054_v30, %v6070_v31  ;;  %v6074_v33 = vcombine.high %v6054_v30, %v6070_v31  ;;  %v6071_v0 = vcombine.low %v6047_v62, %v6063_v51  ;;  %v6777_v62 = vld [vmem:[%s8922_s20 + $0x48] sm:$0xff]  ;;  %v6778_v30 = vld [vmem:[%s8922_s20 + $0x50] sm:$0xff]  ;;  %v6779_v31 = vld [vmem:[%s8922_s20 + $0x58] sm:$0xff] }
0x1170   :  { %v7392_v51 = vpack.c.bf16 %v6777_v62, %v6776_v29  ;;  %v6789_v29 = vld [vmem:[%s8925_s23] ss:$0 sm:$0xff] }
0x1171   :  { %6079 = vrot.lane.b32.xlu1 %v6072_v20, %s8984_s12  ;;  %v6780_v20 = vld [vmem:[%s8922_s20 + $0x60] sm:$0xff] }
0x1172   :  { %7393 = vmatprep.subr.bf16.mxu0 %v7392_v51 }
0x1175   :  { %6087 = vrot.lane.b32.xlu1 %v6073_v32, %s8983_s13  ;;  %v6781_v32 = vld [vmem:[%s8922_s20 + $0x68] sm:$0xff] }
0x1179   :  { %6095 = vrot.lane.b32.xlu1 %v6074_v33, %s8985_s5  ;;  %v7400_v33 = vpack.c.bf16 %v6781_v32, %v6780_v20 }
0x11a1   :  { %v6086_v34 = vpop.permute.xlu0 %6085  ;;  %v6078_v37 = vpop.permute.xlu1 %6077 }
0x11a2   :  { %v6099_v38 = vsel %vm1405_vm5, %v6003_v49, %v6078_v37 }
0x11a3   :  { %v6101_v15 = vsel %vm2984_vm6, %v6099_v38, %v6086_v34  ;;  %v6783_v34 = vld [vmem:[%s8922_s20 + $0x78] sm:$0xff]  ;;  %v6773_v38 = vld [vmem:[%s8921_s19 + $0x1] ss:$0 sm:$0xff] }
0x11a5   :  { %v6094_v39 = vpop.permute.xlu0 %6093 }
0x11a6   :  { %v6103_v42 = vsel %vm2987_vm7, %v6101_v15, %v6094_v39 }
0x11a7   :  { %7216 = vmatprep.mubr.msk.f32.mxu0 %vm213_vm3, %v6103_v42 }
0x11e3   :  { %v6080_v45 = vpop.permute.xlu1 %6079 }
0x11e4   :  { %v6100_v36 = vsel %vm1405_vm5, %v6071_v0, %v6080_v45  ;;  %v6782_v0 = vld [vmem:[%s8922_s20 + $0x70] sm:$0xff] }
0x11e5   :  { %v7404_v37 = vpack.c.bf16 %v6783_v34, %v6782_v0 }
0x11e7   :  { %v6088_v46 = vpop.permute.xlu1 %6087 }
0x11e8   :  { %v6102_v58 = vsel %vm2984_vm6, %v6100_v36, %v6088_v46 }
0x11eb   :  { %v6096_v63 = vpop.permute.xlu1 %6095 }
0x11ec   :  { %v6104_v35 = vsel %vm2987_vm7, %v6102_v58, %v6096_v63 }
0x11ed   :  { %7217 = vmatmul.mubr.msk.f32.vlgmr.msra.gmra.mrb[30].mxu0 %vm213_vm3, %v6104_v35 }
0x11ee   :  { %7395 = vmatpush3.bf16.msra.mxu0 %v7392_v51 }
0x12c0   :  { %v7218_v59 = vpop.f32.mrb[30].mxu0 }
0x12c1   :  { %v6196_v49 = vadd.f32 %v7218_v59, %v6761_v40  ;;  %v6190_v48 = vpop.f32.mrb[31].mxu0 }
0x12c2   :  { %v6191_v26 = vadd.f32 %v6761_v40, %v6190_v48 }
0x12c3   :  { %v8779_v25 = vadd.f32 %v6196_v49, %v8326_v5 }
0x12c4   :  { %v8782_v53 = vadd.f32 %v6191_v26, %v8329_v50 }
0x12c5   :  { %v6208_v6 = vsel %vm213_vm3, %v8779_v25, 0.0 }
0x12c6   :  { %6209 = vadd.xlane.f32.xlu1 %v6208_v6  ;;  %v6205_v7 = vsel %vm213_vm3, %v8782_v53, 0.0  ;;  %v6785_v6 = vld [vmem:[%s8923_s21 + $0x1] ss:$0 sm:$0xff] }
0x12c7   :  { %6206 = vadd.xlane.f32.xlu0 %v6205_v7 }
0x1353   :  { %v6210_v9 = vpop.xlane.xlu1 %6209 }
0x1354   :  { %v6212_v61 = vmul.f32 0.03125, %v6210_v9  ;;  %v6207_v23 = vpop.xlane.xlu0 %6206 }
0x1355   :  { %v6211_v8 = vmul.f32 0.03125, %v6207_v23 }
0x1356   :  { %v6214_v60 = vsub.f32 %v8779_v25, %v6212_v61 }
0x1357   :  { %v6213_v5 = vsub.f32 %v8782_v53, %v6211_v8 }
0x1358   :  { %v6216_v11 = vmul.f32 %v6214_v60, %v6214_v60 }
0x1359   :  { %v6215_v10 = vmul.f32 %v6213_v5, %v6213_v5 }
0x135a   :  { %v6220_v12 = vsel %vm213_vm3, %v6216_v11, 0.0 }
0x135b   :  { %v6217_v50 = vsel %vm213_vm3, %v6215_v10, 0.0 }
0x135c   :  { %6218 = vadd.xlane.f32.xlu0 %v6217_v50 }
0x1360   :  { %6221 = vadd.xlane.f32.xlu0 %v6220_v12 }
0x13e9   :  { %v6219_v54 = vpop.xlane.xlu0 %6218 }
0x13ea   :  { %v6223_v57 = vmul.f32 0.03125, %v6219_v54  ;;  %v6511_v54 = vld [vmem:[%s8926_s24] sm:$0xff] }
0x13ec   :  { %v6225_v17 = vadd.f32 1e-06, %v6223_v57  ;;  %v6512_v57 = vld [vmem:[%s8926_s24 + $0x8] sm:$0xff] }
0x13ed   :  { %v6222_v18 = vpop.xlane.xlu0 %6221 }
0x13ee   :  { %7507 = vrsqrt.f32 %v6225_v17  ;;  %v6224_v21 = vmul.f32 0.03125, %v6222_v18  ;;  %v6513_v17 = vld [vmem:[%s8926_s24 + $0x10] sm:$0xff]  ;;  %v7409_v18 = vpack.c.bf16 %v6512_v57, %v6511_v54 }
0x13f0   :  { %v6226_v22 = vadd.f32 1e-06, %v6224_v21  ;;  %v6514_v21 = vld [vmem:[%s8926_s24 + $0x18] sm:$0xff] }
0x13f2   :  { %7509 = vrsqrt.f32 %v6226_v22  ;;  %v7412_v22 = vpack.c.bf16 %v6514_v21, %v6513_v17 }
0x13f8   :  { %v7508_v13 = vpop.eup %7507 }
0x13f9   :  { %v6229_v16 = vmul.f32 %v7508_v13, %v6213_v5 }
0x13fb   :  { %v6237_v47 = vmul.f32 %v6766_v44, %v6229_v16 }
0x13fc   :  { %v7510_v55 = vpop.eup %7509 }
0x13fd   :  { %v6230_v2 = vmul.f32 %v7510_v55, %v6214_v60  ;;  %v6245_v27 = vadd.f32 %v6767_v24, %v6237_v47 }
0x13ff   :  { %v6238_v19 = vmul.f32 %v6766_v44, %v6230_v2  ;;  %7227 = vmatprep.mubr.msk.f32.mxu1 %vm213_vm3, %v6245_v27  ;;  %v6788_v2 = vld [vmem:[%s8924_s22] ss:$0 sm:$0xff]  ;;  %s7518_s22 = scalar_lea.vmem %s6602_s17, 32 }
0x1400   :  { %p7519_p0 = scmp.ne.s32.totalorder %s6602_s17, %s7518_s22  ;;  %p7524_p2 = scmp.lt.s32.totalorder %s7518_s22, %s7518_s22 }
0x1401   :  { %v6246_v28 = vadd.f32 %v6767_v24, %v6238_v19 }
0x1402   :  { %p7525_p3 = por %p7524_p2, %p7523_p1 }
0x1403   :  { %7228 = vmatmul.mubr.msk.f32.vlgmr.msra.gmra.mrb[54].mxu1 %vm213_vm3, %v6246_v28 }
0x1404   :  { %7257 = vmatprep.mubr.msk.f32.mxu1 %vm7571_vm4, %v7570_v52  ;;  %v7396_v52 = vpack.c.bf16 %v6779_v31, %v6778_v30  ;;  %7410 = vmatpush3.bf16.msra.mxu1 %v7409_v18  ;;  %p7526_p4 = pnand %p7525_p3, %p7519_p0 }
0x1405   :  { %7411 = vmatprep.subr.bf16.mxu1 %v7566_v3 }
0x1406   :  { %7397 = vmatprep.subr.bf16.mxu0 %v7396_v52 }
0x1407   :  { %7399 = vmatpush3.bf16.msra.mxu0 %v7396_v52 }
0x1408   :  { %7401 = vmatprep.subr.bf16.mxu0 %v7400_v33  ;;  %7413 = vmatpush3.bf16.msra.mxu1 %v7412_v22 }
0x140b   :  { %7403 = vmatpush3.bf16.msra.mxu0 %v7400_v33 }
0x140c   :  { %7405 = vmatprep.subr.bf16.mxu0 %v7404_v37 }
0x140f   :  { %7407 = vmatpush3.bf16.msra.mxu0 %v7404_v37 }
0x14d6   :  { %v7229_v39 = vpop.f32.mrb[54].mxu1 }
0x14d7   :  { %v6338_v15 = vadd.f32 %v7229_v39, %v6773_v38  ;;  %v6332_v42 = vpop.f32.mrb[55].mxu1 }
0x14d8   :  { %v6333_v45 = vadd.f32 %v6773_v38, %v6332_v42 }
0x14d9   :  { %v6344_v46 = vmul.f32 0.70710677, %v6338_v15  ;;  %v6342_v49 = vmul.f32 0.5, %v6338_v15 }
0x14da   :  { %v6343_v36 = vmul.f32 0.70710677, %v6333_v45  ;;  %v6341_v40 = vmul.f32 0.5, %v6333_v45 }
0x14db   :  { %7511 = verf.f32 %v6344_v46 }
0x14dc   :  { %7513 = verf.f32 %v6343_v36 }
0x14e5   :  { %v7512_v58 = vpop.eup %7511 }
0x14e6   :  { %v7514_v63 = vpop.eup %7513  ;;  %v6348_v35 = vadd.f32 1.0, %v7512_v58 }
0x14e7   :  { %v6347_v59 = vadd.f32 1.0, %v7514_v63 }
0x14e8   :  { %v6350_v26 = vmul.f32 %v6348_v35, %v6342_v49 }
0x14e9   :  { %v6349_v48 = vmul.f32 %v6347_v59, %v6341_v40 }
0x14eb   :  { %7246 = vmatprep.mubr.msk.f32.mxu0 %vm120_vm0, %v6349_v48 }
0x14ec   :  { %7247 = vmatmul.mubr.msk.f32.vlgmr.msra.gmra.mrb[32].mxu0 %vm120_vm0, %v6350_v26 }
0x15bf   :  { %v7248_v7 = vpop.f32.mrb[32].mxu0 }
0x15c0   :  { %v6446_v9 = vadd.f32 %v7248_v7, %v6785_v6  ;;  %v6440_v61 = vpop.f32.mrb[33].mxu0 }
0x15c1   :  { %v6441_v23 = vadd.f32 %v6785_v6, %v6440_v61 }
0x15c2   :  { %v6450_v8 = vadd.f32 %v6446_v9, %v8779_v25 }
0x15c3   :  { %v6449_v60 = vadd.f32 %v6441_v23, %v8782_v53 }
0x15c4   :  { %v6455_v5 = vrot.slane %v6450_v8, 7 }
0x15c6   :  { %v6457_v10 = vsel %vm6456_vm8, %v6455_v5, %v6449_v60 }
0x15c7   :  { %v6460_v50 = vsel %vm6459_vm9, %v6457_v10, 0.0 }
0x15c8   :  { %6461 = vadd.xlane.f32.xlu0 %v6460_v50 }
0x1655   :  { %v6462_v11 = vpop.xlane.xlu0 %6461 }
0x1656   :  { %v6463_v12 = vmul.f32 0.03125, %v6462_v11 }
0x1658   :  { %v6465_v56 = vrot.slane %v6463_v12, 1  ;;  %v6468_v43 = vsub.f32 %v6449_v60, %v6463_v12 }
0x165a   :  { %v6469_v4 = vsub.f32 %v6450_v8, %v6465_v56  ;;  %v6470_v1 = vmul.f32 %v6468_v43, %v6468_v43 }
0x165c   :  { %v6471_v41 = vmul.f32 %v6469_v4, %v6469_v4 }
0x165e   :  { %v6474_v14 = vrot.slane %v6471_v41, 7 }
0x1660   :  { %v6475_v25 = vsel %vm6456_vm8, %v6474_v14, %v6470_v1 }
0x1661   :  { %v6477_v53 = vsel %vm6459_vm9, %v6475_v25, 0.0 }
0x1662   :  { %6478 = vadd.xlane.f32.xlu1 %v6477_v53 }
0x16ef   :  { %v6479_v13 = vpop.xlane.xlu1 %6478 }
0x16f0   :  { %v6480_v44 = vmul.f32 0.03125, %v6479_v13 }
0x16f2   :  { %v6481_v16 = vadd.f32 1e-06, %v6480_v44 }
0x16f4   :  { %7515 = vrsqrt.f32 %v6481_v16 }
0x16fe   :  { %v7516_v24 = vpop.eup %7515 }
0x16ff   :  { %v6484_v47 = vrot.slane %v7516_v24, 1  ;;  %v6487_v55 = vmul.f32 %v7516_v24, %v6468_v43 }
0x1701   :  { %v6488_v27 = vmul.f32 %v6484_v47, %v6469_v4  ;;  %v6495_v19 = vmul.f32 %v6788_v2, %v6487_v55 }
0x1703   :  { %v6496_v28 = vmul.f32 %v6788_v2, %v6488_v27  ;;  %v6503_v62 = vadd.f32 %v6789_v29, %v6495_v19 }
0x1705   :  { %v6504_v3 = vadd.f32 %v6789_v29, %v6496_v28 }
0x1707   :  { %v6507_v51 = vrot.slane %v6504_v3, 7 }
0x1709   :  { %v6508_v30 = vsel %vm6456_vm8, %v6507_v51, %v6503_v62 }
0x170a   :  { %7258 = vmatmul.mubr.msk.f32.vlgmr.msra.gmra.mrb[56].mxu1 %vm213_vm3, %v6508_v30  ;;  %6510 = vst.msk [vmem:[#allocation2] sm:$0x3] %vm6459_vm9, %v6508_v30 }
0x170b   :  { %7529 = shalt.err (!%p7526_p4)
}
0x170c   :  { %s8986_s28 = sld [smem:[#allocation21_spill]] }
0x1712   :  { %s7530_s11 = scalar_lea.hbm %s8986_s28, 32 }
0x1713   :  { %p7531_p5 = scmp.ne.s32.totalorder %s8986_s28, %s7530_s11  ;;  %p7534_p6 = scmp.lt.u32.totalorder %s7530_s11, %s8986_s28 }
0x1715   :  { %p7536_p7 = pnand %p7534_p6, %p7531_p5 }
0x1717   :  { %7539 = shalt.err (!%p7536_p7)
}
0x1718   :  { %6604 = dma.vmem_to_hbm [thread:$0]  %s6602_s17, 32, %s8986_s28, [#allocation3]  }
0x1719   :  { %s8987_s30 = sld [smem:[#allocation20_spill]]  ;;  %s7578_s26 = smov [#allocation4]  }
0x171a   :  { %s6611_s19 = sshll.u32 %s7578_s26, 4  ;;  %s6612_s19 = int_to_ptr.vmem [resolvable:$true] %s6611_s19 }
0x171b   :  { %s7540_s20 = scalar_lea.vmem %s6612_s19, 32  ;;  %p7545_p9 = scmp.lt.s32.totalorder %s6612_s19, %s6612_s19 }
0x171c   :  { %p7541_p8 = scmp.ne.s32.totalorder %s6612_s19, %s7540_s20  ;;  %p7546_p10 = scmp.lt.s32.totalorder %s7540_s20, %s7540_s20 }
0x171e   :  { %p7547_p11 = por %p7546_p10, %p7545_p9 }
0x171f   :  { %v6790_v31 = vld [vmem:[%s8987_s30] ss:$0 sm:$0xff] }
0x1720   :  { %p7548_p12 = pnand %p7547_p11, %p7541_p8 }
0x17dd   :  { %v6590_v52 = vpop.f32.mrb[56].mxu1 }
0x17de   :  { %v6591_v20 = vadd.f32 %v6790_v31, %v6590_v52  ;;  %v7259_v32 = vpop.f32.mrb[57].mxu1 }
0x17e0   :  { %6594 = vst [vmem:[#allocation4] sm:$0x3] %v6591_v20 }
0x17e1   :  { %7551 = shalt.err (!%p7548_p12)
}
0x17e2   :  { %s8988_s1 = sld [smem:[#allocation22_spill]] }
0x17e8   :  { %s7552_s7 = scalar_lea.hbm %s8988_s1, 32 }
0x17e9   :  { %p7553_p13 = scmp.ne.s32.totalorder %s8988_s1, %s7552_s7  ;;  %p7556_p0 = scmp.lt.u32.totalorder %s7552_s7, %s8988_s1 }
0x17eb   :  { %p7558_p1 = pnand %p7556_p0, %p7553_p13 }
0x17ed   :  { %7561 = shalt.err (!%p7558_p1)
}
0x17ee   :  { %6614 = dma.vmem_to_hbm [thread:$0]  %s6612_s19, 32, %s8988_s1, [#allocation5]  }
0x17ef   :  { %7562 = dma.done.wait [#allocation3], 32  }
0x17f0   :  { %7563 = vsyncadd [#allocation3], 4294967264 }
0x17f1   :  { %7564 = dma.done.wait [#allocation5], 32  }
0x17f2   :  { %7565 = vsyncadd [#allocation5], 4294967264 }
0x17f3   :  { %6621 = vsyncpa [#allocation3], 1 }
0x17f4   :  { %6622 = vsyncpa [#allocation5], 1 }

</bundles_post_ra>
